<compile_context>
chip_gen: v5e
topology: v5e:2x2
jax: 0.10.0
libtpu: 0.0.40
codegen_flags: <defaults>
</compile_context>

<pallas_src>
import functools

import jax
import jax.numpy as jnp
from jax.experimental import pallas as pl
from jax.experimental.pallas import tpu as pltpu

_BN_EPS = 1e-5
_LANE = 128
_VMEM_LIMIT = 48 * 1024 * 1024      # per-kernel scoped VMEM limit (v7x-safe)
_VMEM_BUDGET = 40 * 1024 * 1024     # block-sizing budget (leave headroom)


def _round_up(x, m):
    return (x + m - 1) // m * m


def _pick_tile(c, pref):
    """Largest multiple of 128 that divides c (c is a multiple of 128), <= pref."""
    t = min(c, pref)
    while c % t != 0:
        t -= _LANE
    return t


# ---------------------------------------------------------------------------
# Pallas kernel: fused 3x3 conv (stride 1, kw pre-folded into K) + folded BN
# [+ residual] + ReLU.
#   x_ref     : (nb, H+2, W, tK)   bf16  kw-stacked, spatially padded activations
#   w_ref     : (3, tK, tCout)     bf16  BN-scale-folded weights (kw folded in K)
#   shift_ref : (1, tCout)         f32   folded BN shift
#   res_ref   : (nb*H*W, tCout)    bf16  optional residual / identity
#   o_ref     : (nb*H*W, tCout)    out dtype
#   acc_ref   : (nb*H*W, tCout)    f32   VMEM accumulator scratch
# grid = (batch blocks, Cout tiles, K tiles); K (k) is the reduction axis (last).
# ---------------------------------------------------------------------------
def _conv3x3_bn_act_kernel(*refs, relu, has_residual, H, W, nb):
    if has_residual:
        x_ref, w_ref, shift_ref, res_ref, o_ref, acc_ref = refs
    else:
        x_ref, w_ref, shift_ref, o_ref, acc_ref = refs
        res_ref = None

    k = pl.program_id(2)

    @pl.when(k == 0)
    def _():
        # Init accumulator with the folded BN shift: saves the zero-store and the
        # finalize-time add.
        acc_ref[...] = jnp.broadcast_to(shift_ref[...], acc_ref.shape)

    tk = x_ref.shape[-1]

    def tap(dh):
        # kh slice is on a leading (non-tiled) dim -> free view; kw is already in
        # the contraction dim, so the reshape is contiguous and each matmul runs
        # with K = tk (>= 3 * Cin).
        patch = x_ref[:, pl.ds(dh, H)].reshape(nb * H * W, tk)
        return jnp.dot(patch, w_ref[dh], preferred_element_type=jnp.float32)

    # Single accumulator read-modify-write per grid step.
    acc_ref[...] += tap(0) + tap(1) + tap(2)

    @pl.when(k == pl.num_programs(2) - 1)
    def _():
        y = acc_ref[...]
        if has_residual:
            y = y + res_ref[...].astype(jnp.float32)
        if relu:
            y = jnp.maximum(y, 0.0)
        o_ref[...] = y.astype(o_ref.dtype)


def conv3x3_bn_act(xk, w, shift, *, H, W, relu=True, residual=None,
                   out_dtype=jnp.float32):
    """Fused 3x3 conv (stride 1, 'same') + folded BN [+ residual] + activation.

    xk       : (N, H+2, W, Kp)  bf16  kw-stacked, spatially padded activations
    w        : (3, Kp, Coutp)   bf16  BN scale folded in, kw folded into K
    shift    : (1, Coutp)       f32
    residual : (N*H*W, Coutp)   bf16 or None
    returns  : (N*H*W, Coutp)   out_dtype
    """
    N, Hp, Wx, Kp = xk.shape
    assert Hp == H + 2 and Wx == W
    Coutp = w.shape[-1]
    out_isz = jnp.dtype(out_dtype).itemsize

    tk = _pick_tile(Kp, 512)
    tcout = _pick_tile(Coutp, 512 if H * W <= 1024 else 256)

    def vmem_est(nb):
        x_b = nb * Hp * W * tk * 2 * 2                      # input, double-buffered
        w_b = 3 * tk * tcout * 2 * 2
        o_b = nb * H * W * tcout * out_isz * 2
        r_b = nb * H * W * tcout * 2 * 2 if residual is not None else 0
        a_b = nb * H * W * tcout * 4                        # f32 accumulator
        return x_b + w_b + o_b + r_b + a_b

    nb = 1
    for cand in (8, 4, 2, 1):
        if N % cand:
            continue
        if (cand * H * W) % 8 and cand * H * W != N * H * W:
            continue                                        # keep out-block sublane-aligned
        if vmem_est(cand) <= _VMEM_BUDGET:
            nb = cand
            break

    grid = (N // nb, Coutp // tcout, Kp // tk)

    in_specs = [
        pl.BlockSpec((nb, Hp, W, tk), lambda b, j, k: (b, 0, 0, k)),
        pl.BlockSpec((3, tk, tcout), lambda b, j, k: (0, k, j)),
        pl.BlockSpec((1, tcout), lambda b, j, k: (0, j)),
    ]
    args = [xk, w, shift]
    if residual is not None:
        in_specs.append(
            pl.BlockSpec((nb * H * W, tcout), lambda b, j, k: (b, j)))
        args.append(residual)

    kernel = functools.partial(_conv3x3_bn_act_kernel, relu=relu,
                               has_residual=residual is not None,
                               H=H, W=W, nb=nb)

    out_bytes = N * H * W * Coutp * out_isz
    cost = pl.CostEstimate(
        flops=2 * N * H * W * Coutp * 3 * Kp,
        transcendentals=0,
        bytes_accessed=(xk.size * 2 * (Coutp // tcout)
                        + w.size * 2 * (N // nb)
                        + shift.size * 4
                        + out_bytes
                        + (residual.size * 2 if residual is not None else 0)),
    )

    return pl.pallas_call(
        kernel,
        out_shape=jax.ShapeDtypeStruct((N * H * W, Coutp), out_dtype),
        grid=grid,
        in_specs=in_specs,
        out_specs=pl.BlockSpec((nb * H * W, tcout), lambda b, j, k: (b, j)),
        scratch_shapes=[pltpu.VMEM((nb * H * W, tcout), jnp.float32)],
        compiler_params=pltpu.CompilerParams(
            dimension_semantics=("parallel", "parallel", "arbitrary"),
            vmem_limit_bytes=_VMEM_LIMIT,
        ),
        cost_estimate=cost,
    )(*args)


# ---------------------------------------------------------------------------
# Glue: BN folding, kw stacking, forward pass
# ---------------------------------------------------------------------------
def _fold_conv_bn(w_oihw, gamma, beta, mean, var, cin_present, kp, cout_pad):
    """Fold inference-mode BN into conv weights; fold kw into K; pad K and Cout."""
    scale = gamma / jnp.sqrt(var + _BN_EPS)
    shift = beta - mean * scale
    w = jnp.transpose(w_oihw, (2, 3, 1, 0)) * scale            # (kh, kw, Cin, Cout)
    _, _, cin, cout = w.shape
    w = jnp.pad(w, ((0, 0), (0, 0), (0, cin_present - cin), (0, 0)))
    w = w.reshape(3, 3 * cin_present, cout)                    # kw folded (kw-major)
    w = jnp.pad(w, ((0, 0), (0, kp - 3 * cin_present), (0, cout_pad - cout)))
    shift = jnp.pad(shift, (0, cout_pad - cout)).reshape(1, cout_pad)
    return w.astype(jnp.bfloat16), shift.astype(jnp.float32)


def _stack_kw(x_nhwc, kp):
    """Spatially pad (+1 halo) and fold the kw taps into channels.

    (N, H, W, C) -> (N, H+2, W, kp) bf16 with channel dw*C + ci = x_pad[.., w+dw, ci].
    """
    _, _, W, C = x_nhwc.shape
    xp = jnp.pad(x_nhwc.astype(jnp.bfloat16), ((0, 0), (1, 1), (1, 1), (0, 0)))
    xk = jnp.concatenate([xp[:, :, dw:dw + W, :] for dw in range(3)], axis=-1)
    return jnp.pad(xk, ((0, 0), (0, 0), (0, 0), (0, kp - 3 * C)))


def basic_block_forward(x_nchw, params):
    """BasicBlock forward (stride=1, downsample=None => in_channel == out_channel)."""
    N, Cin, H, W = x_nchw.shape
    Cout = params["w1"].shape[0]
    assert Cin == Cout, "downsample=None requires in_channel == out_channel"

    coutp = _round_up(Cout, _LANE)
    x_nhwc = jnp.transpose(x_nchw, (0, 2, 3, 1)).astype(jnp.float32)

    # conv1 (3x3, pad=1) + bn1 + relu.  K1 = round_up(3*Cin, 128) (pad AFTER kw fold).
    k1 = _round_up(3 * Cin, _LANE)
    xk1 = _stack_kw(x_nhwc, k1)
    w1, s1 = _fold_conv_bn(params["w1"], *params["bn1"],
                           cin_present=Cin, kp=k1, cout_pad=coutp)
    y = conv3x3_bn_act(xk1, w1, s1, H=H, W=W, relu=True,
                       out_dtype=jnp.bfloat16)                 # (N*H*W, coutp) bf16

    # conv2 (3x3, pad=1) + bn2 + identity + relu.  conv2 consumes conv1's padded
    # channel layout directly (K2 = 3*coutp, already 128-aligned).
    k2 = 3 * coutp
    yk = _stack_kw(y.reshape(N, H, W, coutp), k2)
    w2, s2 = _fold_conv_bn(params["w2"], *params["bn2"],
                           cin_present=coutp, kp=k2, cout_pad=coutp)
    identity = jnp.pad(x_nhwc, ((0, 0), (0, 0), (0, 0), (0, coutp - Cin)))
    identity = identity.astype(jnp.bfloat16).reshape(N * H * W, coutp)
    out = conv3x3_bn_act(yk, w2, s2, H=H, W=W, relu=True,
                         residual=identity, out_dtype=jnp.float32)

    out = out.reshape(N, H, W, coutp)[..., :Cout]
    return jnp.transpose(out, (0, 3, 1, 2))                    # back to NCHW


def make_params(key, in_channel, out_channel):
    ks = jax.random.split(key, 4)

    def bn(k, c):
        k1, k2, k3, k4 = jax.random.split(k, 4)
        gamma = 1.0 + 0.1 * jax.random.normal(k1, (c,), jnp.float32)
        beta = 0.1 * jax.random.normal(k2, (c,), jnp.float32)
        mean = 0.1 * jax.random.normal(k3, (c,), jnp.float32)
        var = 1.0 + 0.1 * jax.random.uniform(k4, (c,), jnp.float32)
        return (gamma, beta, mean, var)

    w1 = 0.1 * jax.random.normal(ks[0], (out_channel, in_channel, 3, 3), jnp.float32)
    w2 = 0.1 * jax.random.normal(ks[2], (out_channel, out_channel, 3, 3), jnp.float32)
    return dict(w1=w1, bn1=bn(ks[1], out_channel), w2=w2, bn2=bn(ks[3], out_channel))


# ---------------------------------------------------------------------------
# Pure-JAX reference (mirrors the PyTorch BasicBlock in inference mode)
# ---------------------------------------------------------------------------
def _conv3x3_ref(x_nchw, w_oihw):
    return jax.lax.conv_general_dilated(
        x_nchw, w_oihw, window_strides=(1, 1), padding=((1, 1), (1, 1)),
        dimension_numbers=("NCHW", "OIHW", "NCHW"))


def _bn_ref(x_nchw, gamma, beta, mean, var):
    g = gamma.reshape(1, -1, 1, 1)
    b = beta.reshape(1, -1, 1, 1)
    m = mean.reshape(1, -1, 1, 1)
    v = var.reshape(1, -1, 1, 1)
    return g * (x_nchw - m) / jnp.sqrt(v + _BN_EPS) + b


def basic_block_reference(x_nchw, params):
    y = jax.nn.relu(_bn_ref(_conv3x3_ref(x_nchw, params["w1"]), *params["bn1"]))
    y = _bn_ref(_conv3x3_ref(y, params["w2"]), *params["bn2"])
    return jax.nn.relu(y + x_nchw)


if __name__ == "__main__":
    key = jax.random.PRNGKey(0)
    k_x, k_p = jax.random.split(key)

    in_channel = out_channel = 4
    N, H, W = 2, 16, 16

    x = jax.random.normal(k_x, (N, in_channel, H, W), jnp.float32)
    params = make_params(k_p, in_channel, out_channel)

    fwd = jax.jit(basic_block_forward)
    out = fwd(x, params)
    jax.block_until_ready(out)
    assert out.shape == (N, out_channel, H, W)

    ref = basic_block_reference(x, params)
    max_err = float(jnp.max(jnp.abs(out - ref)))
    assert max_err < 5e-2, f"max abs error {max_err}"

    print("KERNEL_OK")
</pallas_src>

<mosaic_0001>
module attributes {stable_mosaic.version = 11 : i64} {
  func.func @_conv3x3_bn_act_kernel(%arg0: i32, %arg1: i32, %arg2: i32, %arg3: memref<2x18x16x128xbf16, #tpu.memory_space<vmem>>, %arg4: memref<3x128x128xbf16, #tpu.memory_space<vmem>>, %arg5: memref<1x128xf32, #tpu.memory_space<vmem>>, %arg6: memref<512x128xbf16, #tpu.memory_space<vmem>>, %arg7: memref<512x128xf32, #tpu.memory_space<vmem>>) attributes {dimension_semantics = [#tpu.dimension_semantics<parallel>, #tpu.dimension_semantics<parallel>, #tpu.dimension_semantics<arbitrary>], iteration_bounds = array<i64: 1, 1, 1>, scalar_prefetch = 0 : i64, scratch_operands = 1 : i64, tpu.core_type = #tpu.core_type<tc>, window_params = [{transform_indices = @transform_0, window_bounds = array<i64: 2, 18, 16, 128>}, {transform_indices = @transform_1, window_bounds = array<i64: 3, 128, 128>}, {transform_indices = @transform_2, window_bounds = array<i64: 1, 128>}, {transform_indices = @transform_3, window_bounds = array<i64: 512, 128>}]} {
    %c0_i32 = arith.constant 0 : i32
    %0 = arith.cmpi eq, %arg2, %c0_i32 : i32
    %1 = arith.extui %0 : i1 to i32
    %c0_i32_0 = arith.constant 0 : i32
    %2 = arith.cmpi ne, %1, %c0_i32_0 : i32
    scf.if %2 {
      %c0_27 = arith.constant 0 : index
      %c0_28 = arith.constant 0 : index
      %26 = vector.load %arg5[%c0_27, %c0_28] : memref<1x128xf32, #tpu.memory_space<vmem>>, vector<1x128xf32>
      %27 = vector.shape_cast %26 : vector<1x128xf32> to vector<1x128xf32>
      %28 = vector.broadcast %27 : vector<1x128xf32> to vector<512x128xf32>
      %c0_29 = arith.constant 0 : index
      %c0_30 = arith.constant 0 : index
      %29 = vector.load %arg7[%c0_29, %c0_30] : memref<512x128xf32, #tpu.memory_space<vmem>>, vector<512x128xf32>
      tpu.vector_store %arg7[%c0_29, %c0_30], %28 {strides = array<i32>} : memref<512x128xf32, #tpu.memory_space<vmem>>, vector<512x128xf32>,
    } else {
    }
    %c0 = arith.constant 0 : index
    %c0_1 = arith.constant 0 : index
    %3 = vector.load %arg7[%c0, %c0_1] : memref<512x128xf32, #tpu.memory_space<vmem>>, vector<512x128xf32>
    %c0_2 = arith.constant 0 : index
    %c0_3 = arith.constant 0 : index
    %c0_4 = arith.constant 0 : index
    %c0_5 = arith.constant 0 : index
    %4 = vector.load %arg3[%c0_2, %c0_3, %c0_4, %c0_5] : memref<2x18x16x128xbf16, #tpu.memory_space<vmem>>, vector<2x16x16x128xbf16>
    %5 = vector.shape_cast %4 : vector<2x16x16x128xbf16> to vector<512x128xbf16>
    %c0_6 = arith.constant 0 : index
    %c0_7 = arith.constant 0 : index
    %c0_8 = arith.constant 0 : index
    %6 = vector.load %arg4[%c0_6, %c0_7, %c0_8] : memref<3x128x128xbf16, #tpu.memory_space<vmem>>, vector<1x128x128xbf16>
    %7 = vector.shape_cast %6 : vector<1x128x128xbf16> to vector<128x128xbf16>
    %cst = arith.constant dense<0.000000e+00> : vector<512x128xf32>
    %8 = tpu.matmul %5, %7, %cst {dimension_numbers = #tpu.dot_dimension_numbers<[1], [0], [0], [1], [0, 0, 1, 1], [], []>} : vector<512x128xbf16>, vector<128x128xbf16>, vector<512x128xf32> -> vector<512x128xf32>
    %c0_9 = arith.constant 0 : index
    %c1 = arith.constant 1 : index
    %c0_10 = arith.constant 0 : index
    %c0_11 = arith.constant 0 : index
    %9 = vector.load %arg3[%c0_9, %c1, %c0_10, %c0_11] : memref<2x18x16x128xbf16, #tpu.memory_space<vmem>>, vector<2x16x16x128xbf16>
    %10 = vector.shape_cast %9 : vector<2x16x16x128xbf16> to vector<512x128xbf16>
    %c1_12 = arith.constant 1 : index
    %c0_13 = arith.constant 0 : index
    %c0_14 = arith.constant 0 : index
    %11 = vector.load %arg4[%c1_12, %c0_13, %c0_14] : memref<3x128x128xbf16, #tpu.memory_space<vmem>>, vector<1x128x128xbf16>
    %12 = vector.shape_cast %11 : vector<1x128x128xbf16> to vector<128x128xbf16>
    %cst_15 = arith.constant dense<0.000000e+00> : vector<512x128xf32>
    %13 = tpu.matmul %10, %12, %cst_15 {dimension_numbers = #tpu.dot_dimension_numbers<[1], [0], [0], [1], [0, 0, 1, 1], [], []>} : vector<512x128xbf16>, vector<128x128xbf16>, vector<512x128xf32> -> vector<512x128xf32>
    %14 = arith.addf %8, %13 : vector<512x128xf32>
    %c0_16 = arith.constant 0 : index
    %c2 = arith.constant 2 : index
    %c0_17 = arith.constant 0 : index
    %c0_18 = arith.constant 0 : index
    %15 = vector.load %arg3[%c0_16, %c2, %c0_17, %c0_18] : memref<2x18x16x128xbf16, #tpu.memory_space<vmem>>, vector<2x16x16x128xbf16>
    %16 = vector.shape_cast %15 : vector<2x16x16x128xbf16> to vector<512x128xbf16>
    %c2_19 = arith.constant 2 : index
    %c0_20 = arith.constant 0 : index
    %c0_21 = arith.constant 0 : index
    %17 = vector.load %arg4[%c2_19, %c0_20, %c0_21] : memref<3x128x128xbf16, #tpu.memory_space<vmem>>, vector<1x128x128xbf16>
    %18 = vector.shape_cast %17 : vector<1x128x128xbf16> to vector<128x128xbf16>
    %cst_22 = arith.constant dense<0.000000e+00> : vector<512x128xf32>
    %19 = tpu.matmul %16, %18, %cst_22 {dimension_numbers = #tpu.dot_dimension_numbers<[1], [0], [0], [1], [0, 0, 1, 1], [], []>} : vector<512x128xbf16>, vector<128x128xbf16>, vector<512x128xf32> -> vector<512x128xf32>
    %20 = arith.addf %14, %19 : vector<512x128xf32>
    %21 = arith.addf %3, %20 : vector<512x128xf32>
    %c0_23 = arith.constant 0 : index
    %c0_24 = arith.constant 0 : index
    %22 = vector.load %arg7[%c0_23, %c0_24] : memref<512x128xf32, #tpu.memory_space<vmem>>, vector<512x128xf32>
    tpu.vector_store %arg7[%c0_23, %c0_24], %21 {strides = array<i32>} : memref<512x128xf32, #tpu.memory_space<vmem>>, vector<512x128xf32>,
    %c0_i32_25 = arith.constant 0 : i32
    %23 = arith.cmpi eq, %arg2, %c0_i32_25 : i32
    %24 = arith.extui %23 : i1 to i32
    %c0_i32_26 = arith.constant 0 : i32
    %25 = arith.cmpi ne, %24, %c0_i32_26 : i32
    scf.if %25 {
      %c0_27 = arith.constant 0 : index
      %c0_28 = arith.constant 0 : index
      %26 = vector.load %arg7[%c0_27, %c0_28] : memref<512x128xf32, #tpu.memory_space<vmem>>, vector<512x128xf32>
      %cst_29 = arith.constant 0.000000e+00 : f32
      %27 = vector.broadcast %cst_29 : f32 to vector<512x128xf32>
      %28 = arith.maximumf %26, %27 : vector<512x128xf32>
      %29 = arith.truncf %28 : vector<512x128xf32> to vector<512x128xbf16>
      %c0_30 = arith.constant 0 : index
      %c0_31 = arith.constant 0 : index
      %30 = vector.load %arg6[%c0_30, %c0_31] : memref<512x128xbf16, #tpu.memory_space<vmem>>, vector<512x128xbf16>
      tpu.vector_store %arg6[%c0_30, %c0_31], %29 {strides = array<i32>} : memref<512x128xbf16, #tpu.memory_space<vmem>>, vector<512x128xbf16>,
    } else {
    }
    return
  }
  func.func @transform_0(%arg0: i32, %arg1: i32, %arg2: i32) -> (i32, i32, i32, i32) {
    %c0_i32 = arith.constant 0 : i32
    %c0_i32_0 = arith.constant 0 : i32
    %c0_i32_1 = arith.constant 0 : i32
    return %arg0, %c0_i32, %c0_i32_0, %arg2 : i32, i32, i32, i32
  }
  func.func @transform_1(%arg0: i32, %arg1: i32, %arg2: i32) -> (i32, i32, i32) {
    %c0_i32 = arith.constant 0 : i32
    %c0_i32_0 = arith.constant 0 : i32
    return %c0_i32, %arg2, %arg1 : i32, i32, i32
  }
  func.func @transform_2(%arg0: i32, %arg1: i32, %arg2: i32) -> (i32, i32) {
    %c0_i32 = arith.constant 0 : i32
    %c0_i32_0 = arith.constant 0 : i32
    return %c0_i32, %arg1 : i32, i32
  }
  func.func @transform_3(%arg0: i32, %arg1: i32, %arg2: i32) -> (i32, i32) {
    %c0_i32 = arith.constant 0 : i32
    return %arg0, %arg1 : i32, i32
  }
}

module attributes {stable_mosaic.version = 11 : i64} {
  func.func @_conv3x3_bn_act_kernel(%arg0: i32, %arg1: i32, %arg2: i32, %arg3: memref<2x18x16x384xbf16, #tpu.memory_space<vmem>>, %arg4: memref<3x384x128xbf16, #tpu.memory_space<vmem>>, %arg5: memref<1x128xf32, #tpu.memory_space<vmem>>, %arg6: memref<512x128xbf16, #tpu.memory_space<vmem>>, %arg7: memref<512x128xf32, #tpu.memory_space<vmem>>, %arg8: memref<512x128xf32, #tpu.memory_space<vmem>>) attributes {dimension_semantics = [#tpu.dimension_semantics<parallel>, #tpu.dimension_semantics<parallel>, #tpu.dimension_semantics<arbitrary>], iteration_bounds = array<i64: 1, 1, 1>, scalar_prefetch = 0 : i64, scratch_operands = 1 : i64, tpu.core_type = #tpu.core_type<tc>, window_params = [{transform_indices = @transform_0, window_bounds = array<i64: 2, 18, 16, 384>}, {transform_indices = @transform_1, window_bounds = array<i64: 3, 384, 128>}, {transform_indices = @transform_2, window_bounds = array<i64: 1, 128>}, {transform_indices = @transform_3, window_bounds = array<i64: 512, 128>}, {transform_indices = @transform_4, window_bounds = array<i64: 512, 128>}]} {
    %c0_i32 = arith.constant 0 : i32
    %0 = arith.cmpi eq, %arg2, %c0_i32 : i32
    %1 = arith.extui %0 : i1 to i32
    %c0_i32_0 = arith.constant 0 : i32
    %2 = arith.cmpi ne, %1, %c0_i32_0 : i32
    scf.if %2 {
      %c0_27 = arith.constant 0 : index
      %c0_28 = arith.constant 0 : index
      %26 = vector.load %arg5[%c0_27, %c0_28] : memref<1x128xf32, #tpu.memory_space<vmem>>, vector<1x128xf32>
      %27 = vector.shape_cast %26 : vector<1x128xf32> to vector<1x128xf32>
      %28 = vector.broadcast %27 : vector<1x128xf32> to vector<512x128xf32>
      %c0_29 = arith.constant 0 : index
      %c0_30 = arith.constant 0 : index
      %29 = vector.load %arg8[%c0_29, %c0_30] : memref<512x128xf32, #tpu.memory_space<vmem>>, vector<512x128xf32>
      tpu.vector_store %arg8[%c0_29, %c0_30], %28 {strides = array<i32>} : memref<512x128xf32, #tpu.memory_space<vmem>>, vector<512x128xf32>,
    } else {
    }
    %c0 = arith.constant 0 : index
    %c0_1 = arith.constant 0 : index
    %3 = vector.load %arg8[%c0, %c0_1] : memref<512x128xf32, #tpu.memory_space<vmem>>, vector<512x128xf32>
    %c0_2 = arith.constant 0 : index
    %c0_3 = arith.constant 0 : index
    %c0_4 = arith.constant 0 : index
    %c0_5 = arith.constant 0 : index
    %4 = vector.load %arg3[%c0_2, %c0_3, %c0_4, %c0_5] : memref<2x18x16x384xbf16, #tpu.memory_space<vmem>>, vector<2x16x16x384xbf16>
    %5 = vector.shape_cast %4 : vector<2x16x16x384xbf16> to vector<512x384xbf16>
    %c0_6 = arith.constant 0 : index
    %c0_7 = arith.constant 0 : index
    %c0_8 = arith.constant 0 : index
    %6 = vector.load %arg4[%c0_6, %c0_7, %c0_8] : memref<3x384x128xbf16, #tpu.memory_space<vmem>>, vector<1x384x128xbf16>
    %7 = vector.shape_cast %6 : vector<1x384x128xbf16> to vector<384x128xbf16>
    %cst = arith.constant dense<0.000000e+00> : vector<512x128xf32>
    %8 = tpu.matmul %5, %7, %cst {dimension_numbers = #tpu.dot_dimension_numbers<[1], [0], [0], [1], [0, 0, 1, 1], [], []>} : vector<512x384xbf16>, vector<384x128xbf16>, vector<512x128xf32> -> vector<512x128xf32>
    %c0_9 = arith.constant 0 : index
    %c1 = arith.constant 1 : index
    %c0_10 = arith.constant 0 : index
    %c0_11 = arith.constant 0 : index
    %9 = vector.load %arg3[%c0_9, %c1, %c0_10, %c0_11] : memref<2x18x16x384xbf16, #tpu.memory_space<vmem>>, vector<2x16x16x384xbf16>
    %10 = vector.shape_cast %9 : vector<2x16x16x384xbf16> to vector<512x384xbf16>
    %c1_12 = arith.constant 1 : index
    %c0_13 = arith.constant 0 : index
    %c0_14 = arith.constant 0 : index
    %11 = vector.load %arg4[%c1_12, %c0_13, %c0_14] : memref<3x384x128xbf16, #tpu.memory_space<vmem>>, vector<1x384x128xbf16>
    %12 = vector.shape_cast %11 : vector<1x384x128xbf16> to vector<384x128xbf16>
    %cst_15 = arith.constant dense<0.000000e+00> : vector<512x128xf32>
    %13 = tpu.matmul %10, %12, %cst_15 {dimension_numbers = #tpu.dot_dimension_numbers<[1], [0], [0], [1], [0, 0, 1, 1], [], []>} : vector<512x384xbf16>, vector<384x128xbf16>, vector<512x128xf32> -> vector<512x128xf32>
    %14 = arith.addf %8, %13 : vector<512x128xf32>
    %c0_16 = arith.constant 0 : index
    %c2 = arith.constant 2 : index
    %c0_17 = arith.constant 0 : index
    %c0_18 = arith.constant 0 : index
    %15 = vector.load %arg3[%c0_16, %c2, %c0_17, %c0_18] : memref<2x18x16x384xbf16, #tpu.memory_space<vmem>>, vector<2x16x16x384xbf16>
    %16 = vector.shape_cast %15 : vector<2x16x16x384xbf16> to vector<512x384xbf16>
    %c2_19 = arith.constant 2 : index
    %c0_20 = arith.constant 0 : index
    %c0_21 = arith.constant 0 : index
    %17 = vector.load %arg4[%c2_19, %c0_20, %c0_21] : memref<3x384x128xbf16, #tpu.memory_space<vmem>>, vector<1x384x128xbf16>
    %18 = vector.shape_cast %17 : vector<1x384x128xbf16> to vector<384x128xbf16>
    %cst_22 = arith.constant dense<0.000000e+00> : vector<512x128xf32>
    %19 = tpu.matmul %16, %18, %cst_22 {dimension_numbers = #tpu.dot_dimension_numbers<[1], [0], [0], [1], [0, 0, 1, 1], [], []>} : vector<512x384xbf16>, vector<384x128xbf16>, vector<512x128xf32> -> vector<512x128xf32>
    %20 = arith.addf %14, %19 : vector<512x128xf32>
    %21 = arith.addf %3, %20 : vector<512x128xf32>
    %c0_23 = arith.constant 0 : index
    %c0_24 = arith.constant 0 : index
    %22 = vector.load %arg8[%c0_23, %c0_24] : memref<512x128xf32, #tpu.memory_space<vmem>>, vector<512x128xf32>
    tpu.vector_store %arg8[%c0_23, %c0_24], %21 {strides = array<i32>} : memref<512x128xf32, #tpu.memory_space<vmem>>, vector<512x128xf32>,
    %c0_i32_25 = arith.constant 0 : i32
    %23 = arith.cmpi eq, %arg2, %c0_i32_25 : i32
    %24 = arith.extui %23 : i1 to i32
    %c0_i32_26 = arith.constant 0 : i32
    %25 = arith.cmpi ne, %24, %c0_i32_26 : i32
    scf.if %25 {
      %c0_27 = arith.constant 0 : index
      %c0_28 = arith.constant 0 : index
      %26 = vector.load %arg8[%c0_27, %c0_28] : memref<512x128xf32, #tpu.memory_space<vmem>>, vector<512x128xf32>
      %c0_29 = arith.constant 0 : index
      %c0_30 = arith.constant 0 : index
      %27 = vector.load %arg6[%c0_29, %c0_30] : memref<512x128xbf16, #tpu.memory_space<vmem>>, vector<512x128xbf16>
      %28 = arith.extf %27 : vector<512x128xbf16> to vector<512x128xf32>
      %29 = arith.addf %26, %28 : vector<512x128xf32>
      %cst_31 = arith.constant 0.000000e+00 : f32
      %30 = vector.broadcast %cst_31 : f32 to vector<512x128xf32>
      %31 = arith.maximumf %29, %30 : vector<512x128xf32>
      %c0_32 = arith.constant 0 : index
      %c0_33 = arith.constant 0 : index
      %32 = vector.load %arg7[%c0_32, %c0_33] : memref<512x128xf32, #tpu.memory_space<vmem>>, vector<512x128xf32>
      tpu.vector_store %arg7[%c0_32, %c0_33], %31 {strides = array<i32>} : memref<512x128xf32, #tpu.memory_space<vmem>>, vector<512x128xf32>,
    } else {
    }
    return
  }
  func.func @transform_0(%arg0: i32, %arg1: i32, %arg2: i32) -> (i32, i32, i32, i32) {
    %c0_i32 = arith.constant 0 : i32
    %c0_i32_0 = arith.constant 0 : i32
    %c0_i32_1 = arith.constant 0 : i32
    return %arg0, %c0_i32, %c0_i32_0, %arg2 : i32, i32, i32, i32
  }
  func.func @transform_1(%arg0: i32, %arg1: i32, %arg2: i32) -> (i32, i32, i32) {
    %c0_i32 = arith.constant 0 : i32
    %c0_i32_0 = arith.constant 0 : i32
    return %c0_i32, %arg2, %arg1 : i32, i32, i32
  }
  func.func @transform_2(%arg0: i32, %arg1: i32, %arg2: i32) -> (i32, i32) {
    %c0_i32 = arith.constant 0 : i32
    %c0_i32_0 = arith.constant 0 : i32
    return %c0_i32, %arg1 : i32, i32
  }
  func.func @transform_3(%arg0: i32, %arg1: i32, %arg2: i32) -> (i32, i32) {
    %c0_i32 = arith.constant 0 : i32
    return %arg0, %arg1 : i32, i32
  }
  func.func @transform_4(%arg0: i32, %arg1: i32, %arg2: i32) -> (i32, i32) {
    %c0_i32 = arith.constant 0 : i32
    return %arg0, %arg1 : i32, i32
  }
}

</mosaic_0001>

<bundles_post_ra>
// kernel: basic_block_forward.2
= control target key start
LH: loop header
LB: loop body
LE: loop exit
PB: predicated region body
PF: predicated region fallthrough
CT: control target
= control target key end

     0   :  { %s3723_s1 = inlined_call_operand.vmem [shape: bf16[3,128,128], index: 1, kind: input, shape index: {}]   ;;  %s3724_s0 = inlined_call_operand.vmem [shape: bf16[2,18,16,128], index: 0, kind: input, shape index: {}]   ;;  %s3725_s2 = inlined_call_operand.vmem [shape: f32[1,128], index: 2, kind: input, shape index: {}]   ;;  %s3726_s3 = inlined_call_operand.vmem [shape: bf16[512,128], index: 3, kind: output, shape index: {}]  }
   0x1   :  { %v2795_v0 = vld [vmem:[%s3723_s1 + $0x78] sm:$0xff]  ;;  %v2794_v3 = vld [vmem:[%s3723_s1 + $0x70] sm:$0xff]  ;;  %v2793_v6 = vld [vmem:[%s3723_s1 + $0x68] sm:$0xff] }
   0x2   :  { %v2755_v1 = vld [vmem:[%s3723_s1 + $0x38] sm:$0xff]  ;;  %552 = vmatpush.bf16.msra.mxu0 %v2795_v0  ;;  %3027 = vmatpush.bf16.msra.mxu3 %v2795_v0  ;;  %v2754_v4 = vld [vmem:[%s3723_s1 + $0x30] sm:$0xff]  ;;  %v2753_v7 = vld [vmem:[%s3723_s1 + $0x28] sm:$0xff] }
   0x3   :  { %v3082_v2 = vld [vmem:[%s3723_s1 + $0xb8] sm:$0xff]  ;;  %961 = vmatpush.bf16.msra.mxu1 %v2755_v1  ;;  %v3094_v5 = vld [vmem:[%s3723_s1 + $0xb0] sm:$0xff]  ;;  %v3106_v8 = vld [vmem:[%s3723_s1 + $0xa8] sm:$0xff] }
   0x4   :  { %1452 = vmatpush.bf16.msra.mxu2 %v3082_v2  ;;  %v2792_v9 = vld [vmem:[%s3723_s1 + $0x60] sm:$0xff]  ;;  %v2791_v12 = vld [vmem:[%s3723_s1 + $0x58] sm:$0xff]  ;;  %v2790_v15 = vld [vmem:[%s3723_s1 + $0x50] sm:$0xff] }
   0x5   :  { %v2752_v10 = vld [vmem:[%s3723_s1 + $0x20] sm:$0xff]  ;;  %v2751_v13 = vld [vmem:[%s3723_s1 + $0x18] sm:$0xff]  ;;  %v2750_v16 = vld [vmem:[%s3723_s1 + $0x10] sm:$0xff] }
   0x6   :  { %553 = vmatpush.bf16.msra.mxu0 %v2794_v3  ;;  %3028 = vmatpush.bf16.msra.mxu3 %v2794_v3  ;;  %v3118_v11 = vld [vmem:[%s3723_s1 + $0xa0] sm:$0xff]  ;;  %v3130_v14 = vld [vmem:[%s3723_s1 + $0x98] sm:$0xff]  ;;  %v3142_v17 = vld [vmem:[%s3723_s1 + $0x90] sm:$0xff] }
   0x7   :  { %962 = vmatpush.bf16.msra.mxu1 %v2754_v4  ;;  %v2789_v18 = vld [vmem:[%s3723_s1 + $0x48] sm:$0xff]  ;;  %v2788_v21 = vld [vmem:[%s3723_s1 + $0x40] sm:$0xff]  ;;  %v2780_v25 = vld [vmem:[%s3724_s0 + $0xd8] sm:$0xff] }
   0x8   :  { %1453 = vmatpush.bf16.msra.mxu2 %v3094_v5  ;;  %v2749_v19 = vld [vmem:[%s3723_s1 + $0x8] sm:$0xff]  ;;  %v2748_v22 = vld [vmem:[%s3723_s1] sm:$0xff]  ;;  %v2796_v27 = vld [vmem:[%s3724_s0 + $0x10] sm:$0xff] }
   0x9   :  { %v2829_v20 = vld [vmem:[%s3723_s1 + $0x88] sm:$0xff]  ;;  %v2828_v23 = vld [vmem:[%s3723_s1 + $0x80] sm:$0xff]  ;;  %v2757_v28 = vld [vmem:[%s3724_s0 + $0x10] sm:$0xff] }
   0xa   :  { %554 = vmatpush.bf16.msra.mxu0 %v2793_v6  ;;  %3029 = vmatpush.bf16.msra.mxu3 %v2793_v6  ;;  %v2756_v24 = vld [vmem:[%s3724_s0 + $0x8] sm:$0xff]  ;;  %v2716_v26 = vld [vmem:[%s3724_s0] sm:$0xff]  ;;  %v2797_v31 = vld [vmem:[%s3724_s0 + $0x18] sm:$0xff] }
   0xb   :  { %963 = vmatpush.bf16.msra.mxu1 %v2753_v7  ;;  %v2781_v29 = vld [vmem:[%s3724_s0 + $0xe0] sm:$0xff]  ;;  %v2717_v30 = vld [vmem:[%s3724_s0 + $0x8] sm:$0xff]  ;;  %v2758_v32 = vld [vmem:[%s3724_s0 + $0x18] sm:$0xff] }
   0xc   :  { %1454 = vmatpush.bf16.msra.mxu2 %v3106_v8  ;;  %v2782_v33 = vld [vmem:[%s3724_s0 + $0xe8] sm:$0xff]  ;;  %v2718_v34 = vld [vmem:[%s3724_s0 + $0x10] sm:$0xff]  ;;  %v2798_v35 = vld [vmem:[%s3724_s0 + $0x20] sm:$0xff] }
   0xd   :  { %v2759_v36 = vld [vmem:[%s3724_s0 + $0x20] sm:$0xff]  ;;  %v2783_v37 = vld [vmem:[%s3724_s0 + $0xf0] sm:$0xff]  ;;  %v2719_v38 = vld [vmem:[%s3724_s0 + $0x18] sm:$0xff] }
   0xe   :  { %555 = vmatpush.bf16.msra.mxu0 %v2792_v9  ;;  %3030 = vmatpush.bf16.msra.mxu3 %v2792_v9  ;;  %v2799_v39 = vld [vmem:[%s3724_s0 + $0x28] sm:$0xff]  ;;  %v2784_v41 = vld [vmem:[%s3724_s0 + $0xf8] sm:$0xff]  ;;  %v2720_v42 = vld [vmem:[%s3724_s0 + $0x20] sm:$0xff] }
   0xf   :  { %964 = vmatpush.bf16.msra.mxu1 %v2752_v10  ;;  %v2760_v40 = vld [vmem:[%s3724_s0 + $0x28] sm:$0xff]  ;;  %v2800_v43 = vld [vmem:[%s3724_s0 + $0x30] sm:$0xff]  ;;  %v2785_v45 = vld [vmem:[%s3724_s0 + $0x100] sm:$0xff] }
  0x10   :  { %1455 = vmatpush.bf16.msra.mxu2 %v3118_v11  ;;  %v2761_v44 = vld [vmem:[%s3724_s0 + $0x30] sm:$0xff]  ;;  %v2721_v46 = vld [vmem:[%s3724_s0 + $0x28] sm:$0xff]  ;;  %v2801_v47 = vld [vmem:[%s3724_s0 + $0x38] sm:$0xff] }
  0x11   :  { %v2762_v48 = vld [vmem:[%s3724_s0 + $0x38] sm:$0xff]  ;;  %v2786_v49 = vld [vmem:[%s3724_s0 + $0x108] sm:$0xff]  ;;  %v2722_v50 = vld [vmem:[%s3724_s0 + $0x30] sm:$0xff] }
  0x12   :  { %556 = vmatpush.bf16.msra.mxu0 %v2791_v12  ;;  %3031 = vmatpush.bf16.msra.mxu3 %v2791_v12  ;;  %v2802_v51 = vld [vmem:[%s3724_s0 + $0x40] sm:$0xff]  ;;  %v2787_v53 = vld [vmem:[%s3724_s0 + $0x110] sm:$0xff]  ;;  %v2723_v54 = vld [vmem:[%s3724_s0 + $0x38] sm:$0xff] }
  0x13   :  { %965 = vmatpush.bf16.msra.mxu1 %v2751_v13  ;;  %v2763_v52 = vld [vmem:[%s3724_s0 + $0x40] sm:$0xff]  ;;  %v2803_v55 = vld [vmem:[%s3724_s0 + $0x48] sm:$0xff]  ;;  %v2740_v57 = vld [vmem:[%s3724_s0 + $0xd0] sm:$0xff] }
  0x14   :  { %1456 = vmatpush.bf16.msra.mxu2 %v3130_v14  ;;  %v2764_v56 = vld [vmem:[%s3724_s0 + $0x48] sm:$0xff]  ;;  %v2724_v59 = vld [vmem:[%s3724_s0 + $0x40] sm:$0xff]  ;;  %v2804_v60 = vld [vmem:[%s3724_s0 + $0x50] sm:$0xff] }
  0x15   :  { %v3282_v3 = vld [vmem:[%s3725_s2] ss:$0 sm:$0xff]  ;;  %v2741_v9 = vld [vmem:[%s3724_s0 + $0xd8] sm:$0xff] }
  0x16   :  { %557 = vmatpush.bf16.msra.mxu0 %v2790_v15  ;;  %3032 = vmatpush.bf16.msra.mxu3 %v2790_v15 }
  0x17   :  { %966 = vmatpush.bf16.msra.mxu1 %v2750_v16 }
  0x18   :  { %1457 = vmatpush.bf16.msra.mxu2 %v3142_v17 }
  0x1a   :  { %558 = vmatpush.bf16.msra.mxu0 %v2789_v18  ;;  %3033 = vmatpush.bf16.msra.mxu3 %v2789_v18 }
  0x1b   :  { %967 = vmatpush.bf16.msra.mxu1 %v2749_v19 }
  0x1c   :  { %1458 = vmatpush.bf16.msra.mxu2 %v2829_v20 }
  0x1e   :  { %559 = vmatpush.bf16.msra.mxu0 %v2788_v21  ;;  %3034 = vmatpush.bf16.msra.mxu3 %v2788_v21 }
  0x1f   :  { %968 = vmatpush.bf16.msra.mxu1 %v2748_v22 }
  0x20   :  { %1459 = vmatpush.bf16.msra.mxu2 %v2828_v23 }
  0x21   :  { %560 = vmatmul.bf16.vlgmr.msra.gmra.mxu0 %v2756_v24  ;;  %680 = vmatmul.bf16.vlgmr.msra.gmra.mxu3 %v2780_v25 }
  0x22   :  { %3035 = vmatpush.bf16.msrb.mxu3 %v2755_v1  ;;  %969 = vmatmul.bf16.vlgmr.msra.gmra.mxu1 %v2716_v26 }
  0x23   :  { %1460 = vmatmul.bf16.vlgmr.msra.gmra.mxu2 %v2796_v27 }
  0x26   :  { %3036 = vmatpush.bf16.msrb.mxu3 %v2754_v4 }
  0x2a   :  { %3037 = vmatpush.bf16.msrb.mxu3 %v2753_v7 }
  0x2e   :  { %3038 = vmatpush.bf16.msrb.mxu3 %v2752_v10 }
  0x31   :  { %565 = vmatmul.bf16.gmra.mxu0 %v2757_v28  ;;  %685 = vmatmul.bf16.gmra.mxu3 %v2781_v29  ;;  %v2766_v29 = vld [vmem:[%s3724_s0 + $0x58] sm:$0xff] }
  0x32   :  { %3039 = vmatpush.bf16.msrb.mxu3 %v2751_v13  ;;  %974 = vmatmul.bf16.gmra.mxu1 %v2717_v30  ;;  %v2725_v13 = vld [vmem:[%s3724_s0 + $0x48] sm:$0xff]  ;;  %v2742_v30 = vld [vmem:[%s3724_s0 + $0xe0] sm:$0xff] }
  0x33   :  { %1465 = vmatmul.bf16.gmra.mxu2 %v2797_v31 }
  0x36   :  { %3040 = vmatpush.bf16.msrb.mxu3 %v2750_v16 }
  0x3a   :  { %3041 = vmatpush.bf16.msrb.mxu3 %v2749_v19 }
  0x3e   :  { %3042 = vmatpush.bf16.msrb.mxu3 %v2748_v22 }
  0x41   :  { %570 = vmatmul.bf16.gmra.mxu0 %v2758_v32  ;;  %690 = vmatmul.bf16.gmra.mxu3 %v2782_v33 }
  0x42   :  { %3043 = vmatpush.bf16.msra.mxu3 %v3082_v2  ;;  %979 = vmatmul.bf16.gmra.mxu1 %v2718_v34  ;;  %v2726_v34 = vld [vmem:[%s3724_s0 + $0x50] sm:$0xff] }
  0x43   :  { %1470 = vmatmul.bf16.gmra.mxu2 %v2798_v35  ;;  %v2806_v35 = vld [vmem:[%s3724_s0 + $0x60] sm:$0xff] }
  0x46   :  { %3044 = vmatpush.bf16.msra.mxu3 %v3094_v5 }
  0x4a   :  { %3045 = vmatpush.bf16.msra.mxu3 %v3106_v8  ;;  %v2765_v8 = vld [vmem:[%s3724_s0 + $0x50] sm:$0xff] }
  0x4e   :  { %3046 = vmatpush.bf16.msra.mxu3 %v3118_v11 }
  0x51   :  { %575 = vmatmul.bf16.gmra.mxu0 %v2759_v36  ;;  %695 = vmatmul.bf16.gmra.mxu3 %v2783_v37 }
  0x52   :  { %3047 = vmatpush.bf16.msra.mxu3 %v3130_v14  ;;  %984 = vmatmul.bf16.gmra.mxu1 %v2719_v38  ;;  %v2805_v14 = vld [vmem:[%s3724_s0 + $0x58] sm:$0xff] }
  0x53   :  { %1475 = vmatmul.bf16.gmra.mxu2 %v2799_v39 }
  0x56   :  { %3048 = vmatpush.bf16.msra.mxu3 %v3142_v17 }
  0x5a   :  { %3049 = vmatpush.bf16.msra.mxu3 %v2829_v20 }
  0x5e   :  { %3050 = vmatpush.bf16.msra.mxu3 %v2828_v23 }
  0x61   :  { %580 = vmatmul.bf16.gmra.mxu0 %v2760_v40  ;;  %700 = vmatmul.bf16.gmra.mxu3 %v2784_v41 }
  0x62   :  { %989 = vmatmul.bf16.gmra.mxu1 %v2720_v42 }
  0x63   :  { %1480 = vmatmul.bf16.gmra.mxu2 %v2800_v43 }
  0x71   :  { %585 = vmatmul.bf16.gmra.mxu0 %v2761_v44  ;;  %705 = vmatmul.bf16.gmra.mxu3 %v2785_v45 }
  0x72   :  { %994 = vmatmul.bf16.gmra.mxu1 %v2721_v46 }
  0x73   :  { %1485 = vmatmul.bf16.gmra.mxu2 %v2801_v47 }
  0x81   :  { %590 = vmatmul.bf16.gmra.mxu0 %v2762_v48  ;;  %710 = vmatmul.bf16.gmra.mxu3 %v2786_v49 }
  0x82   :  { %999 = vmatmul.bf16.gmra.mxu1 %v2722_v50  ;;  %v2767_v50 = vld [vmem:[%s3724_s0 + $0x60] sm:$0xff] }
  0x83   :  { %1490 = vmatmul.bf16.gmra.mxu2 %v2802_v51  ;;  %v2743_v51 = vld [vmem:[%s3724_s0 + $0xe8] sm:$0xff] }
  0x91   :  { %595 = vmatmul.bf16.gmra.mxu0 %v2763_v52  ;;  %715 = vmatmul.bf16.gmra.mxu3 %v2787_v53 }
  0x92   :  { %1004 = vmatmul.bf16.gmra.mxu1 %v2723_v54 }
  0x93   :  { %1495 = vmatmul.bf16.gmra.mxu2 %v2803_v55  ;;  %v2727_v55 = vld [vmem:[%s3724_s0 + $0x58] sm:$0xff] }
  0x9e   :  { %v561_v58 = vpop.f32.mrf.mxu0 }
  0x9f   :  { %v970_v61 = vpop.f32.mrf.mxu1 }
  0xa0   :  { %v971_v0 = vadd.f32 %v970_v61, %v561_v58 }
  0xa1   :  { %600 = vmatmul.bf16.gmra.mxu0 %v2764_v56  ;;  %1089 = vmatmul.bf16.vlgmr.msrb.gmra.mxu3 %v2740_v57  ;;  %v2807_v56 = vld [vmem:[%s3724_s0 + $0x68] sm:$0xff] }
  0xa2   :  { %1009 = vmatmul.bf16.gmra.mxu1 %v2724_v59 }
  0xa3   :  { %1500 = vmatmul.bf16.gmra.mxu2 %v2804_v60 }
  0xa4   :  { %v3277_v62 = vpop.f32.mrf.mxu3 }
  0xa6   :  { %v1461_v63 = vpop.f32.mrf.mxu2  ;;  %v563_v1 = vpop.f32.mrf.mxu0 }
  0xa7   :  { %v972_v2 = vpop.f32.mrf.mxu1  ;;  %v1621_v4 = vadd.f32 %v1461_v63, %v971_v0 }
  0xa8   :  { %v973_v5 = vadd.f32 %v972_v2, %v563_v1 }
  0xa9   :  { %v1685_v10 = vadd.f32 %v3282_v3, %v1621_v4 }
  0xab   :  { %v1880_v17 = vmax.f32 %v1685_v10, 0.0  ;;  %v2768_v10 = vld [vmem:[%s3724_s0 + $0x68] sm:$0xff] }
  0xac   :  { %v3284_v6 = vpop.f32.mrf.mxu3 }
  0xae   :  { %v1463_v7 = vpop.f32.mrf.mxu2  ;;  %v566_v12 = vpop.f32.mrf.mxu0 }
  0xaf   :  { %v1622_v11 = vadd.f32 %v1463_v7, %v973_v5  ;;  %v975_v15 = vpop.f32.mrf.mxu1 }
  0xb0   :  { %v976_v22 = vadd.f32 %v975_v15, %v566_v12  ;;  %v2728_v15 = vld [vmem:[%s3724_s0 + $0x60] sm:$0xff] }
  0xb1   :  { %v1686_v16 = vadd.f32 %v3282_v3, %v1622_v11  ;;  %605 = vmatmul.bf16.gmra.mxu0 %v2765_v8  ;;  %1094 = vmatmul.bf16.gmra.mxu3 %v2741_v9  ;;  %v2744_v11 = vld [vmem:[%s3724_s0 + $0xf0] sm:$0xff] }
  0xb2   :  { %1014 = vmatmul.bf16.gmra.mxu1 %v2725_v13 }
  0xb3   :  { %v1881_v18 = vmax.f32 %v1686_v16, 0.0  ;;  %1505 = vmatmul.bf16.gmra.mxu2 %v2805_v14  ;;  %v2808_v16 = vld [vmem:[%s3724_s0 + $0x70] sm:$0xff] }
  0xb4   :  { %v3300_v20 = vpop.f32.mrf.mxu3 }
  0xb5   :  { %v2839_v19 = vpack.c.bf16 %v1881_v18, %v1880_v17 }
  0xb6   :  { %v1466_v21 = vpop.f32.mrf.mxu2  ;;  %v568_v23 = vpop.f32.mrf.mxu0 }
  0xb7   :  { %2840 = vst [vmem:[%s3726_s3] sm:$0xff] %v2839_v19   ;;  %v977_v24 = vpop.f32.mrf.mxu1  ;;  %v1623_v25 = vadd.f32 %v1466_v21, %v976_v22 }
  0xb8   :  { %v978_v26 = vadd.f32 %v977_v24, %v568_v23 }
  0xb9   :  { %v1687_v31 = vadd.f32 %v3282_v3, %v1623_v25 }
  0xbb   :  { %v1882_v38 = vmax.f32 %v1687_v31, 0.0 }
  0xbc   :  { %v3305_v27 = vpop.f32.mrf.mxu3 }
  0xbe   :  { %v1468_v28 = vpop.f32.mrf.mxu2  ;;  %v571_v33 = vpop.f32.mrf.mxu0 }
  0xbf   :  { %v1624_v32 = vadd.f32 %v1468_v28, %v978_v26  ;;  %v980_v36 = vpop.f32.mrf.mxu1 }
  0xc0   :  { %v981_v43 = vadd.f32 %v980_v36, %v571_v33  ;;  %v2769_v33 = vld [vmem:[%s3724_s0 + $0x70] sm:$0xff] }
  0xc1   :  { %v1688_v37 = vadd.f32 %v3282_v3, %v1624_v32  ;;  %610 = vmatmul.bf16.gmra.mxu0 %v2766_v29  ;;  %1099 = vmatmul.bf16.gmra.mxu3 %v2742_v30 }
  0xc2   :  { %1019 = vmatmul.bf16.gmra.mxu1 %v2726_v34  ;;  %v2745_v34 = vld [vmem:[%s3724_s0 + $0xf8] sm:$0xff] }
  0xc3   :  { %v1883_v39 = vmax.f32 %v1688_v37, 0.0  ;;  %1510 = vmatmul.bf16.gmra.mxu2 %v2806_v35 }
  0xc4   :  { %v3321_v41 = vpop.f32.mrf.mxu3 }
  0xc5   :  { %v2844_v40 = vpack.c.bf16 %v1883_v39, %v1882_v38  ;;  %v2729_v38 = vld [vmem:[%s3724_s0 + $0x68] sm:$0xff]  ;;  %v2809_v39 = vld [vmem:[%s3724_s0 + $0x78] sm:$0xff] }
  0xc6   :  { %v1471_v42 = vpop.f32.mrf.mxu2  ;;  %v573_v44 = vpop.f32.mrf.mxu0 }
  0xc7   :  { %2996 = vst [vmem:[%s3726_s3 + $0x8] sm:$0xff] %v2844_v40   ;;  %v982_v45 = vpop.f32.mrf.mxu1  ;;  %v1625_v46 = vadd.f32 %v1471_v42, %v981_v43 }
  0xc8   :  { %v983_v47 = vadd.f32 %v982_v45, %v573_v44 }
  0xc9   :  { %v1689_v52 = vadd.f32 %v3282_v3, %v1625_v46 }
  0xcb   :  { %v1884_v59 = vmax.f32 %v1689_v52, 0.0 }
  0xcc   :  { %v3326_v48 = vpop.f32.mrf.mxu3 }
  0xce   :  { %v1473_v49 = vpop.f32.mrf.mxu2  ;;  %v576_v54 = vpop.f32.mrf.mxu0 }
  0xcf   :  { %v1626_v53 = vadd.f32 %v1473_v49, %v983_v47  ;;  %v985_v57 = vpop.f32.mrf.mxu1 }
  0xd0   :  { %v986_v1 = vadd.f32 %v985_v57, %v576_v54  ;;  %v2746_v57 = vld [vmem:[%s3724_s0 + $0x100] sm:$0xff] }
  0xd1   :  { %v1690_v58 = vadd.f32 %v3282_v3, %v1626_v53  ;;  %615 = vmatmul.bf16.gmra.mxu0 %v2767_v50  ;;  %1104 = vmatmul.bf16.gmra.mxu3 %v2743_v51 }
  0xd2   :  { %1024 = vmatmul.bf16.gmra.mxu1 %v2727_v55 }
  0xd3   :  { %v1885_v60 = vmax.f32 %v1690_v58, 0.0  ;;  %1515 = vmatmul.bf16.gmra.mxu2 %v2807_v56  ;;  %v2770_v56 = vld [vmem:[%s3724_s0 + $0x78] sm:$0xff] }
  0xd4   :  { %v3342_v63 = vpop.f32.mrf.mxu3 }
  0xd5   :  { %v2849_v61 = vpack.c.bf16 %v1885_v60, %v1884_v59 }
  0xd6   :  { %v1476_v0 = vpop.f32.mrf.mxu2  ;;  %v578_v2 = vpop.f32.mrf.mxu0 }
  0xd7   :  { %2997 = vst [vmem:[%s3726_s3 + $0x10] sm:$0xff] %v2849_v61   ;;  %v987_v4 = vpop.f32.mrf.mxu1  ;;  %v1627_v5 = vadd.f32 %v1476_v0, %v986_v1  ;;  %v2730_v61 = vld [vmem:[%s3724_s0 + $0x70] sm:$0xff]  ;;  %v2810_v0 = vld [vmem:[%s3724_s0 + $0x80] sm:$0xff] }
  0xd8   :  { %v988_v7 = vadd.f32 %v987_v4, %v578_v2 }
  0xd9   :  { %v1691_v12 = vadd.f32 %v3282_v3, %v1627_v5 }
  0xdb   :  { %v1886_v19 = vmax.f32 %v1691_v12, 0.0 }
  0xdc   :  { %v3347_v8 = vpop.f32.mrf.mxu3 }
  0xde   :  { %v1478_v9 = vpop.f32.mrf.mxu2  ;;  %v581_v14 = vpop.f32.mrf.mxu0 }
  0xdf   :  { %v1628_v13 = vadd.f32 %v1478_v9, %v988_v7  ;;  %v990_v17 = vpop.f32.mrf.mxu1 }
  0xe0   :  { %v991_v25 = vadd.f32 %v990_v17, %v581_v14 }
  0xe1   :  { %v1692_v18 = vadd.f32 %v3282_v3, %v1628_v13  ;;  %620 = vmatmul.bf16.gmra.mxu0 %v2768_v10  ;;  %1109 = vmatmul.bf16.gmra.mxu3 %v2744_v11 }
  0xe2   :  { %1029 = vmatmul.bf16.gmra.mxu1 %v2728_v15 }
  0xe3   :  { %v1887_v21 = vmax.f32 %v1692_v18, 0.0  ;;  %1520 = vmatmul.bf16.gmra.mxu2 %v2808_v16  ;;  %v2771_v18 = vld [vmem:[%s3724_s0 + $0x80] sm:$0xff] }
  0xe4   :  { %v3363_v23 = vpop.f32.mrf.mxu3 }
  0xe5   :  { %v2854_v22 = vpack.c.bf16 %v1887_v21, %v1886_v19  ;;  %v2747_v19 = vld [vmem:[%s3724_s0 + $0x108] sm:$0xff] }
  0xe6   :  { %v1481_v24 = vpop.f32.mrf.mxu2  ;;  %v583_v26 = vpop.f32.mrf.mxu0 }
  0xe7   :  { %2998 = vst [vmem:[%s3726_s3 + $0x18] sm:$0xff] %v2854_v22   ;;  %v992_v28 = vpop.f32.mrf.mxu1  ;;  %v1629_v29 = vadd.f32 %v1481_v24, %v991_v25  ;;  %v2731_v25 = vld [vmem:[%s3724_s0 + $0x78] sm:$0xff] }
  0xe8   :  { %v993_v30 = vadd.f32 %v992_v28, %v583_v26  ;;  %v2811_v26 = vld [vmem:[%s3724_s0 + $0x88] sm:$0xff] }
  0xe9   :  { %v1693_v35 = vadd.f32 %v3282_v3, %v1629_v29 }
  0xeb   :  { %v1888_v43 = vmax.f32 %v1693_v35, 0.0 }
  0xec   :  { %v3368_v31 = vpop.f32.mrf.mxu3 }
  0xee   :  { %v1483_v32 = vpop.f32.mrf.mxu2  ;;  %v586_v37 = vpop.f32.mrf.mxu0 }
  0xef   :  { %v1630_v36 = vadd.f32 %v1483_v32, %v993_v30  ;;  %v995_v40 = vpop.f32.mrf.mxu1 }
  0xf0   :  { %v996_v49 = vadd.f32 %v995_v40, %v586_v37 }
  0xf1   :  { %v1694_v42 = vadd.f32 %v3282_v3, %v1630_v36  ;;  %625 = vmatmul.bf16.gmra.mxu0 %v2769_v33  ;;  %1114 = vmatmul.bf16.gmra.mxu3 %v2745_v34 }
  0xf2   :  { %1034 = vmatmul.bf16.gmra.mxu1 %v2729_v38 }
  0xf3   :  { %v1889_v44 = vmax.f32 %v1694_v42, 0.0  ;;  %1525 = vmatmul.bf16.gmra.mxu2 %v2809_v39 }
  0xf4   :  { %v3384_v46 = vpop.f32.mrf.mxu3 }
  0xf5   :  { %v2859_v45 = vpack.c.bf16 %v1889_v44, %v1888_v43  ;;  %v2772_v44 = vld [vmem:[%s3724_s0 + $0x98] sm:$0xff] }
  0xf6   :  { %v1486_v47 = vpop.f32.mrf.mxu2  ;;  %v588_v50 = vpop.f32.mrf.mxu0 }
  0xf7   :  { %2999 = vst [vmem:[%s3726_s3 + $0x20] sm:$0xff] %v2859_v45   ;;  %v997_v51 = vpop.f32.mrf.mxu1  ;;  %v1631_v52 = vadd.f32 %v1486_v47, %v996_v49  ;;  %v2820_v45 = vld [vmem:[%s3724_s0 + $0xe0] sm:$0xff] }
  0xf8   :  { %v998_v53 = vadd.f32 %v997_v51, %v588_v50  ;;  %v2732_v51 = vld [vmem:[%s3724_s0 + $0x90] sm:$0xff] }
  0xf9   :  { %v1695_v58 = vadd.f32 %v3282_v3, %v1631_v52  ;;  %v2812_v52 = vld [vmem:[%s3724_s0 + $0xa0] sm:$0xff] }
  0xfb   :  { %v1890_v4 = vmax.f32 %v1695_v58, 0.0 }
  0xfc   :  { %v3389_v54 = vpop.f32.mrf.mxu3 }
  0xfe   :  { %v1488_v55 = vpop.f32.mrf.mxu2  ;;  %v591_v60 = vpop.f32.mrf.mxu0 }
  0xff   :  { %v1632_v59 = vadd.f32 %v1488_v55, %v998_v53  ;;  %v1000_v1 = vpop.f32.mrf.mxu1 }
 0x100   :  { %v1001_v11 = vadd.f32 %v1000_v1, %v591_v60 }
 0x101   :  { %v1696_v2 = vadd.f32 %v3282_v3, %v1632_v59  ;;  %630 = vmatmul.bf16.gmra.mxu0 %v2770_v56  ;;  %1119 = vmatmul.bf16.gmra.mxu3 %v2746_v57 }
 0x102   :  { %1039 = vmatmul.bf16.gmra.mxu1 %v2730_v61 }
 0x103   :  { %v1891_v5 = vmax.f32 %v1696_v2, 0.0  ;;  %1530 = vmatmul.bf16.gmra.mxu2 %v2810_v0 }
 0x104   :  { %v3405_v9 = vpop.f32.mrf.mxu3 }
 0x105   :  { %v2864_v7 = vpack.c.bf16 %v1891_v5, %v1890_v4 }
 0x106   :  { %v1491_v10 = vpop.f32.mrf.mxu2  ;;  %v593_v12 = vpop.f32.mrf.mxu0 }
 0x107   :  { %3000 = vst [vmem:[%s3726_s3 + $0x28] sm:$0xff] %v2864_v7   ;;  %v1002_v13 = vpop.f32.mrf.mxu1  ;;  %v1633_v14 = vadd.f32 %v1491_v10, %v1001_v11  ;;  %v2773_v10 = vld [vmem:[%s3724_s0 + $0xa0] sm:$0xff]  ;;  %v2821_v11 = vld [vmem:[%s3724_s0 + $0xe8] sm:$0xff] }
 0x108   :  { %v1003_v15 = vadd.f32 %v1002_v13, %v593_v12 }
 0x109   :  { %v1697_v21 = vadd.f32 %v3282_v3, %v1633_v14 }
 0x10b   :  { %v1892_v30 = vmax.f32 %v1697_v21, 0.0 }
 0x10c   :  { %v3410_v16 = vpop.f32.mrf.mxu3 }
 0x10e   :  { %v1493_v17 = vpop.f32.mrf.mxu2  ;;  %v596_v24 = vpop.f32.mrf.mxu0 }
 0x10f   :  { %v1634_v22 = vadd.f32 %v1493_v17, %v1003_v15  ;;  %v1005_v28 = vpop.f32.mrf.mxu1  ;;  %v2733_v15 = vld [vmem:[%s3724_s0 + $0x98] sm:$0xff]  ;;  %v2813_v17 = vld [vmem:[%s3724_s0 + $0xa8] sm:$0xff] }
 0x110   :  { %v1006_v36 = vadd.f32 %v1005_v28, %v596_v24 }
 0x111   :  { %v1698_v29 = vadd.f32 %v3282_v3, %v1634_v22  ;;  %635 = vmatmul.bf16.gmra.mxu0 %v2771_v18  ;;  %1124 = vmatmul.bf16.gmra.mxu3 %v2747_v19 }
 0x112   :  { %1044 = vmatmul.bf16.gmra.mxu1 %v2731_v25 }
 0x113   :  { %v1893_v32 = vmax.f32 %v1698_v29, 0.0  ;;  %1535 = vmatmul.bf16.gmra.mxu2 %v2811_v26 }
 0x114   :  { %v3426_v34 = vpop.f32.mrf.mxu3 }
 0x115   :  { %v2869_v33 = vpack.c.bf16 %v1893_v32, %v1892_v30 }
 0x116   :  { %v1496_v35 = vpop.f32.mrf.mxu2  ;;  %v598_v37 = vpop.f32.mrf.mxu0 }
 0x117   :  { %3001 = vst [vmem:[%s3726_s3 + $0x30] sm:$0xff] %v2869_v33   ;;  %v1007_v38 = vpop.f32.mrf.mxu1  ;;  %v1635_v39 = vadd.f32 %v1496_v35, %v1006_v36 }
 0x118   :  { %v1008_v40 = vadd.f32 %v1007_v38, %v598_v37  ;;  %v2774_v37 = vld [vmem:[%s3724_s0 + $0xa8] sm:$0xff]  ;;  %v2822_v38 = vld [vmem:[%s3724_s0 + $0xf0] sm:$0xff] }
 0x119   :  { %v1699_v47 = vadd.f32 %v3282_v3, %v1635_v39 }
 0x11b   :  { %v1894_v56 = vmax.f32 %v1699_v47, 0.0 }
 0x11c   :  { %v3431_v42 = vpop.f32.mrf.mxu3 }
 0x11e   :  { %v1498_v43 = vpop.f32.mrf.mxu2  ;;  %v601_v50 = vpop.f32.mrf.mxu0 }
 0x11f   :  { %v1636_v49 = vadd.f32 %v1498_v43, %v1008_v40  ;;  %v1010_v53 = vpop.f32.mrf.mxu1 }
 0x120   :  { %v1011_v61 = vadd.f32 %v1010_v53, %v601_v50 }
 0x121   :  { %v1700_v55 = vadd.f32 %v3282_v3, %v1636_v49  ;;  %640 = vmatmul.bf16.gmra.mxu0 %v2772_v44  ;;  %1580 = vmatmul.bf16.vlgmr.msra.gmra.mxu3 %v2820_v45  ;;  %v2734_v44 = vld [vmem:[%s3724_s0 + $0xa0] sm:$0xff]  ;;  %v2814_v45 = vld [vmem:[%s3724_s0 + $0xb0] sm:$0xff] }
 0x122   :  { %1049 = vmatmul.bf16.gmra.mxu1 %v2732_v51 }
 0x123   :  { %v1895_v57 = vmax.f32 %v1700_v55, 0.0  ;;  %1540 = vmatmul.bf16.gmra.mxu2 %v2812_v52 }
 0x124   :  { %v3447_v59 = vpop.f32.mrf.mxu3 }
 0x125   :  { %v2874_v58 = vpack.c.bf16 %v1895_v57, %v1894_v56 }
 0x126   :  { %v1501_v60 = vpop.f32.mrf.mxu2  ;;  %v603_v0 = vpop.f32.mrf.mxu0 }
 0x127   :  { %3002 = vst [vmem:[%s3726_s3 + $0x38] sm:$0xff] %v2874_v58   ;;  %v1012_v1 = vpop.f32.mrf.mxu1  ;;  %v1637_v2 = vadd.f32 %v1501_v60, %v1011_v61 }
 0x128   :  { %v1013_v4 = vadd.f32 %v1012_v1, %v603_v0 }
 0x129   :  { %v1701_v12 = vadd.f32 %v3282_v3, %v1637_v2  ;;  %v2775_v2 = vld [vmem:[%s3724_s0 + $0xb0] sm:$0xff] }
 0x12b   :  { %v1896_v21 = vmax.f32 %v1701_v12, 0.0  ;;  %v2735_v12 = vld [vmem:[%s3724_s0 + $0xa8] sm:$0xff] }
 0x12c   :  { %v3452_v5 = vpop.f32.mrf.mxu3 }
 0x12e   :  { %v1503_v7 = vpop.f32.mrf.mxu2  ;;  %v606_v14 = vpop.f32.mrf.mxu0 }
 0x12f   :  { %v1638_v13 = vadd.f32 %v1503_v7, %v1013_v4  ;;  %v1015_v18 = vpop.f32.mrf.mxu1  ;;  %v2823_v4 = vld [vmem:[%s3724_s0 + $0xf8] sm:$0xff] }
 0x130   :  { %v1016_v28 = vadd.f32 %v1015_v18, %v606_v14 }
 0x131   :  { %v1702_v19 = vadd.f32 %v3282_v3, %v1638_v13  ;;  %645 = vmatmul.bf16.gmra.mxu0 %v2773_v10  ;;  %1585 = vmatmul.bf16.gmra.mxu3 %v2821_v11  ;;  %v2815_v13 = vld [vmem:[%s3724_s0 + $0xb8] sm:$0xff] }
 0x132   :  { %1054 = vmatmul.bf16.gmra.mxu1 %v2733_v15 }
 0x133   :  { %v1897_v22 = vmax.f32 %v1702_v19, 0.0  ;;  %1545 = vmatmul.bf16.gmra.mxu2 %v2813_v17 }
 0x134   :  { %v3468_v25 = vpop.f32.mrf.mxu3 }
 0x135   :  { %v2879_v24 = vpack.c.bf16 %v1897_v22, %v1896_v21 }
 0x136   :  { %v1506_v26 = vpop.f32.mrf.mxu2  ;;  %v608_v29 = vpop.f32.mrf.mxu0 }
 0x137   :  { %3003 = vst [vmem:[%s3726_s3 + $0x40] sm:$0xff] %v2879_v24   ;;  %v1017_v30 = vpop.f32.mrf.mxu1  ;;  %v1639_v32 = vadd.f32 %v1506_v26, %v1016_v28 }
 0x138   :  { %v1018_v33 = vadd.f32 %v1017_v30, %v608_v29 }
 0x139   :  { %v1703_v39 = vadd.f32 %v3282_v3, %v1639_v32 }
 0x13b   :  { %v1898_v50 = vmax.f32 %v1703_v39, 0.0 }
 0x13c   :  { %v3473_v35 = vpop.f32.mrf.mxu3 }
 0x13e   :  { %v1508_v36 = vpop.f32.mrf.mxu2  ;;  %v611_v43 = vpop.f32.mrf.mxu0 }
 0x13f   :  { %v1640_v40 = vadd.f32 %v1508_v36, %v1018_v33  ;;  %v1020_v47 = vpop.f32.mrf.mxu1  ;;  %v2776_v36 = vld [vmem:[%s3724_s0 + $0xb8] sm:$0xff] }
 0x140   :  { %v1021_v56 = vadd.f32 %v1020_v47, %v611_v43  ;;  %v2736_v43 = vld [vmem:[%s3724_s0 + $0xb0] sm:$0xff] }
 0x141   :  { %v1704_v49 = vadd.f32 %v3282_v3, %v1640_v40  ;;  %650 = vmatmul.bf16.gmra.mxu0 %v2774_v37  ;;  %1590 = vmatmul.bf16.gmra.mxu3 %v2822_v38  ;;  %v2824_v37 = vld [vmem:[%s3724_s0 + $0x100] sm:$0xff] }
 0x142   :  { %1059 = vmatmul.bf16.gmra.mxu1 %v2734_v44  ;;  %v2816_v44 = vld [vmem:[%s3724_s0 + $0xc0] sm:$0xff] }
 0x143   :  { %v1899_v51 = vmax.f32 %v1704_v49, 0.0  ;;  %1550 = vmatmul.bf16.gmra.mxu2 %v2814_v45 }
 0x144   :  { %v3489_v53 = vpop.f32.mrf.mxu3 }
 0x145   :  { %v2884_v52 = vpack.c.bf16 %v1899_v51, %v1898_v50 }
 0x146   :  { %v1511_v55 = vpop.f32.mrf.mxu2  ;;  %v613_v57 = vpop.f32.mrf.mxu0 }
 0x147   :  { %3004 = vst [vmem:[%s3726_s3 + $0x48] sm:$0xff] %v2884_v52   ;;  %v1022_v58 = vpop.f32.mrf.mxu1  ;;  %v1641_v60 = vadd.f32 %v1511_v55, %v1021_v56 }
 0x148   :  { %v1023_v61 = vadd.f32 %v1022_v58, %v613_v57 }
 0x149   :  { %v1705_v7 = vadd.f32 %v3282_v3, %v1641_v60 }
 0x14b   :  { %v1900_v17 = vmax.f32 %v1705_v7, 0.0  ;;  %v2825_v7 = vld [vmem:[%s3724_s0 + $0x108] sm:$0xff] }
 0x14c   :  { %v3494_v0 = vpop.f32.mrf.mxu3 }
 0x14e   :  { %v1513_v1 = vpop.f32.mrf.mxu2  ;;  %v616_v11 = vpop.f32.mrf.mxu0 }
 0x14f   :  { %v1642_v10 = vadd.f32 %v1513_v1, %v1023_v61  ;;  %v1025_v14 = vpop.f32.mrf.mxu1 }
 0x150   :  { %v1026_v24 = vadd.f32 %v1025_v14, %v616_v11  ;;  %v2817_v14 = vld [vmem:[%s3724_s0 + $0xc8] sm:$0xff] }
 0x151   :  { %v1706_v15 = vadd.f32 %v3282_v3, %v1642_v10  ;;  %655 = vmatmul.bf16.gmra.mxu0 %v2775_v2  ;;  %1595 = vmatmul.bf16.gmra.mxu3 %v2823_v4  ;;  %v2777_v4 = vld [vmem:[%s3724_s0 + $0xc0] sm:$0xff] }
 0x152   :  { %1064 = vmatmul.bf16.gmra.mxu1 %v2735_v12 }
 0x153   :  { %v1901_v18 = vmax.f32 %v1706_v15, 0.0  ;;  %1555 = vmatmul.bf16.gmra.mxu2 %v2815_v13  ;;  %v2737_v13 = vld [vmem:[%s3724_s0 + $0xb8] sm:$0xff] }
 0x154   :  { %v3510_v21 = vpop.f32.mrf.mxu3 }
 0x155   :  { %v2889_v19 = vpack.c.bf16 %v1901_v18, %v1900_v17 }
 0x156   :  { %v1516_v22 = vpop.f32.mrf.mxu2  ;;  %v618_v26 = vpop.f32.mrf.mxu0 }
 0x157   :  { %3005 = vst [vmem:[%s3726_s3 + $0x50] sm:$0xff] %v2889_v19   ;;  %v1027_v28 = vpop.f32.mrf.mxu1  ;;  %v1643_v29 = vadd.f32 %v1516_v22, %v1026_v24 }
 0x158   :  { %v1028_v30 = vadd.f32 %v1027_v28, %v618_v26 }
 0x159   :  { %v1707_v38 = vadd.f32 %v3282_v3, %v1643_v29 }
 0x15b   :  { %v1902_v49 = vmax.f32 %v1707_v38, 0.0 }
 0x15c   :  { %v3515_v32 = vpop.f32.mrf.mxu3 }
 0x15e   :  { %v1518_v33 = vpop.f32.mrf.mxu2  ;;  %v621_v40 = vpop.f32.mrf.mxu0 }
 0x15f   :  { %v1644_v39 = vadd.f32 %v1518_v33, %v1028_v30  ;;  %v1030_v45 = vpop.f32.mrf.mxu1 }
 0x160   :  { %v1031_v56 = vadd.f32 %v1030_v45, %v621_v40  ;;  %v2826_v40 = vld [vmem:[%s3724_s0 + $0x110] sm:$0xff] }
 0x161   :  { %v1708_v47 = vadd.f32 %v3282_v3, %v1644_v39  ;;  %660 = vmatmul.bf16.gmra.mxu0 %v2776_v36  ;;  %1600 = vmatmul.bf16.gmra.mxu3 %v2824_v37  ;;  %v2778_v39 = vld [vmem:[%s3724_s0 + $0xc8] sm:$0xff] }
 0x162   :  { %1069 = vmatmul.bf16.gmra.mxu1 %v2736_v43 }
 0x163   :  { %v1903_v50 = vmax.f32 %v1708_v47, 0.0  ;;  %1560 = vmatmul.bf16.gmra.mxu2 %v2816_v44  ;;  %v2738_v47 = vld [vmem:[%s3724_s0 + $0xc0] sm:$0xff] }
 0x164   :  { %v3531_v52 = vpop.f32.mrf.mxu3 }
 0x165   :  { %v2894_v51 = vpack.c.bf16 %v1903_v50, %v1902_v49  ;;  %v2818_v49 = vld [vmem:[%s3724_s0 + $0xd0] sm:$0xff] }
 0x166   :  { %v1521_v55 = vpop.f32.mrf.mxu2  ;;  %v623_v57 = vpop.f32.mrf.mxu0 }
 0x167   :  { %3006 = vst [vmem:[%s3726_s3 + $0x58] sm:$0xff] %v2894_v51   ;;  %v1032_v58 = vpop.f32.mrf.mxu1  ;;  %v1645_v60 = vadd.f32 %v1521_v55, %v1031_v56 }
 0x168   :  { %v1033_v61 = vadd.f32 %v1032_v58, %v623_v57 }
 0x169   :  { %v1709_v10 = vadd.f32 %v3282_v3, %v1645_v60 }
 0x16b   :  { %v1904_v18 = vmax.f32 %v1709_v10, 0.0 }
 0x16c   :  { %v3536_v1 = vpop.f32.mrf.mxu3 }
 0x16e   :  { %v1523_v2 = vpop.f32.mrf.mxu2  ;;  %v626_v12 = vpop.f32.mrf.mxu0 }
 0x16f   :  { %v1646_v11 = vadd.f32 %v1523_v2, %v1033_v61  ;;  %v1035_v15 = vpop.f32.mrf.mxu1 }
 0x170   :  { %v1036_v28 = vadd.f32 %v1035_v15, %v626_v12 }
 0x171   :  { %v1710_v17 = vadd.f32 %v3282_v3, %v1646_v11  ;;  %665 = vmatmul.bf16.gmra.mxu0 %v2777_v4  ;;  %1605 = vmatmul.bf16.gmra.mxu3 %v2825_v7 }
 0x172   :  { %1074 = vmatmul.bf16.gmra.mxu1 %v2737_v13  ;;  %v2779_v13 = vld [vmem:[%s3724_s0 + $0xd0] sm:$0xff] }
 0x173   :  { %v1905_v19 = vmax.f32 %v1710_v17, 0.0  ;;  %1565 = vmatmul.bf16.gmra.mxu2 %v2817_v14  ;;  %v2827_v14 = vld [vmem:[%s3724_s0 + $0x118] sm:$0xff] }
 0x174   :  { %v3552_v24 = vpop.f32.mrf.mxu3 }
 0x175   :  { %v2899_v22 = vpack.c.bf16 %v1905_v19, %v1904_v18  ;;  %v2739_v19 = vld [vmem:[%s3724_s0 + $0xc8] sm:$0xff] }
 0x176   :  { %v1526_v26 = vpop.f32.mrf.mxu2  ;;  %v628_v29 = vpop.f32.mrf.mxu0 }
 0x177   :  { %3007 = vst [vmem:[%s3726_s3 + $0x60] sm:$0xff] %v2899_v22   ;;  %v1037_v30 = vpop.f32.mrf.mxu1  ;;  %v1647_v33 = vadd.f32 %v1526_v26, %v1036_v28  ;;  %v2819_v22 = vld [vmem:[%s3724_s0 + $0xd8] sm:$0xff] }
 0x178   :  { %v1038_v36 = vadd.f32 %v1037_v30, %v628_v29 }
 0x179   :  { %v1711_v43 = vadd.f32 %v3282_v3, %v1647_v33 }
 0x17b   :  { %v1906_v55 = vmax.f32 %v1711_v43, 0.0 }
 0x17c   :  { %v3557_v37 = vpop.f32.mrf.mxu3 }
 0x17e   :  { %v1528_v38 = vpop.f32.mrf.mxu2  ;;  %v631_v45 = vpop.f32.mrf.mxu0 }
 0x17f   :  { %v1648_v44 = vadd.f32 %v1528_v38, %v1038_v36  ;;  %v1040_v50 = vpop.f32.mrf.mxu1 }
 0x180   :  { %v1041_v61 = vadd.f32 %v1040_v50, %v631_v45 }
 0x181   :  { %v1712_v51 = vadd.f32 %v3282_v3, %v1648_v44  ;;  %670 = vmatmul.bf16.gmra.mxu0 %v2778_v39  ;;  %1610 = vmatmul.bf16.gmra.mxu3 %v2826_v40 }
 0x182   :  { %1079 = vmatmul.bf16.gmra.mxu1 %v2738_v47 }
 0x183   :  { %v1907_v56 = vmax.f32 %v1712_v51, 0.0  ;;  %1570 = vmatmul.bf16.gmra.mxu2 %v2818_v49 }
 0x184   :  { %v3573_v58 = vpop.f32.mrf.mxu3 }
 0x185   :  { %v2904_v57 = vpack.c.bf16 %v1907_v56, %v1906_v55 }
 0x186   :  { %v1531_v60 = vpop.f32.mrf.mxu2  ;;  %v633_v2 = vpop.f32.mrf.mxu0 }
 0x187   :  { %3008 = vst [vmem:[%s3726_s3 + $0x68] sm:$0xff] %v2904_v57   ;;  %v1042_v4 = vpop.f32.mrf.mxu1  ;;  %v1649_v7 = vadd.f32 %v1531_v60, %v1041_v61 }
 0x188   :  { %v1043_v10 = vadd.f32 %v1042_v4, %v633_v2 }
 0x189   :  { %v1713_v15 = vadd.f32 %v3282_v3, %v1649_v7 }
 0x18b   :  { %v1908_v29 = vmax.f32 %v1713_v15, 0.0 }
 0x18c   :  { %v3578_v11 = vpop.f32.mrf.mxu3 }
 0x18e   :  { %v1533_v12 = vpop.f32.mrf.mxu2  ;;  %v636_v18 = vpop.f32.mrf.mxu0 }
 0x18f   :  { %v1650_v17 = vadd.f32 %v1533_v12, %v1043_v10  ;;  %v1045_v26 = vpop.f32.mrf.mxu1 }
 0x190   :  { %v1046_v39 = vadd.f32 %v1045_v26, %v636_v18  ;;  %v1093_v18 = vadd.f32 %v3452_v5, %v3284_v6 }
 0x191   :  { %v1714_v28 = vadd.f32 %v3282_v3, %v1650_v17  ;;  %675 = vmatmul.bf16.gmra.mxu0 %v2779_v13  ;;  %1615 = vmatmul.bf16.gmra.mxu3 %v2827_v14  ;;  %v1091_v13 = vadd.f32 %v3447_v59, %v3277_v62 }
 0x192   :  { %1084 = vmatmul.bf16.gmra.mxu1 %v2739_v19 }
 0x193   :  { %v1909_v30 = vmax.f32 %v1714_v28, 0.0  ;;  %1575 = vmatmul.bf16.gmra.mxu2 %v2819_v22 }
 0x194   :  { %v3594_v36 = vpop.f32.mrf.mxu3 }
 0x195   :  { %v2909_v33 = vpack.c.bf16 %v1909_v30, %v1908_v29 }
 0x196   :  { %v1536_v38 = vpop.f32.mrf.mxu2  ;;  %v638_v40 = vpop.f32.mrf.mxu0 }
 0x197   :  { %3009 = vst [vmem:[%s3726_s3 + $0x70] sm:$0xff] %v2909_v33   ;;  %v1047_v43 = vpop.f32.mrf.mxu1  ;;  %v1651_v44 = vadd.f32 %v1536_v38, %v1046_v39 }
 0x198   :  { %v1048_v45 = vadd.f32 %v1047_v43, %v638_v40 }
 0x199   :  { %v1715_v50 = vadd.f32 %v3282_v3, %v1651_v44 }
 0x19b   :  { %v1910_v60 = vmax.f32 %v1715_v50, 0.0 }
 0x19c   :  { %v3599_v47 = vpop.f32.mrf.mxu3 }
 0x19e   :  { %v1538_v49 = vpop.f32.mrf.mxu2  ;;  %v641_v55 = vpop.f32.mrf.mxu0 }
 0x19f   :  { %v1652_v51 = vadd.f32 %v1538_v49, %v1048_v45  ;;  %v1050_v56 = vpop.f32.mrf.mxu1 }
 0x1a0   :  { %v1051_v10 = vadd.f32 %v1050_v56, %v641_v55  ;;  %v1096_v56 = vadd.f32 %v3468_v25, %v3300_v20 }
 0x1a1   :  { %v1716_v57 = vadd.f32 %v3282_v3, %v1652_v51 }
 0x1a3   :  { %v1911_v61 = vmax.f32 %v1716_v57, 0.0 }
 0x1a4   :  { %v1581_v4 = vpop.f32.mrf.mxu3 }
 0x1a5   :  { %v2914_v2 = vpack.c.bf16 %v1911_v61, %v1910_v60  ;;  %v1669_v15 = vadd.f32 %v1581_v4, %v1091_v13 }
 0x1a6   :  { %v1541_v7 = vpop.f32.mrf.mxu2  ;;  %v643_v12 = vpop.f32.mrf.mxu0 }
 0x1a7   :  { %3010 = vst [vmem:[%s3726_s3 + $0x78] sm:$0xff] %v2914_v2   ;;  %v1052_v14 = vpop.f32.mrf.mxu1  ;;  %v1653_v17 = vadd.f32 %v1541_v7, %v1051_v10  ;;  %v1733_v26 = vadd.f32 %v3282_v3, %v1669_v15  ;;  %v1098_v2 = vadd.f32 %v3473_v35, %v3305_v27 }
 0x1a8   :  { %v1053_v19 = vadd.f32 %v1052_v14, %v643_v12 }
 0x1a9   :  { %v1717_v30 = vadd.f32 %v3282_v3, %v1653_v17  ;;  %v1928_v59 = vmax.f32 %v1733_v26, 0.0 }
 0x1ab   :  { %v1912_v44 = vmax.f32 %v1717_v30, 0.0 }
 0x1ac   :  { %v1583_v22 = vpop.f32.mrf.mxu3 }
 0x1ad   :  { %v1670_v29 = vadd.f32 %v1583_v22, %v1093_v18 }
 0x1ae   :  { %v1543_v28 = vpop.f32.mrf.mxu2  ;;  %v646_v38 = vpop.f32.mrf.mxu0 }
 0x1af   :  { %v1654_v33 = vadd.f32 %v1543_v28, %v1053_v19  ;;  %v1734_v39 = vadd.f32 %v3282_v3, %v1670_v29  ;;  %v1055_v40 = vpop.f32.mrf.mxu1 }
 0x1b0   :  { %v1056_v51 = vadd.f32 %v1055_v40, %v646_v38 }
 0x1b1   :  { %v1718_v62 = vadd.f32 %v3282_v3, %v1654_v33  ;;  %v1929_v43 = vmax.f32 %v1734_v39, 0.0  ;;  %v1101_v39 = vadd.f32 %v3489_v53, %v3321_v41 }
 0x1b3   :  { %v1913_v45 = vmax.f32 %v1718_v62, 0.0  ;;  %v2959_v6 = vpack.c.bf16 %v1929_v43, %v1928_v59  ;;  %v1103_v43 = vadd.f32 %v3494_v0, %v3326_v48 }
 0x1b4   :  { %v1586_v49 = vpop.f32.mrf.mxu3 }
 0x1b5   :  { %v2919_v5 = vpack.c.bf16 %v1913_v45, %v1912_v44  ;;  %3019 = vst [vmem:[%s3726_s3 + $0xc0] sm:$0xff] %v2959_v6   ;;  %v1671_v60 = vadd.f32 %v1586_v49, %v1096_v56 }
 0x1b6   :  { %v1546_v50 = vpop.f32.mrf.mxu2  ;;  %v648_v55 = vpop.f32.mrf.mxu0 }
 0x1b7   :  { %3011 = vst [vmem:[%s3726_s3 + $0x80] sm:$0xff] %v2919_v5   ;;  %v1057_v57 = vpop.f32.mrf.mxu1  ;;  %v1655_v61 = vadd.f32 %v1546_v50, %v1056_v51  ;;  %v1735_v10 = vadd.f32 %v3282_v3, %v1671_v60 }
 0x1b8   :  { %v1058_v4 = vadd.f32 %v1057_v57, %v648_v55 }
 0x1b9   :  { %v1719_v14 = vadd.f32 %v3282_v3, %v1655_v61  ;;  %v1930_v25 = vmax.f32 %v1735_v10, 0.0 }
 0x1bb   :  { %v1914_v26 = vmax.f32 %v1719_v14, 0.0 }
 0x1bc   :  { %v1588_v7 = vpop.f32.mrf.mxu3 }
 0x1bd   :  { %v1672_v13 = vadd.f32 %v1588_v7, %v1098_v2 }
 0x1be   :  { %v1548_v12 = vpop.f32.mrf.mxu2  ;;  %v651_v17 = vpop.f32.mrf.mxu0 }
 0x1bf   :  { %v1656_v15 = vadd.f32 %v1548_v12, %v1058_v4  ;;  %v1736_v18 = vadd.f32 %v3282_v3, %v1672_v13  ;;  %v1060_v19 = vpop.f32.mrf.mxu1  ;;  %v1106_v13 = vadd.f32 %v3510_v21, %v3342_v63 }
 0x1c0   :  { %v1061_v33 = vadd.f32 %v1060_v19, %v651_v17 }
 0x1c1   :  { %v1720_v20 = vadd.f32 %v3282_v3, %v1656_v15  ;;  %v1931_v22 = vmax.f32 %v1736_v18, 0.0  ;;  %v1108_v18 = vadd.f32 %v3515_v32, %v3347_v8 }
 0x1c3   :  { %v1915_v28 = vmax.f32 %v1720_v20, 0.0  ;;  %v2964_v27 = vpack.c.bf16 %v1931_v22, %v1930_v25 }
 0x1c4   :  { %v1591_v29 = vpop.f32.mrf.mxu3 }
 0x1c5   :  { %v2924_v35 = vpack.c.bf16 %v1915_v28, %v1914_v26  ;;  %3020 = vst [vmem:[%s3726_s3 + $0xc8] sm:$0xff] %v2964_v27   ;;  %v1673_v62 = vadd.f32 %v1591_v29, %v1101_v39 }
 0x1c6   :  { %v1551_v30 = vpop.f32.mrf.mxu2  ;;  %v653_v38 = vpop.f32.mrf.mxu0 }
 0x1c7   :  { %3012 = vst [vmem:[%s3726_s3 + $0x88] sm:$0xff] %v2924_v35   ;;  %v1062_v40 = vpop.f32.mrf.mxu1  ;;  %v1657_v59 = vadd.f32 %v1551_v30, %v1061_v33  ;;  %v1737_v6 = vadd.f32 %v3282_v3, %v1673_v62 }
 0x1c8   :  { %v1063_v44 = vadd.f32 %v1062_v40, %v653_v38 }
 0x1c9   :  { %v1721_v50 = vadd.f32 %v3282_v3, %v1657_v59  ;;  %v1932_v53 = vmax.f32 %v1737_v6, 0.0 }
 0x1cb   :  { %v1916_v61 = vmax.f32 %v1721_v50, 0.0 }
 0x1cc   :  { %v1593_v45 = vpop.f32.mrf.mxu3 }
 0x1cd   :  { %v1674_v49 = vadd.f32 %v1593_v45, %v1103_v43 }
 0x1ce   :  { %v1553_v5 = vpop.f32.mrf.mxu2  ;;  %v656_v55 = vpop.f32.mrf.mxu0 }
 0x1cf   :  { %v1658_v51 = vadd.f32 %v1553_v5, %v1063_v44  ;;  %v1738_v56 = vadd.f32 %v3282_v3, %v1674_v49  ;;  %v1065_v57 = vpop.f32.mrf.mxu1  ;;  %v1113_v5 = vadd.f32 %v3536_v1, %v3368_v31 }
 0x1d0   :  { %v1066_v10 = vadd.f32 %v1065_v57, %v656_v55 }
 0x1d1   :  { %v1722_v41 = vadd.f32 %v3282_v3, %v1658_v51  ;;  %v1933_v60 = vmax.f32 %v1738_v56, 0.0  ;;  %v3669_v51 = vld [vmem:[%s3725_s2] ss:$0 sm:$0xff] }
 0x1d3   :  { %v1917_v2 = vmax.f32 %v1722_v41, 0.0  ;;  %v2969_v48 = vpack.c.bf16 %v1933_v60, %v1932_v53 }
 0x1d4   :  { %v1596_v4 = vpop.f32.mrf.mxu3 }
 0x1d5   :  { %v2929_v0 = vpack.c.bf16 %v1917_v2, %v1916_v61  ;;  %3021 = vst [vmem:[%s3726_s3 + $0xd0] sm:$0xff] %v2969_v48   ;;  %v1675_v15 = vadd.f32 %v1596_v4, %v1106_v13 }
 0x1d6   :  { %v1556_v7 = vpop.f32.mrf.mxu2  ;;  %v658_v12 = vpop.f32.mrf.mxu0 }
 0x1d7   :  { %3013 = vst [vmem:[%s3726_s3 + $0x90] sm:$0xff] %v2929_v0   ;;  %v1067_v14 = vpop.f32.mrf.mxu1  ;;  %v1659_v17 = vadd.f32 %v1556_v7, %v1066_v10  ;;  %v1739_v25 = vadd.f32 %v3282_v3, %v1675_v15 }
 0x1d8   :  { %v1068_v19 = vadd.f32 %v1067_v14, %v658_v12  ;;  %v1116_v14 = vadd.f32 %v3552_v24, %v3384_v46 }
 0x1d9   :  { %v1723_v28 = vadd.f32 %v3282_v3, %v1659_v17  ;;  %v1934_v21 = vmax.f32 %v1739_v25, 0.0 }
 0x1db   :  { %v1918_v38 = vmax.f32 %v1723_v28, 0.0 }
 0x1dc   :  { %v1598_v20 = vpop.f32.mrf.mxu3 }
 0x1dd   :  { %v1676_v26 = vadd.f32 %v1598_v20, %v1108_v18 }
 0x1de   :  { %v1558_v22 = vpop.f32.mrf.mxu2  ;;  %v661_v35 = vpop.f32.mrf.mxu0 }
 0x1df   :  { %v1660_v27 = vadd.f32 %v1558_v22, %v1068_v19  ;;  %v1740_v29 = vadd.f32 %v3282_v3, %v1676_v26  ;;  %v1070_v30 = vpop.f32.mrf.mxu1  ;;  %v1118_v19 = vadd.f32 %v3557_v37, %v3389_v54 }
 0x1e0   :  { %v1071_v59 = vadd.f32 %v1070_v30, %v661_v35 }
 0x1e1   :  { %v1724_v63 = vadd.f32 %v3282_v3, %v1660_v27  ;;  %v1935_v33 = vmax.f32 %v1740_v29, 0.0  ;;  %v1111_v3 = vadd.f32 %v3531_v52, %v3363_v23 }
 0x1e3   :  { %v1919_v39 = vmax.f32 %v1724_v63, 0.0  ;;  %v2974_v8 = vpack.c.bf16 %v1935_v33, %v1934_v21 }
 0x1e4   :  { %v1601_v40 = vpop.f32.mrf.mxu3 }
 0x1e5   :  { %v2934_v32 = vpack.c.bf16 %v1919_v39, %v1918_v38  ;;  %3022 = vst [vmem:[%s3726_s3 + $0xd8] sm:$0xff] %v2974_v8   ;;  %v1677_v45 = vadd.f32 %v1601_v40, %v1111_v3 }
 0x1e6   :  { %v1561_v62 = vpop.f32.mrf.mxu2  ;;  %v663_v43 = vpop.f32.mrf.mxu0 }
 0x1e7   :  { %3014 = vst [vmem:[%s3726_s3 + $0x98] sm:$0xff] %v2934_v32   ;;  %v1072_v44 = vpop.f32.mrf.mxu1  ;;  %v1661_v6 = vadd.f32 %v1561_v62, %v1071_v59  ;;  %v1741_v55 = vadd.f32 %v3669_v51, %v1677_v45  ;;  %v1121_v62 = vadd.f32 %v3573_v58, %v3405_v9 }
 0x1e8   :  { %v1073_v49 = vadd.f32 %v1072_v44, %v663_v43  ;;  %v1123_v44 = vadd.f32 %v3578_v11, %v3410_v16 }
 0x1e9   :  { %v1725_v41 = vadd.f32 %v3669_v51, %v1661_v6  ;;  %v1936_v1 = vmax.f32 %v1741_v55, 0.0 }
 0x1eb   :  { %v1920_v2 = vmax.f32 %v1725_v41, 0.0 }
 0x1ec   :  { %v1603_v50 = vpop.f32.mrf.mxu3 }
 0x1ed   :  { %v1678_v57 = vadd.f32 %v1603_v50, %v1113_v5 }
 0x1ee   :  { %v1563_v56 = vpop.f32.mrf.mxu2  ;;  %v666_v52 = vpop.f32.mrf.mxu0 }
 0x1ef   :  { %v1662_v23 = vadd.f32 %v1563_v56, %v1073_v49  ;;  %v1742_v53 = vadd.f32 %v3669_v51, %v1678_v57  ;;  %v1075_v60 = vpop.f32.mrf.mxu1 }
 0x1f0   :  { %v1076_v12 = vadd.f32 %v1075_v60, %v666_v52 }
 0x1f1   :  { %v1726_v31 = vadd.f32 %v3669_v51, %v1662_v23  ;;  %v1937_v61 = vmax.f32 %v1742_v53, 0.0 }
 0x1f3   :  { %v1921_v48 = vmax.f32 %v1726_v31, 0.0  ;;  %v2979_v0 = vpack.c.bf16 %v1937_v61, %v1936_v1 }
 0x1f4   :  { %v1606_v7 = vpop.f32.mrf.mxu3 }
 0x1f5   :  { %v2939_v4 = vpack.c.bf16 %v1921_v48, %v1920_v2  ;;  %3023 = vst [vmem:[%s3726_s3 + $0xe0] sm:$0xff] %v2979_v0   ;;  %v1679_v17 = vadd.f32 %v1606_v7, %v1116_v14  ;;  %v1126_v2 = vadd.f32 %v3594_v36, %v3426_v34 }
 0x1f6   :  { %v1566_v10 = vpop.f32.mrf.mxu2  ;;  %v668_v13 = vpop.f32.mrf.mxu0 }
 0x1f7   :  { %3015 = vst [vmem:[%s3726_s3 + $0xa0] sm:$0xff] %v2939_v4   ;;  %v1077_v15 = vpop.f32.mrf.mxu1  ;;  %v1663_v18 = vadd.f32 %v1566_v10, %v1076_v12  ;;  %v1743_v22 = vadd.f32 %v3669_v51, %v1679_v17  ;;  %v1128_v10 = vadd.f32 %v3599_v47, %v3431_v42 }
 0x1f8   :  { %v1078_v20 = vadd.f32 %v1077_v15, %v668_v13 }
 0x1f9   :  { %v1727_v27 = vadd.f32 %v3669_v51, %v1663_v18  ;;  %v1938_v24 = vmax.f32 %v1743_v22, 0.0 }
 0x1fb   :  { %v1922_v33 = vmax.f32 %v1727_v27, 0.0 }
 0x1fc   :  { %v1608_v25 = vpop.f32.mrf.mxu3 }
 0x1fd   :  { %v1680_v28 = vadd.f32 %v1608_v25, %v1118_v19 }
 0x1fe   :  { %v1568_v26 = vpop.f32.mrf.mxu2  ;;  %v671_v29 = vpop.f32.mrf.mxu0 }
 0x1ff   :  { %v1664_v35 = vadd.f32 %v1568_v26, %v1078_v20  ;;  %v1744_v30 = vadd.f32 %v3669_v51, %v1680_v28  ;;  %v1080_v63 = vpop.f32.mrf.mxu1 }
 0x200   :  { %v1081_v32 = vadd.f32 %v1080_v63, %v671_v29 }
 0x201   :  { %v1728_v46 = vadd.f32 %v3669_v51, %v1664_v35  ;;  %v1939_v21 = vmax.f32 %v1744_v30, 0.0 }
 0x203   :  { %v1923_v38 = vmax.f32 %v1728_v46, 0.0  ;;  %v2984_v54 = vpack.c.bf16 %v1939_v21, %v1938_v24 }
 0x204   :  { %v1611_v39 = vpop.f32.mrf.mxu3 }
 0x205   :  { %v2944_v37 = vpack.c.bf16 %v1923_v38, %v1922_v33  ;;  %3024 = vst [vmem:[%s3726_s3 + $0xe8] sm:$0xff] %v2984_v54   ;;  %v1681_v43 = vadd.f32 %v1611_v39, %v1121_v62 }
 0x206   :  { %v1571_v8 = vpop.f32.mrf.mxu2  ;;  %v673_v40 = vpop.f32.mrf.mxu0 }
 0x207   :  { %3016 = vst [vmem:[%s3726_s3 + $0xa8] sm:$0xff] %v2944_v37   ;;  %v1082_v59 = vpop.f32.mrf.mxu1  ;;  %v1665_v3 = vadd.f32 %v1571_v8, %v1081_v32  ;;  %v1745_v5 = vadd.f32 %v3669_v51, %v1681_v43 }
 0x208   :  { %v1083_v45 = vadd.f32 %v1082_v59, %v673_v40 }
 0x209   :  { %v1729_v55 = vadd.f32 %v3669_v51, %v1665_v3  ;;  %v1940_v58 = vmax.f32 %v1745_v5, 0.0 }
 0x20b   :  { %v1924_v53 = vmax.f32 %v1729_v55, 0.0 }
 0x20c   :  { %v1613_v6 = vpop.f32.mrf.mxu3 }
 0x20d   :  { %v1682_v50 = vadd.f32 %v1613_v6, %v1123_v44 }
 0x20e   :  { %v1573_v49 = vpop.f32.mrf.mxu2  ;;  %v676_v41 = vpop.f32.mrf.mxu0 }
 0x20f   :  { %v1666_v56 = vadd.f32 %v1573_v49, %v1083_v45  ;;  %v1746_v57 = vadd.f32 %v3669_v51, %v1682_v50  ;;  %v1085_v23 = vpop.f32.mrf.mxu1 }
 0x210   :  { %v1086_v61 = vadd.f32 %v1085_v23, %v676_v41 }
 0x211   :  { %v1730_v9 = vadd.f32 %v3669_v51, %v1666_v56  ;;  %v1941_v52 = vmax.f32 %v1746_v57, 0.0 }
 0x213   :  { %v1925_v60 = vmax.f32 %v1730_v9, 0.0  ;;  %v2989_v16 = vpack.c.bf16 %v1941_v52, %v1940_v58 }
 0x214   :  { %v1616_v31 = vpop.f32.mrf.mxu3 }
 0x215   :  { %v2949_v11 = vpack.c.bf16 %v1925_v60, %v1924_v53  ;;  %3025 = vst [vmem:[%s3726_s3 + $0xf0] sm:$0xff] %v2989_v16   ;;  %v1683_v48 = vadd.f32 %v1616_v31, %v1126_v2 }
 0x216   :  { %v1576_v1 = vpop.f32.mrf.mxu2  ;;  %v678_v0 = vpop.f32.mrf.mxu0 }
 0x217   :  { %3017 = vst [vmem:[%s3726_s3 + $0xb0] sm:$0xff] %v2949_v11   ;;  %v1087_v4 = vpop.f32.mrf.mxu1  ;;  %v1667_v7 = vadd.f32 %v1576_v1, %v1086_v61  ;;  %v1747_v14 = vadd.f32 %v3669_v51, %v1683_v48 }
 0x218   :  { %v1088_v12 = vadd.f32 %v1087_v4, %v678_v0 }
 0x219   :  { %v1731_v18 = vadd.f32 %v3669_v51, %v1667_v7  ;;  %v1942_v36 = vmax.f32 %v1747_v14, 0.0 }
 0x21b   :  { %v1926_v22 = vmax.f32 %v1731_v18, 0.0 }
 0x21c   :  { %v1618_v13 = vpop.f32.mrf.mxu3 }
 0x21d   :  { %v1684_v17 = vadd.f32 %v1618_v13, %v1128_v10 }
 0x21e   :  { %v1578_v15 = vpop.f32.mrf.mxu2 }
 0x21f   :  { %v1668_v19 = vadd.f32 %v1578_v15, %v1088_v12  ;;  %v1748_v20 = vadd.f32 %v3669_v51, %v1684_v17 }
 0x221   :  { %v1732_v34 = vadd.f32 %v3669_v51, %v1668_v19  ;;  %v1943_v25 = vmax.f32 %v1748_v20, 0.0 }
 0x223   :  { %v1927_v26 = vmax.f32 %v1732_v34, 0.0  ;;  %v2994_v28 = vpack.c.bf16 %v1943_v25, %v1942_v36 }
 0x225   :  { %v2954_v27 = vpack.c.bf16 %v1927_v26, %v1926_v22  ;;  %3026 = vst [vmem:[%s3726_s3 + $0xf8] sm:$0xff] %v2994_v28  }
 0x227   :  { %3018 = vst [vmem:[%s3726_s3 + $0xb8] sm:$0xff] %v2954_v27  }

// kernel: basic_block_forward.3
= control target key start
LH: loop header
LB: loop body
LE: loop exit
PB: predicated region body
PF: predicated region fallthrough
CT: control target
= control target key end

     0   :  { %s9815_s1 = inlined_call_operand.vmem [shape: bf16[3,384,128], index: 1, kind: input, shape index: {}]   ;;  %s9816_s0 = inlined_call_operand.vmem [shape: bf16[2,18,16,384], index: 0, kind: input, shape index: {}]   ;;  %s9817_s2 = inlined_call_operand.vmem [shape: f32[1,128], index: 2, kind: input, shape index: {}]   ;;  %s9818_s3 = inlined_call_operand.vmem [shape: bf16[512,128], index: 3, kind: input, shape index: {}]   ;;  %s9819_s4 = inlined_call_operand.vmem [shape: f32[512,128], index: 4, kind: output, shape index: {}]  }
   0x1   :  { %v6772_v0 = vld [vmem:[%s9815_s1 + $0xf8] sm:$0xff]  ;;  %v6771_v1 = vld [vmem:[%s9815_s1 + $0xf0] sm:$0xff]  ;;  %v6770_v2 = vld [vmem:[%s9815_s1 + $0xe8] sm:$0xff] }
   0x2   :  { %1163 = vmatpush.bf16.msra.mxu0 %v6772_v0  ;;  %7068 = vmatpush.bf16.msra.mxu1 %v6772_v0  ;;  %v6769_v3 = vld [vmem:[%s9815_s1 + $0xe0] sm:$0xff]  ;;  %v6768_v4 = vld [vmem:[%s9815_s1 + $0xd8] sm:$0xff]  ;;  %v6767_v5 = vld [vmem:[%s9815_s1 + $0xd0] sm:$0xff] }
   0x3   :  { %7069 = vmatpush.bf16.msra.mxu2 %v6772_v0  ;;  %7070 = vmatpush.bf16.msra.mxu3 %v6772_v0  ;;  %v6766_v6 = vld [vmem:[%s9815_s1 + $0xc8] sm:$0xff]  ;;  %v6765_v7 = vld [vmem:[%s9815_s1 + $0xc0] sm:$0xff]  ;;  %v4935_v8 = vld [vmem:[%s9816_s0 + $0x18] sm:$0xf] }
   0x4   :  { %v6670_v9 = vld [vmem:[%s9816_s0 + $0x20] sm:$0xf0]  ;;  %v5031_v10 = vld [vmem:[%s9816_s0 + $0xd8] sm:$0xf]  ;;  %v5127_v12 = vld [vmem:[%s9816_s0 + $0x1c8] sm:$0xf] }
   0x5   :  { %v6694_v11 = vld [vmem:[%s9816_s0 + $0xe0] sm:$0xf0]  ;;  %v6718_v13 = vld [vmem:[%s9816_s0 + $0x1d0] sm:$0xf0]  ;;  %v5223_v14 = vld [vmem:[%s9816_s0 + $0x288] sm:$0xf]  ;;  %v4936_v18 = vor.u32 %v6670_v9, %v4935_v8 }
   0x6   :  { %1164 = vmatpush.bf16.msra.mxu0 %v6771_v1  ;;  %7071 = vmatpush.bf16.msra.mxu1 %v6771_v1  ;;  %v6742_v15 = vld [vmem:[%s9816_s0 + $0x290] sm:$0xf0]  ;;  %v6788_v16 = vld [vmem:[%s9815_s1 + $0x178] sm:$0xff]  ;;  %v5032_v19 = vor.u32 %v6694_v11, %v5031_v10  ;;  %v5128_v20 = vor.u32 %v6718_v13, %v5127_v12  ;;  %v6786_v28 = vld [vmem:[%s9815_s1 + $0x168] sm:$0xff] }
   0x7   :  { %7072 = vmatpush.bf16.msra.mxu2 %v6771_v1  ;;  %7073 = vmatpush.bf16.msra.mxu3 %v6771_v1  ;;  %v6652_v17 = vld [vmem:[%s9815_s1 + $0x38] sm:$0xff]  ;;  %v5224_v21 = vor.u32 %v6742_v15, %v5223_v14  ;;  %v6787_v24 = vld [vmem:[%s9815_s1 + $0x170] sm:$0xff]  ;;  %v6650_v29 = vld [vmem:[%s9815_s1 + $0x28] sm:$0xff] }
   0x8   :  { %v6780_v22 = vld [vmem:[%s9815_s1 + $0x138] sm:$0xff]  ;;  %v6651_v25 = vld [vmem:[%s9815_s1 + $0x30] sm:$0xff]  ;;  %v6778_v30 = vld [vmem:[%s9815_s1 + $0x128] sm:$0xff] }
   0x9   :  { %v6660_v23 = vld [vmem:[%s9815_s1 + $0x78] sm:$0xff]  ;;  %v6779_v26 = vld [vmem:[%s9815_s1 + $0x130] sm:$0xff]  ;;  %v6658_v31 = vld [vmem:[%s9815_s1 + $0x68] sm:$0xff] }
   0xa   :  { %1165 = vmatpush.bf16.msra.mxu0 %v6770_v2  ;;  %7074 = vmatpush.bf16.msra.mxu1 %v6770_v2  ;;  %v6659_v27 = vld [vmem:[%s9815_s1 + $0x70] sm:$0xff]  ;;  %v6673_v33 = vld [vmem:[%s9816_s0 + $0x38] sm:$0xf0]  ;;  %v5139_v36 = vld [vmem:[%s9816_s0 + $0x1e0] sm:$0xf] }
   0xb   :  { %7075 = vmatpush.bf16.msra.mxu2 %v6770_v2  ;;  %7076 = vmatpush.bf16.msra.mxu3 %v6770_v2  ;;  %v4947_v32 = vld [vmem:[%s9816_s0 + $0x30] sm:$0xf]  ;;  %v6697_v35 = vld [vmem:[%s9816_s0 + $0xf8] sm:$0xf0]  ;;  %v6721_v37 = vld [vmem:[%s9816_s0 + $0x1e8] sm:$0xf0] }
   0xc   :  { %v5043_v34 = vld [vmem:[%s9816_s0 + $0xf0] sm:$0xf]  ;;  %v5235_v38 = vld [vmem:[%s9816_s0 + $0x2a0] sm:$0xf]  ;;  %v6745_v39 = vld [vmem:[%s9816_s0 + $0x2a8] sm:$0xf0]  ;;  %v4948_v40 = vor.u32 %v6673_v33, %v4947_v32  ;;  %v5140_v42 = vor.u32 %v6721_v37, %v5139_v36 }
   0xd   :  { %v5044_v41 = vor.u32 %v6697_v35, %v5043_v34  ;;  %v5236_v43 = vor.u32 %v6745_v39, %v5235_v38  ;;  %v6785_v44 = vld [vmem:[%s9815_s1 + $0x160] sm:$0xff]  ;;  %v4959_v48 = vld [vmem:[%s9816_s0 + $0x48] sm:$0xf]  ;;  %v6676_v49 = vld [vmem:[%s9816_s0 + $0x50] sm:$0xf0] }
   0xe   :  { %1166 = vmatpush.bf16.msra.mxu0 %v6769_v3  ;;  %7077 = vmatpush.bf16.msra.mxu1 %v6769_v3  ;;  %v6649_v45 = vld [vmem:[%s9815_s1 + $0x20] sm:$0xff]  ;;  %v5055_v50 = vld [vmem:[%s9816_s0 + $0x108] sm:$0xf]  ;;  %v6700_v51 = vld [vmem:[%s9816_s0 + $0x110] sm:$0xf0]  ;;  %v4960_v56 = vor.u32 %v6676_v49, %v4959_v48 }
   0xf   :  { %7078 = vmatpush.bf16.msra.mxu2 %v6769_v3  ;;  %7079 = vmatpush.bf16.msra.mxu3 %v6769_v3  ;;  %v6777_v46 = vld [vmem:[%s9815_s1 + $0x120] sm:$0xff]  ;;  %v5151_v52 = vld [vmem:[%s9816_s0 + $0x1f8] sm:$0xf]  ;;  %v5056_v57 = vor.u32 %v6700_v51, %v5055_v50  ;;  %v6679_v1 = vld [vmem:[%s9816_s0 + $0x68] sm:$0xf0] }
  0x10   :  { %v6657_v47 = vld [vmem:[%s9815_s1 + $0x60] sm:$0xff]  ;;  %v5247_v54 = vld [vmem:[%s9816_s0 + $0x2b8] sm:$0xf]  ;;  %v6703_v3 = vld [vmem:[%s9816_s0 + $0x128] sm:$0xf0] }
  0x11   :  { %v6724_v53 = vld [vmem:[%s9816_s0 + $0x200] sm:$0xf0]  ;;  %v6784_v60 = vld [vmem:[%s9815_s1 + $0x158] sm:$0xff]  ;;  %v4971_v0 = vld [vmem:[%s9816_s0 + $0x60] sm:$0xf] }
  0x12   :  { %1167 = vmatpush.bf16.msra.mxu0 %v6768_v4  ;;  %7080 = vmatpush.bf16.msra.mxu1 %v6768_v4  ;;  %v6748_v55 = vld [vmem:[%s9816_s0 + $0x2c0] sm:$0xf0]  ;;  %v5152_v58 = vor.u32 %v6724_v53, %v5151_v52  ;;  %v6648_v61 = vld [vmem:[%s9815_s1 + $0x18] sm:$0xff]  ;;  %v5067_v2 = vld [vmem:[%s9816_s0 + $0x120] sm:$0xf]  ;;  %v4972_v8 = vor.u32 %v6679_v1, %v4971_v0 }
  0x13   :  { %7081 = vmatpush.bf16.msra.mxu2 %v6768_v4  ;;  %7082 = vmatpush.bf16.msra.mxu3 %v6768_v4  ;;  %v5248_v59 = vor.u32 %v6748_v55, %v5247_v54  ;;  %v6776_v62 = vld [vmem:[%s9815_s1 + $0x118] sm:$0xff]  ;;  %v5163_v4 = vld [vmem:[%s9816_s0 + $0x210] sm:$0xf]  ;;  %v5068_v9 = vor.u32 %v6703_v3, %v5067_v2  ;;  %v5187_v36 = vld [vmem:[%s9816_s0 + $0x240] sm:$0xf] }
  0x14   :  { %v6656_v63 = vld [vmem:[%s9815_s1 + $0x58] sm:$0xff]  ;;  %v6783_v12 = vld [vmem:[%s9815_s1 + $0x150] sm:$0xff]  ;;  %v6733_v37 = vld [vmem:[%s9816_s0 + $0x248] sm:$0xf0] }
  0x15   :  { %v6647_v13 = vld [vmem:[%s9815_s1 + $0x10] sm:$0xff]  ;;  %v6685_v33 = vld [vmem:[%s9816_s0 + $0x98] sm:$0xf0]  ;;  %v5283_v38 = vld [vmem:[%s9816_s0 + $0x300] sm:$0xf] }
  0x16   :  { %1168 = vmatpush.bf16.msra.mxu0 %v6767_v5  ;;  %7083 = vmatpush.bf16.msra.mxu1 %v6767_v5  ;;  %v6775_v14 = vld [vmem:[%s9815_s1 + $0x110] sm:$0xff]  ;;  %v6709_v35 = vld [vmem:[%s9816_s0 + $0x158] sm:$0xf0]  ;;  %v6757_v39 = vld [vmem:[%s9816_s0 + $0x308] sm:$0xf0] }
  0x17   :  { %7084 = vmatpush.bf16.msra.mxu2 %v6767_v5  ;;  %7085 = vmatpush.bf16.msra.mxu3 %v6767_v5  ;;  %v6727_v5 = vld [vmem:[%s9816_s0 + $0x218] sm:$0xf0]  ;;  %v6655_v15 = vld [vmem:[%s9815_s1 + $0x50] sm:$0xff]  ;;  %v5007_v48 = vld [vmem:[%s9816_s0 + $0xa8] sm:$0xf] }
  0x18   :  { %v5164_v10 = vor.u32 %v6727_v5, %v5163_v4  ;;  %v4995_v32 = vld [vmem:[%s9816_s0 + $0x90] sm:$0xf]  ;;  %v6688_v49 = vld [vmem:[%s9816_s0 + $0xb0] sm:$0xf0]  ;;  %v5103_v50 = vld [vmem:[%s9816_s0 + $0x168] sm:$0xf] }
  0x19   :  { %v5091_v34 = vld [vmem:[%s9816_s0 + $0x150] sm:$0xf]  ;;  %v6712_v51 = vld [vmem:[%s9816_s0 + $0x170] sm:$0xf0]  ;;  %v5199_v52 = vld [vmem:[%s9816_s0 + $0x258] sm:$0xf] }
  0x1a   :  { %1169 = vmatpush.bf16.msra.mxu0 %v6766_v6  ;;  %7086 = vmatpush.bf16.msra.mxu1 %v6766_v6  ;;  %v6736_v53 = vld [vmem:[%s9816_s0 + $0x260] sm:$0xf0]  ;;  %v5295_v54 = vld [vmem:[%s9816_s0 + $0x318] sm:$0xf]  ;;  %v5019_v0 = vld [vmem:[%s9816_s0 + $0xc0] sm:$0xf] }
  0x1b   :  { %7087 = vmatpush.bf16.msra.mxu2 %v6766_v6  ;;  %7088 = vmatpush.bf16.msra.mxu3 %v6766_v6  ;;  %v5259_v6 = vld [vmem:[%s9816_s0 + $0x2d0] sm:$0xf]  ;;  %v6760_v55 = vld [vmem:[%s9816_s0 + $0x320] sm:$0xf0]  ;;  %v6691_v1 = vld [vmem:[%s9816_s0 + $0xc8] sm:$0xf0] }
  0x1c   :  { %v5115_v2 = vld [vmem:[%s9816_s0 + $0x180] sm:$0xf]  ;;  %v6715_v3 = vld [vmem:[%s9816_s0 + $0x188] sm:$0xf0]  ;;  %v5211_v4 = vld [vmem:[%s9816_s0 + $0x270] sm:$0xf] }
  0x1d   :  { %v6739_v5 = vld [vmem:[%s9816_s0 + $0x278] sm:$0xf0] }
  0x1e   :  { %1170 = vmatpush.bf16.msra.mxu0 %v6765_v7  ;;  %7089 = vmatpush.bf16.msra.mxu1 %v6765_v7 }
  0x1f   :  { %7090 = vmatpush.bf16.msra.mxu2 %v6765_v7  ;;  %7091 = vmatpush.bf16.msra.mxu3 %v6765_v7  ;;  %v6751_v7 = vld [vmem:[%s9816_s0 + $0x2d8] sm:$0xf0] }
  0x20   :  { %v5260_v11 = vor.u32 %v6751_v7, %v5259_v6  ;;  %v5307_v6 = vld [vmem:[%s9816_s0 + $0x330] sm:$0xf]  ;;  %v6763_v7 = vld [vmem:[%s9816_s0 + $0x338] sm:$0xf0] }
  0x21   :  { %1171 = vmatmul.bf16.vlgmr.msra.gmra.mxu0 %v4936_v18  ;;  %1211 = vmatmul.bf16.vlgmr.msra.gmra.mxu1 %v5032_v19  ;;  %v5079_v18 = vld [vmem:[%s9816_s0 + $0x138] sm:$0xf]  ;;  %v6706_v19 = vld [vmem:[%s9816_s0 + $0x140] sm:$0xf0] }
  0x22   :  { %1251 = vmatmul.bf16.vlgmr.msra.gmra.mxu2 %v5128_v20  ;;  %1291 = vmatmul.bf16.vlgmr.msra.gmra.mxu3 %v5224_v21  ;;  %v5175_v20 = vld [vmem:[%s9816_s0 + $0x228] sm:$0xf]  ;;  %v6730_v21 = vld [vmem:[%s9816_s0 + $0x230] sm:$0xf0] }
  0x23   :  { %1501 = vmatpush.bf16.msrb.mxu2 %v6788_v16  ;;  %2326 = vmatpush.bf16.msrb.mxu3 %v6652_v17  ;;  %v4983_v16 = vld [vmem:[%s9816_s0 + $0x78] sm:$0xf]  ;;  %v6682_v17 = vld [vmem:[%s9816_s0 + $0x80] sm:$0xf0] }
  0x24   :  { %1332 = vmatpush.bf16.msrb.mxu1 %v6780_v22  ;;  %2495 = vmatpush.bf16.msrb.mxu0 %v6660_v23  ;;  %v5271_v22 = vld [vmem:[%s9816_s0 + $0x2e8] sm:$0xf]  ;;  %v6754_v23 = vld [vmem:[%s9816_s0 + $0x2f0] sm:$0xf0] }
  0x27   :  { %1502 = vmatpush.bf16.msrb.mxu2 %v6787_v24  ;;  %2327 = vmatpush.bf16.msrb.mxu3 %v6651_v25  ;;  %v4984_v24 = vor.u32 %v6682_v17, %v4983_v16  ;;  %v5080_v25 = vor.u32 %v6706_v19, %v5079_v18  ;;  %v5417_v16 = vld [vmem:[%s9816_s0 + $0xc] sm:$0xf0]  ;;  %v6671_v17 = vld [vmem:[%s9816_s0 + $0x28] sm:$0xf0]  ;;  %v5415_v18 = vld [vmem:[%s9816_s0] sm:$0xf] }
  0x28   :  { %1333 = vmatpush.bf16.msrb.mxu1 %v6779_v26  ;;  %2496 = vmatpush.bf16.msrb.mxu0 %v6659_v27  ;;  %v5176_v26 = vor.u32 %v6730_v21, %v5175_v20  ;;  %v5272_v27 = vor.u32 %v6754_v23, %v5271_v22  ;;  %v6550_v19 = vld [vmem:[%s9816_s0 + $0x8] sm:$0xf0] }
  0x2b   :  { %1503 = vmatpush.bf16.msrb.mxu2 %v6786_v28  ;;  %2328 = vmatpush.bf16.msrb.mxu3 %v6650_v29  ;;  %v6782_v28 = vld [vmem:[%s9815_s1 + $0x148] sm:$0xff] }
  0x2c   :  { %1334 = vmatpush.bf16.msrb.mxu1 %v6778_v30  ;;  %2497 = vmatpush.bf16.msrb.mxu0 %v6658_v31  ;;  %v6646_v29 = vld [vmem:[%s9815_s1 + $0x8] sm:$0xff] }
  0x2d   :  { %v6774_v30 = vld [vmem:[%s9815_s1 + $0x108] sm:$0xff] }
  0x2e   :  { %v6654_v31 = vld [vmem:[%s9815_s1 + $0x48] sm:$0xff] }
  0x2f   :  { %1504 = vmatpush.bf16.msrb.mxu2 %v6785_v44  ;;  %2329 = vmatpush.bf16.msrb.mxu3 %v6649_v45  ;;  %v6781_v44 = vld [vmem:[%s9815_s1 + $0x140] sm:$0xff] }
  0x30   :  { %1335 = vmatpush.bf16.msrb.mxu1 %v6777_v46  ;;  %2498 = vmatpush.bf16.msrb.mxu0 %v6657_v47  ;;  %v6645_v45 = vld [vmem:[%s9815_s1] sm:$0xff] }
  0x31   :  { %1176 = vmatmul.bf16.gmra.mxu0 %v4948_v40  ;;  %1216 = vmatmul.bf16.gmra.mxu1 %v5044_v41  ;;  %v4996_v40 = vor.u32 %v6685_v33, %v4995_v32  ;;  %v5092_v41 = vor.u32 %v6709_v35, %v5091_v34  ;;  %v6773_v46 = vld [vmem:[%s9815_s1 + $0x100] sm:$0xff]  ;;  %v4955_v32 = vld [vmem:[%s9816_s0 + $0x38] sm:$0xf]  ;;  %v6552_v33 = vld [vmem:[%s9816_s0 + $0x1c] sm:$0xf] }
  0x32   :  { %1256 = vmatmul.bf16.gmra.mxu2 %v5140_v42  ;;  %1296 = vmatmul.bf16.gmra.mxu3 %v5236_v43  ;;  %v5188_v42 = vor.u32 %v6733_v37, %v5187_v36  ;;  %v5284_v43 = vor.u32 %v6757_v39, %v5283_v38  ;;  %v6653_v47 = vld [vmem:[%s9815_s1 + $0x40] sm:$0xff]  ;;  %v5429_v34 = vld [vmem:[%s9816_s0 + $0x24] sm:$0xf0]  ;;  %v5427_v36 = vld [vmem:[%s9816_s0 + $0x18] sm:$0xf] }
  0x33   :  { %1505 = vmatpush.bf16.msrb.mxu2 %v6784_v60  ;;  %2330 = vmatpush.bf16.msrb.mxu3 %v6648_v61  ;;  %v6892_v60 = vld [vmem:[%s9815_s1 + $0x1b8] sm:$0xff]  ;;  %v6674_v35 = vld [vmem:[%s9816_s0 + $0x40] sm:$0xf0] }
  0x34   :  { %1336 = vmatpush.bf16.msrb.mxu1 %v6776_v62  ;;  %2499 = vmatpush.bf16.msrb.mxu0 %v6656_v63  ;;  %v6900_v61 = vld [vmem:[%s9815_s1 + $0x1f8] sm:$0xff]  ;;  %v6553_v37 = vld [vmem:[%s9816_s0 + $0x20] sm:$0xf0] }
  0x35   :  { %v6668_v62 = vld [vmem:[%s9815_s1 + $0xb8] sm:$0xff] }
  0x36   :  { %v6908_v63 = vld [vmem:[%s9815_s1 + $0x238] sm:$0xff] }
  0x37   :  { %1506 = vmatpush.bf16.msrb.mxu2 %v6783_v12  ;;  %2331 = vmatpush.bf16.msrb.mxu3 %v6647_v13  ;;  %v6669_v12 = vld [vmem:[%s9816_s0 + $0x1c] sm:$0xf]  ;;  %v4937_v13 = vld [vmem:[%s9816_s0 + $0x24] sm:$0xf0] }
  0x38   :  { %1337 = vmatpush.bf16.msrb.mxu1 %v6775_v14  ;;  %2500 = vmatpush.bf16.msrb.mxu0 %v6655_v15  ;;  %v4943_v14 = vld [vmem:[%s9816_s0 + $0x20] sm:$0xf]  ;;  %v6549_v15 = vld [vmem:[%s9816_s0 + $0x4] sm:$0xf]  ;;  %v4940_v20 = vor.u32 %v6669_v12, %v4937_v13  ;;  %v4979_v12 = vld [vmem:[%s9816_s0 + $0x68] sm:$0xf] }
  0x39   :  { %v5420_v21 = vor.u32 %v6549_v15, %v5417_v16  ;;  %v6558_v13 = vld [vmem:[%s9816_s0 + $0x4c] sm:$0xf]  ;;  %v6680_v15 = vld [vmem:[%s9816_s0 + $0x70] sm:$0xf0]  ;;  %v5451_v16 = vld [vmem:[%s9816_s0 + $0x48] sm:$0xf] }
  0x3b   :  { %1507 = vmatpush.bf16.msrb.mxu2 %v6782_v28  ;;  %2332 = vmatpush.bf16.msrb.mxu3 %v6646_v29 }
  0x3c   :  { %1338 = vmatpush.bf16.msrb.mxu1 %v6774_v30  ;;  %2501 = vmatpush.bf16.msrb.mxu0 %v6654_v31  ;;  %v6672_v30 = vld [vmem:[%s9816_s0 + $0x34] sm:$0xf]  ;;  %v4949_v31 = vld [vmem:[%s9816_s0 + $0x3c] sm:$0xf0] }
  0x3f   :  { %1508 = vmatpush.bf16.msrb.mxu2 %v6781_v44  ;;  %2333 = vmatpush.bf16.msrb.mxu3 %v6645_v45  ;;  %v4956_v44 = vor.u32 %v6674_v35, %v4955_v32  ;;  %v5428_v45 = vor.u32 %v6553_v37, %v5427_v36  ;;  %v6681_v36 = vld [vmem:[%s9816_s0 + $0x7c] sm:$0xf]  ;;  %v4985_v37 = vld [vmem:[%s9816_s0 + $0x84] sm:$0xf0] }
  0x40   :  { %1339 = vmatpush.bf16.msrb.mxu1 %v6773_v46  ;;  %2502 = vmatpush.bf16.msrb.mxu0 %v6653_v47 }
  0x41   :  { %1181 = vmatmul.bf16.gmra.mxu0 %v4960_v56  ;;  %1221 = vmatmul.bf16.gmra.mxu1 %v5056_v57  ;;  %v5008_v56 = vor.u32 %v6688_v49, %v5007_v48  ;;  %v5104_v57 = vor.u32 %v6712_v51, %v5103_v50  ;;  %v6675_v50 = vld [vmem:[%s9816_s0 + $0x4c] sm:$0xf]  ;;  %v4961_v51 = vld [vmem:[%s9816_s0 + $0x54] sm:$0xf0] }
  0x42   :  { %1261 = vmatmul.bf16.gmra.mxu2 %v5152_v58  ;;  %1301 = vmatmul.bf16.gmra.mxu3 %v5248_v59  ;;  %v5200_v58 = vor.u32 %v6736_v53, %v5199_v52  ;;  %v5296_v59 = vor.u32 %v6760_v55, %v5295_v54  ;;  %v4967_v52 = vld [vmem:[%s9816_s0 + $0x50] sm:$0xf]  ;;  %v6555_v53 = vld [vmem:[%s9816_s0 + $0x34] sm:$0xf]  ;;  %v5441_v54 = vld [vmem:[%s9816_s0 + $0x3c] sm:$0xf0] }
  0x43   :  { %3667 = vmatpush.bf16.msra.mxu2 %v6892_v60  ;;  %3836 = vmatpush.bf16.msra.mxu3 %v6900_v61  ;;  %v6677_v55 = vld [vmem:[%s9816_s0 + $0x58] sm:$0xf0]  ;;  %v4964_v60 = vor.u32 %v6675_v50, %v4961_v51  ;;  %v5444_v61 = vor.u32 %v6555_v53, %v5441_v54  ;;  %v5463_v50 = vld [vmem:[%s9816_s0 + $0x60] sm:$0xf]  ;;  %v6562_v51 = vld [vmem:[%s9816_s0 + $0x68] sm:$0xf0]  ;;  %v4988_v54 = vor.u32 %v6681_v36, %v4985_v37 }
  0x44   :  { %2664 = vmatpush.bf16.msra.mxu1 %v6668_v62  ;;  %4005 = vmatpush.bf16.msra.mxu0 %v6908_v63 }
  0x51   :  { %1186 = vmatmul.bf16.gmra.mxu0 %v4972_v8  ;;  %1226 = vmatmul.bf16.gmra.mxu1 %v5068_v9  ;;  %v5020_v8 = vor.u32 %v6691_v1, %v5019_v0  ;;  %v5116_v9 = vor.u32 %v6715_v3, %v5115_v2  ;;  %v4968_v0 = vor.u32 %v6677_v55, %v4967_v52  ;;  %v6891_v2 = vld [vmem:[%s9815_s1 + $0x1b0] sm:$0xff] }
  0x52   :  { %1266 = vmatmul.bf16.gmra.mxu2 %v5164_v10  ;;  %1306 = vmatmul.bf16.gmra.mxu3 %v5260_v11  ;;  %v5212_v10 = vor.u32 %v6739_v5, %v5211_v4  ;;  %v5308_v11 = vor.u32 %v6763_v7, %v5307_v6  ;;  %v6899_v3 = vld [vmem:[%s9815_s1 + $0x1f0] sm:$0xff] }
  0x53   :  { %3668 = vmatpush.bf16.msra.mxu2 %v6891_v2  ;;  %3837 = vmatpush.bf16.msra.mxu3 %v6899_v3 }
  0x61   :  { %1191 = vmatmul.bf16.gmra.mxu0 %v4984_v24  ;;  %1231 = vmatmul.bf16.gmra.mxu1 %v5080_v25  ;;  %v4944_v24 = vor.u32 %v6671_v17, %v4943_v14  ;;  %v5416_v25 = vor.u32 %v6550_v19, %v5415_v18  ;;  %v5453_v14 = vld [vmem:[%s9816_s0 + $0x54] sm:$0xf0]  ;;  %v6559_v17 = vld [vmem:[%s9816_s0 + $0x50] sm:$0xf0] }
  0x62   :  { %1271 = vmatmul.bf16.gmra.mxu2 %v5176_v26  ;;  %1311 = vmatmul.bf16.gmra.mxu3 %v5272_v27 }
  0x71   :  { %1196 = vmatmul.bf16.gmra.mxu0 %v4996_v40  ;;  %1236 = vmatmul.bf16.gmra.mxu1 %v5092_v41  ;;  %v4952_v40 = vor.u32 %v6672_v30, %v4949_v31  ;;  %v5432_v41 = vor.u32 %v6552_v33, %v5429_v34  ;;  %v4980_v30 = vor.u32 %v6680_v15, %v4979_v12  ;;  %v5477_v12 = vld [vmem:[%s9816_s0 + $0x84] sm:$0xf0]  ;;  %v6565_v15 = vld [vmem:[%s9816_s0 + $0x80] sm:$0xf0] }
  0x72   :  { %1276 = vmatmul.bf16.gmra.mxu2 %v5188_v42  ;;  %1316 = vmatmul.bf16.gmra.mxu3 %v5284_v43  ;;  %v5452_v31 = vor.u32 %v6559_v17, %v5451_v16 }
  0x81   :  { %1201 = vmatmul.bf16.gmra.mxu0 %v5008_v56  ;;  %1241 = vmatmul.bf16.gmra.mxu1 %v5104_v57  ;;  %v5439_v56 = vld [vmem:[%s9816_s0 + $0x30] sm:$0xf]  ;;  %v6556_v57 = vld [vmem:[%s9816_s0 + $0x38] sm:$0xf0] }
  0x82   :  { %1281 = vmatmul.bf16.gmra.mxu2 %v5200_v58  ;;  %1321 = vmatmul.bf16.gmra.mxu3 %v5296_v59  ;;  %v5440_v1 = vor.u32 %v6556_v57, %v5439_v56 }
  0x91   :  { %1206 = vmatmul.bf16.gmra.mxu0 %v5020_v8  ;;  %1246 = vmatmul.bf16.gmra.mxu1 %v5116_v9  ;;  %v6667_v8 = vld [vmem:[%s9815_s1 + $0xb0] sm:$0xff] }
  0x92   :  { %1286 = vmatmul.bf16.gmra.mxu2 %v5212_v10  ;;  %1326 = vmatmul.bf16.gmra.mxu3 %v5308_v11  ;;  %v6907_v9 = vld [vmem:[%s9815_s1 + $0x230] sm:$0xff]  ;;  %v6678_v10 = vld [vmem:[%s9816_s0 + $0x64] sm:$0xf] }
  0x93   :  { %2665 = vmatpush.bf16.msra.mxu1 %v6667_v8  ;;  %4006 = vmatpush.bf16.msra.mxu0 %v6907_v9  ;;  %v4973_v11 = vld [vmem:[%s9816_s0 + $0x6c] sm:$0xf0]  ;;  %v6684_v8 = vld [vmem:[%s9816_s0 + $0x94] sm:$0xf]  ;;  %v4997_v9 = vld [vmem:[%s9816_s0 + $0x9c] sm:$0xf0] }
  0x9e   :  { %v7468_v22 = vpop.f32.mrf.mxu0  ;;  %v7470_v23 = vpop.f32.mrf.mxu1 }
  0xa1   :  { %1340 = vmatmul.bf16.vlgmr.msrb.gmra.mxu1 %v4940_v20  ;;  %2503 = vmatmul.bf16.vlgmr.msrb.gmra.mxu0 %v5420_v21  ;;  %v4976_v20 = vor.u32 %v6678_v10, %v4973_v11  ;;  %v5456_v21 = vor.u32 %v6558_v13, %v5453_v14  ;;  %v5003_v10 = vld [vmem:[%s9816_s0 + $0x98] sm:$0xf]  ;;  %v6564_v11 = vld [vmem:[%s9816_s0 + $0x7c] sm:$0xf]  ;;  %v6686_v13 = vld [vmem:[%s9816_s0 + $0xa0] sm:$0xf0] }
  0xa2   :  { %1509 = vmatmul.bf16.vlgmr.msrb.gmra.mxu2 %v4944_v24  ;;  %2334 = vmatmul.bf16.vlgmr.msrb.gmra.mxu3 %v5416_v25  ;;  %v5475_v14 = vld [vmem:[%s9816_s0 + $0x78] sm:$0xf]  ;;  %v5004_v36 = vor.u32 %v6686_v13, %v5003_v10 }
  0xa3   :  { %v5476_v37 = vor.u32 %v6565_v15, %v5475_v14 }
  0xa5   :  { %v7472_v26 = vpop.f32.mrf.mxu2  ;;  %v7474_v27 = vpop.f32.mrf.mxu3 }
  0xa6   :  { %9820 = vst [vmem:[#allocation3_spill] sm:$0xff] %v7474_v27  ;;  %v7476_v28 = vpop.f32.mrf.mxu0  ;;  %v7478_v29 = vpop.f32.mrf.mxu1 }
  0xad   :  { %v7504_v38 = vpop.f32.mrf.mxu2  ;;  %v7506_v39 = vpop.f32.mrf.mxu3 }
  0xae   :  { %9821 = vst [vmem:[#allocation4_spill] sm:$0xff] %v7506_v39  ;;  %v7508_v42 = vpop.f32.mrf.mxu0  ;;  %v7510_v43 = vpop.f32.mrf.mxu1 }
  0xb1   :  { %1345 = vmatmul.bf16.gmra.mxu1 %v4952_v40  ;;  %2508 = vmatmul.bf16.gmra.mxu0 %v5432_v41  ;;  %v4991_v40 = vld [vmem:[%s9816_s0 + $0x80] sm:$0xf]  ;;  %v6561_v41 = vld [vmem:[%s9816_s0 + $0x64] sm:$0xf] }
  0xb2   :  { %1514 = vmatmul.bf16.gmra.mxu2 %v4956_v44  ;;  %2339 = vmatmul.bf16.gmra.mxu3 %v5428_v45  ;;  %v5465_v44 = vld [vmem:[%s9816_s0 + $0x6c] sm:$0xf0]  ;;  %v6683_v45 = vld [vmem:[%s9816_s0 + $0x88] sm:$0xf0] }
  0xb3   :  { %v5468_v55 = vor.u32 %v6561_v41, %v5465_v44 }
  0xb5   :  { %v7512_v46 = vpop.f32.mrf.mxu2  ;;  %v7514_v47 = vpop.f32.mrf.mxu3 }
  0xb6   :  { %9822 = vst [vmem:[#allocation5_spill] sm:$0xff] %v7514_v47  ;;  %v7516_v48 = vpop.f32.mrf.mxu0  ;;  %v7518_v49 = vpop.f32.mrf.mxu1 }
  0xbd   :  { %v7544_v58 = vpop.f32.mrf.mxu2  ;;  %v7546_v59 = vpop.f32.mrf.mxu3 }
  0xbe   :  { %9823 = vst [vmem:[#allocation6_spill] sm:$0xff] %v7546_v59  ;;  %v7548_v62 = vpop.f32.mrf.mxu0  ;;  %v7550_v63 = vpop.f32.mrf.mxu1 }
  0xc1   :  { %1350 = vmatmul.bf16.gmra.mxu1 %v4964_v60  ;;  %2513 = vmatmul.bf16.gmra.mxu0 %v5444_v61  ;;  %v4992_v60 = vor.u32 %v6683_v45, %v4991_v40  ;;  %v5464_v61 = vor.u32 %v6562_v51, %v5463_v50  ;;  %v6687_v50 = vld [vmem:[%s9816_s0 + $0xac] sm:$0xf]  ;;  %v5009_v51 = vld [vmem:[%s9816_s0 + $0xb4] sm:$0xf0] }
  0xc2   :  { %1519 = vmatmul.bf16.gmra.mxu2 %v4968_v0  ;;  %2344 = vmatmul.bf16.gmra.mxu3 %v5440_v1 }
  0xc5   :  { %v7558_v4 = vpop.f32.mrf.mxu2  ;;  %v7560_v5 = vpop.f32.mrf.mxu3 }
  0xc6   :  { %9824 = vst [vmem:[#allocation7_spill] sm:$0xff] %v7560_v5  ;;  %v7562_v6 = vpop.f32.mrf.mxu0  ;;  %v7564_v7 = vpop.f32.mrf.mxu1 }
  0xcd   :  { %v7596_v18 = vpop.f32.mrf.mxu2  ;;  %v7598_v19 = vpop.f32.mrf.mxu3 }
  0xce   :  { %9825 = vst [vmem:[#allocation8_spill] sm:$0xff] %v7598_v19  ;;  %v7600_v24 = vpop.f32.mrf.mxu0  ;;  %v7602_v25 = vpop.f32.mrf.mxu1 }
  0xd1   :  { %1355 = vmatmul.bf16.gmra.mxu1 %v4976_v20  ;;  %2518 = vmatmul.bf16.gmra.mxu0 %v5456_v21  ;;  %v5000_v20 = vor.u32 %v6684_v8, %v4997_v9  ;;  %v5480_v21 = vor.u32 %v6564_v11, %v5477_v12  ;;  %v5487_v8 = vld [vmem:[%s9816_s0 + $0x90] sm:$0xf]  ;;  %v6568_v9 = vld [vmem:[%s9816_s0 + $0x98] sm:$0xf0]  ;;  %v5012_v12 = vor.u32 %v6687_v50, %v5009_v51 }
  0xd2   :  { %1524 = vmatmul.bf16.gmra.mxu2 %v4980_v30  ;;  %2349 = vmatmul.bf16.gmra.mxu3 %v5452_v31 }
  0xd5   :  { %v7604_v32 = vpop.f32.mrf.mxu2  ;;  %v7606_v33 = vpop.f32.mrf.mxu3 }
  0xd6   :  { %9826 = vst [vmem:[#allocation9_spill] sm:$0xff] %v7606_v33  ;;  %v7608_v34 = vpop.f32.mrf.mxu0  ;;  %v7610_v35 = vpop.f32.mrf.mxu1 }
  0xdd   :  { %v7636_v52 = vpop.f32.mrf.mxu2  ;;  %v7638_v53 = vpop.f32.mrf.mxu3 }
  0xde   :  { %9827 = vst [vmem:[#allocation10_spill] sm:$0xff] %v7638_v53  ;;  %v7640_v56 = vpop.f32.mrf.mxu0  ;;  %v7642_v57 = vpop.f32.mrf.mxu1 }
  0xe1   :  { %1360 = vmatmul.bf16.gmra.mxu1 %v4988_v54  ;;  %2523 = vmatmul.bf16.gmra.mxu0 %v5468_v55  ;;  %v5015_v54 = vld [vmem:[%s9816_s0 + $0xb0] sm:$0xf]  ;;  %v6567_v55 = vld [vmem:[%s9816_s0 + $0x94] sm:$0xf] }
  0xe2   :  { %1529 = vmatmul.bf16.gmra.mxu2 %v4992_v60  ;;  %2354 = vmatmul.bf16.gmra.mxu3 %v5464_v61  ;;  %v5489_v60 = vld [vmem:[%s9816_s0 + $0x9c] sm:$0xf0]  ;;  %v6689_v61 = vld [vmem:[%s9816_s0 + $0xb8] sm:$0xf0] }
  0xe3   :  { %v5492_v13 = vor.u32 %v6567_v55, %v5489_v60  ;;  %v6666_v60 = vld [vmem:[%s9815_s1 + $0xa8] sm:$0xff] }
  0xe4   :  { %2666 = vmatpush.bf16.msra.mxu1 %v6666_v60 }
  0xe5   :  { %v7644_v0 = vpop.f32.mrf.mxu2  ;;  %v7646_v1 = vpop.f32.mrf.mxu3 }
  0xe6   :  { %9828 = vst [vmem:[#allocation11_spill] sm:$0xff] %v7644_v0  ;;  %v7648_v2 = vpop.f32.mrf.mxu0  ;;  %v7650_v3 = vpop.f32.mrf.mxu1 }
  0xe7   :  { %9829 = vst [vmem:[#allocation12_spill] sm:$0xff] %v7646_v1 }
  0xed   :  { %v7676_v16 = vpop.f32.mrf.mxu2  ;;  %v7678_v17 = vpop.f32.mrf.mxu3 }
  0xee   :  { %9830 = vst [vmem:[#allocation13_spill] sm:$0xff] %v7676_v16  ;;  %v7680_v30 = vpop.f32.mrf.mxu0  ;;  %v7682_v31 = vpop.f32.mrf.mxu1 }
  0xef   :  { %9831 = vst [vmem:[#allocation14_spill] sm:$0xff] %v7678_v17 }
  0xf1   :  { %1365 = vmatmul.bf16.gmra.mxu1 %v5000_v20  ;;  %2528 = vmatmul.bf16.gmra.mxu0 %v5480_v21  ;;  %v5016_v20 = vor.u32 %v6689_v61, %v5015_v54  ;;  %v5488_v21 = vor.u32 %v6568_v9, %v5487_v8  ;;  %v6906_v61 = vld [vmem:[%s9815_s1 + $0x228] sm:$0xff]  ;;  %v6690_v8 = vld [vmem:[%s9816_s0 + $0xc4] sm:$0xf]  ;;  %v5021_v9 = vld [vmem:[%s9816_s0 + $0xcc] sm:$0xf0] }
  0xf2   :  { %1534 = vmatmul.bf16.gmra.mxu2 %v5004_v36  ;;  %2359 = vmatmul.bf16.gmra.mxu3 %v5476_v37  ;;  %v6890_v36 = vld [vmem:[%s9815_s1 + $0x1a8] sm:$0xff] }
  0xf3   :  { %v6898_v37 = vld [vmem:[%s9815_s1 + $0x1e8] sm:$0xff]  ;;  %3669 = vmatpush.bf16.msra.mxu2 %v6890_v36  ;;  %4007 = vmatpush.bf16.msra.mxu0 %v6906_v61 }
  0xf4   :  { %3838 = vmatpush.bf16.msra.mxu3 %v6898_v37  ;;  %v5499_v36 = vld [vmem:[%s9816_s0 + $0xa8] sm:$0xf]  ;;  %v6571_v37 = vld [vmem:[%s9816_s0 + $0xb0] sm:$0xf0] }
  0xf5   :  { %v7684_v40 = vpop.f32.mrf.mxu2  ;;  %v7686_v41 = vpop.f32.mrf.mxu3  ;;  %v5500_v53 = vor.u32 %v6571_v37, %v5499_v36 }
  0xf6   :  { %9832 = vst [vmem:[#allocation15_spill] sm:$0xff] %v7684_v40  ;;  %v7688_v44 = vpop.f32.mrf.mxu0  ;;  %v7690_v45 = vpop.f32.mrf.mxu1 }
  0xf7   :  { %9833 = vst [vmem:[#allocation16_spill] sm:$0xff] %v7686_v41  ;;  %v5024_v41 = vor.u32 %v6690_v8, %v5021_v9  ;;  %v6693_v8 = vld [vmem:[%s9816_s0 + $0xdc] sm:$0xf]  ;;  %v5033_v9 = vld [vmem:[%s9816_s0 + $0xe4] sm:$0xf0] }
  0xf8   :  { %v5036_v36 = vor.u32 %v6693_v8, %v5033_v9  ;;  %v6696_v8 = vld [vmem:[%s9816_s0 + $0xf4] sm:$0xf]  ;;  %v5045_v9 = vld [vmem:[%s9816_s0 + $0xfc] sm:$0xf0] }
  0xfd   :  { %v7716_v10 = vpop.f32.mrf.mxu2  ;;  %v7718_v11 = vpop.f32.mrf.mxu3 }
  0xfe   :  { %9834 = vst [vmem:[#allocation17_spill] sm:$0xff] %v7716_v10  ;;  %v7720_v14 = vpop.f32.mrf.mxu0  ;;  %v7722_v15 = vpop.f32.mrf.mxu1 }
  0xff   :  { %9835 = vst [vmem:[#allocation18_spill] sm:$0xff] %v7718_v11 }
 0x101   :  { %1370 = vmatmul.bf16.gmra.mxu1 %v5012_v12  ;;  %2533 = vmatmul.bf16.gmra.mxu0 %v5492_v13  ;;  %v5027_v12 = vld [vmem:[%s9816_s0 + $0xc8] sm:$0xf]  ;;  %v6570_v13 = vld [vmem:[%s9816_s0 + $0xac] sm:$0xf] }
 0x102   :  { %1539 = vmatmul.bf16.gmra.mxu2 %v5016_v20  ;;  %2364 = vmatmul.bf16.gmra.mxu3 %v5488_v21  ;;  %v5501_v20 = vld [vmem:[%s9816_s0 + $0xb4] sm:$0xf0]  ;;  %v6692_v21 = vld [vmem:[%s9816_s0 + $0xd0] sm:$0xf0] }
 0x103   :  { %v5504_v17 = vor.u32 %v6570_v13, %v5501_v20  ;;  %v5028_v1 = vor.u32 %v6692_v21, %v5027_v12  ;;  %v5511_v12 = vld [vmem:[%s9816_s0 + $0xc0] sm:$0xf]  ;;  %v6574_v13 = vld [vmem:[%s9816_s0 + $0xc8] sm:$0xf0] }
 0x104   :  { %v5512_v39 = vor.u32 %v6574_v13, %v5511_v12 }
 0x105   :  { %v7730_v50 = vpop.f32.mrf.mxu2  ;;  %v7732_v51 = vpop.f32.mrf.mxu3 }
 0x106   :  { %9836 = vst [vmem:[#allocation19_spill] sm:$0xff] %v7730_v50  ;;  %v7734_v54 = vpop.f32.mrf.mxu0  ;;  %v7736_v55 = vpop.f32.mrf.mxu1 }
 0x107   :  { %9837 = vst [vmem:[#allocation20_spill] sm:$0xff] %v7732_v51 }
 0x10d   :  { %v7768_v51 = vpop.f32.mrf.mxu2  ;;  %v7770_v11 = vpop.f32.mrf.mxu3 }
 0x10e   :  { %9838 = vst [vmem:[#allocation21_spill] sm:$0xff] %v7768_v51  ;;  %v7772_v60 = vpop.f32.mrf.mxu0  ;;  %v7774_v61 = vpop.f32.mrf.mxu1 }
 0x10f   :  { %9839 = vst [vmem:[#allocation22_spill] sm:$0xff] %v7770_v11 }
 0x111   :  { %1375 = vmatmul.bf16.gmra.mxu1 %v5024_v41  ;;  %2538 = vmatmul.bf16.gmra.mxu0 %v5504_v17  ;;  %v5513_v17 = vld [vmem:[%s9816_s0 + $0xcc] sm:$0xf0]  ;;  %v6695_v41 = vld [vmem:[%s9816_s0 + $0xe8] sm:$0xf0] }
 0x112   :  { %1544 = vmatmul.bf16.gmra.mxu2 %v5028_v1  ;;  %2369 = vmatmul.bf16.gmra.mxu3 %v5500_v53  ;;  %v5039_v53 = vld [vmem:[%s9816_s0 + $0xe0] sm:$0xf]  ;;  %v6573_v1 = vld [vmem:[%s9816_s0 + $0xc4] sm:$0xf] }
 0x113   :  { %v5516_v37 = vor.u32 %v6573_v1, %v5513_v17  ;;  %v5040_v47 = vor.u32 %v6695_v41, %v5039_v53  ;;  %v5048_v17 = vor.u32 %v6696_v8, %v5045_v9 }
 0x115   :  { %v7776_v33 = vpop.f32.mrf.mxu2  ;;  %v7778_v19 = vpop.f32.mrf.mxu3 }
 0x116   :  { %9840 = vst [vmem:[#allocation23_spill] sm:$0xff] %v7776_v33  ;;  %v7780_v5 = vpop.f32.mrf.mxu0  ;;  %v7782_v59 = vpop.f32.mrf.mxu1 }
 0x117   :  { %9841 = vst [vmem:[#allocation24_spill] sm:$0xff] %v7778_v19 }
 0x11d   :  { %v7808_v20 = vpop.f32.mrf.mxu2  ;;  %v7810_v21 = vpop.f32.mrf.mxu3 }
 0x11e   :  { %9842 = vst [vmem:[#allocation25_spill] sm:$0xff] %v7808_v20  ;;  %v1341_v19 = vpop.f32.mrf.mxu1  ;;  %v2504_v11 = vpop.f32.mrf.mxu0 }
 0x11f   :  { %9843 = vst [vmem:[#allocation26_spill] sm:$0xff] %v7810_v21  ;;  %v1342_v27 = vadd.f32 %v1341_v19, %v7468_v22  ;;  %v6576_v22 = vld [vmem:[%s9816_s0 + $0xdc] sm:$0xf]  ;;  %v6698_v19 = vld [vmem:[%s9816_s0 + $0x100] sm:$0xf0] }
 0x121   :  { %1380 = vmatmul.bf16.gmra.mxu1 %v5036_v36  ;;  %2543 = vmatmul.bf16.gmra.mxu0 %v5516_v37 }
 0x122   :  { %1549 = vmatmul.bf16.gmra.mxu2 %v5040_v47  ;;  %2374 = vmatmul.bf16.gmra.mxu3 %v5512_v39  ;;  %v5051_v39 = vld [vmem:[%s9816_s0 + $0xf8] sm:$0xf] }
 0x125   :  { %v1510_v33 = vpop.f32.mrf.mxu2  ;;  %v2335_v51 = vpop.f32.mrf.mxu3 }
 0x126   :  { %v1511_v50 = vadd.f32 %v1510_v33, %v1342_v27  ;;  %v1343_v10 = vpop.f32.mrf.mxu1  ;;  %v2506_v40 = vpop.f32.mrf.mxu0  ;;  %v5525_v27 = vld [vmem:[%s9816_s0 + $0xe4] sm:$0xf0]  ;;  %v5523_v33 = vld [vmem:[%s9816_s0 + $0xd8] sm:$0xf] }
 0x127   :  { %v5528_v41 = vor.u32 %v6576_v22, %v5525_v27  ;;  %v5057_v22 = vld [vmem:[%s9816_s0 + $0x114] sm:$0xf0]  ;;  %v6701_v27 = vld [vmem:[%s9816_s0 + $0x118] sm:$0xf0] }
 0x128   :  { %v2336_v20 = vadd.f32 %v2335_v51, %v1511_v50  ;;  %v6577_v50 = vld [vmem:[%s9816_s0 + $0xe0] sm:$0xf0]  ;;  %v1344_v51 = vadd.f32 %v1343_v10, %v7476_v28 }
 0x129   :  { %v5524_v36 = vor.u32 %v6577_v50, %v5523_v33  ;;  %v6580_v33 = vld [vmem:[%s9816_s0 + $0xf8] sm:$0xf0] }
 0x12a   :  { %v7828_v47 = vadd.f32 %v2504_v11, %v2336_v20  ;;  %v5052_v20 = vor.u32 %v6698_v19, %v5051_v39  ;;  %v6699_v39 = vld [vmem:[%s9816_s0 + $0x10c] sm:$0xf]  ;;  %v5535_v19 = vld [vmem:[%s9816_s0 + $0xf0] sm:$0xf] }
 0x12c   :  { %9844 = vst [vmem:[#allocation27_spill] sm:$0xff] %v7828_v47 }
 0x12d   :  { %v1512_v53 = vpop.f32.mrf.mxu2  ;;  %v2337_v1 = vpop.f32.mrf.mxu3 }
 0x12e   :  { %v1513_v11 = vadd.f32 %v1512_v53, %v1344_v51  ;;  %v1346_v12 = vpop.f32.mrf.mxu1  ;;  %v2509_v13 = vpop.f32.mrf.mxu0 }
 0x12f   :  { %v1347_v21 = vadd.f32 %v1346_v12, %v7508_v42  ;;  %v6579_v42 = vld [vmem:[%s9816_s0 + $0xf4] sm:$0xf] }
 0x130   :  { %v2338_v37 = vadd.f32 %v2337_v1, %v1513_v11  ;;  %v5060_v1 = vor.u32 %v6699_v39, %v5057_v22 }
 0x131   :  { %1385 = vmatmul.bf16.gmra.mxu1 %v5048_v17  ;;  %2548 = vmatmul.bf16.gmra.mxu0 %v5528_v41 }
 0x132   :  { %1554 = vmatmul.bf16.gmra.mxu2 %v5052_v20  ;;  %2379 = vmatmul.bf16.gmra.mxu3 %v5524_v36  ;;  %v7840_v47 = vadd.f32 %v2506_v40, %v2338_v37  ;;  %v5063_v40 = vld [vmem:[%s9816_s0 + $0x110] sm:$0xf]  ;;  %v5536_v20 = vor.u32 %v6580_v33, %v5535_v19  ;;  %v6889_v37 = vld [vmem:[%s9815_s1 + $0x1a0] sm:$0xff]  ;;  %v5075_v19 = vld [vmem:[%s9816_s0 + $0x128] sm:$0xf] }
 0x133   :  { %3670 = vmatpush.bf16.msra.mxu2 %v6889_v37  ;;  %v6582_v33 = vld [vmem:[%s9816_s0 + $0x10c] sm:$0xf] }
 0x135   :  { %v1515_v16 = vpop.f32.mrf.mxu2  ;;  %v2340_v28 = vpop.f32.mrf.mxu3 }
 0x136   :  { %v1516_v10 = vadd.f32 %v1515_v16, %v1347_v21  ;;  %v1348_v0 = vpop.f32.mrf.mxu1  ;;  %v2511_v8 = vpop.f32.mrf.mxu0  ;;  %v5537_v16 = vld [vmem:[%s9816_s0 + $0xfc] sm:$0xf0] }
 0x137   :  { %v1349_v50 = vadd.f32 %v1348_v0, %v7516_v48  ;;  %v5540_v17 = vor.u32 %v6579_v42, %v5537_v16  ;;  %v6897_v48 = vld [vmem:[%s9815_s1 + $0x1e0] sm:$0xff] }
 0x138   :  { %v2341_v9 = vadd.f32 %v2340_v28, %v1516_v10  ;;  %3839 = vmatpush.bf16.msra.mxu3 %v6897_v48  ;;  %v6665_v16 = vld [vmem:[%s9815_s1 + $0xa0] sm:$0xff] }
 0x139   :  { %2667 = vmatpush.bf16.msra.mxu1 %v6665_v16 }
 0x13a   :  { %v7858_v21 = vadd.f32 %v2509_v13, %v2341_v9  ;;  %v5064_v13 = vor.u32 %v6701_v27, %v5063_v40  ;;  %v6905_v27 = vld [vmem:[%s9815_s1 + $0x220] sm:$0xff] }
 0x13b   :  { %4008 = vmatpush.bf16.msra.mxu0 %v6905_v27 }
 0x13d   :  { %v1517_v51 = vpop.f32.mrf.mxu2  ;;  %v2342_v53 = vpop.f32.mrf.mxu3 }
 0x13e   :  { %v1518_v41 = vadd.f32 %v1517_v51, %v1349_v50  ;;  %v1351_v11 = vpop.f32.mrf.mxu1  ;;  %v2514_v12 = vpop.f32.mrf.mxu0  ;;  %v5549_v50 = vld [vmem:[%s9816_s0 + $0x114] sm:$0xf0] }
 0x13f   :  { %v1352_v28 = vadd.f32 %v1351_v11, %v7548_v62  ;;  %v6702_v62 = vld [vmem:[%s9816_s0 + $0x124] sm:$0xf] }
 0x140   :  { %v2343_v36 = vadd.f32 %v2342_v53, %v1518_v41  ;;  %v6704_v53 = vld [vmem:[%s9816_s0 + $0x130] sm:$0xf0] }
 0x141   :  { %1390 = vmatmul.bf16.gmra.mxu1 %v5060_v1  ;;  %2553 = vmatmul.bf16.gmra.mxu0 %v5540_v17  ;;  %v5547_v1 = vld [vmem:[%s9816_s0 + $0x108] sm:$0xf]  ;;  %v6583_v17 = vld [vmem:[%s9816_s0 + $0x110] sm:$0xf0] }
 0x142   :  { %1559 = vmatmul.bf16.gmra.mxu2 %v5064_v13  ;;  %2384 = vmatmul.bf16.gmra.mxu3 %v5536_v20  ;;  %v7876_v0 = vadd.f32 %v2511_v8, %v2343_v36  ;;  %v5069_v8 = vld [vmem:[%s9816_s0 + $0x12c] sm:$0xf0]  ;;  %v5552_v36 = vor.u32 %v6582_v33, %v5549_v50  ;;  %v5081_v33 = vld [vmem:[%s9816_s0 + $0x144] sm:$0xf0] }
 0x143   :  { %v5072_v20 = vor.u32 %v6702_v62, %v5069_v8  ;;  %v5561_v50 = vld [vmem:[%s9816_s0 + $0x12c] sm:$0xf0] }
 0x145   :  { %v1520_v10 = vpop.f32.mrf.mxu2  ;;  %v2345_v9 = vpop.f32.mrf.mxu3 }
 0x146   :  { %v1521_v39 = vadd.f32 %v1520_v10, %v1352_v28  ;;  %v1353_v22 = vpop.f32.mrf.mxu1  ;;  %v2516_v40 = vpop.f32.mrf.mxu0  ;;  %v5076_v28 = vor.u32 %v6704_v53, %v5075_v19  ;;  %v5548_v10 = vor.u32 %v6583_v17, %v5547_v1  ;;  %v6705_v19 = vld [vmem:[%s9816_s0 + $0x13c] sm:$0xf]  ;;  %v6707_v1 = vld [vmem:[%s9816_s0 + $0x148] sm:$0xf0]  ;;  %v5559_v17 = vld [vmem:[%s9816_s0 + $0x120] sm:$0xf] }
 0x147   :  { %v1354_v41 = vadd.f32 %v1353_v22, %v7562_v6 }
 0x148   :  { %v2346_v42 = vadd.f32 %v2345_v9, %v1521_v39 }
 0x14a   :  { %v7900_v51 = vadd.f32 %v2514_v12, %v2346_v42 }
 0x14d   :  { %v1522_v11 = vpop.f32.mrf.mxu2  ;;  %v2347_v13 = vpop.f32.mrf.mxu3 }
 0x14e   :  { %v1523_v12 = vadd.f32 %v1522_v11, %v1354_v41  ;;  %v1356_v37 = vpop.f32.mrf.mxu1  ;;  %v2519_v48 = vpop.f32.mrf.mxu0  ;;  %v6586_v41 = vld [vmem:[%s9816_s0 + $0x128] sm:$0xf0] }
 0x14f   :  { %v1357_v42 = vadd.f32 %v1356_v37, %v7600_v24  ;;  %v6585_v24 = vld [vmem:[%s9816_s0 + $0x124] sm:$0xf] }
 0x150   :  { %v2348_v9 = vadd.f32 %v2347_v13, %v1523_v12  ;;  %v5564_v12 = vor.u32 %v6585_v24, %v5561_v50  ;;  %v5093_v24 = vld [vmem:[%s9816_s0 + $0x15c] sm:$0xf0]  ;;  %v5573_v50 = vld [vmem:[%s9816_s0 + $0x144] sm:$0xf0] }
 0x151   :  { %1395 = vmatmul.bf16.gmra.mxu1 %v5072_v20  ;;  %2558 = vmatmul.bf16.gmra.mxu0 %v5552_v36  ;;  %v5084_v36 = vor.u32 %v6705_v19, %v5081_v33 }
 0x152   :  { %1564 = vmatmul.bf16.gmra.mxu2 %v5076_v28  ;;  %2389 = vmatmul.bf16.gmra.mxu3 %v5548_v10  ;;  %v7912_v39 = vadd.f32 %v2516_v40, %v2348_v9  ;;  %v5087_v40 = vld [vmem:[%s9816_s0 + $0x140] sm:$0xf]  ;;  %v5560_v9 = vor.u32 %v6586_v41, %v5559_v17  ;;  %v6710_v17 = vld [vmem:[%s9816_s0 + $0x160] sm:$0xf0]  ;;  %v5571_v41 = vld [vmem:[%s9816_s0 + $0x138] sm:$0xf] }
 0x153   :  { %v5088_v10 = vor.u32 %v6707_v1, %v5087_v40  ;;  %v6708_v40 = vld [vmem:[%s9816_s0 + $0x154] sm:$0xf] }
 0x155   :  { %v1525_v16 = vpop.f32.mrf.mxu2  ;;  %v2350_v6 = vpop.f32.mrf.mxu3 }
 0x156   :  { %v1526_v22 = vadd.f32 %v1525_v16, %v1357_v42  ;;  %v1358_v27 = vpop.f32.mrf.mxu1  ;;  %v2521_v62 = vpop.f32.mrf.mxu0 }
 0x157   :  { %v1359_v11 = vadd.f32 %v1358_v27, %v7608_v34 }
 0x158   :  { %v2351_v8 = vadd.f32 %v2350_v6, %v1526_v22 }
 0x15a   :  { %v7930_v53 = vadd.f32 %v2519_v48, %v2351_v8 }
 0x15d   :  { %v1527_v13 = vpop.f32.mrf.mxu2  ;;  %v2352_v20 = vpop.f32.mrf.mxu3 }
 0x15e   :  { %v1528_v37 = vadd.f32 %v1527_v13, %v1359_v11  ;;  %v1361_v48 = vpop.f32.mrf.mxu1  ;;  %v2524_v28 = vpop.f32.mrf.mxu0  ;;  %v6589_v11 = vld [vmem:[%s9816_s0 + $0x140] sm:$0xf0] }
 0x15f   :  { %v1362_v6 = vadd.f32 %v1361_v48, %v7640_v56  ;;  %v6588_v56 = vld [vmem:[%s9816_s0 + $0x13c] sm:$0xf] }
 0x160   :  { %v2353_v42 = vadd.f32 %v2352_v20, %v1528_v37  ;;  %v5576_v37 = vor.u32 %v6588_v56, %v5573_v50  ;;  %v5105_v56 = vld [vmem:[%s9816_s0 + $0x174] sm:$0xf0]  ;;  %v5585_v50 = vld [vmem:[%s9816_s0 + $0x15c] sm:$0xf0] }
 0x161   :  { %1400 = vmatmul.bf16.gmra.mxu1 %v5084_v36  ;;  %2563 = vmatmul.bf16.gmra.mxu0 %v5564_v12  ;;  %v5096_v12 = vor.u32 %v6708_v40, %v5093_v24 }
 0x162   :  { %1569 = vmatmul.bf16.gmra.mxu2 %v5088_v10  ;;  %2394 = vmatmul.bf16.gmra.mxu3 %v5560_v9  ;;  %v7942_v16 = vadd.f32 %v2521_v62, %v2353_v42  ;;  %v5099_v62 = vld [vmem:[%s9816_s0 + $0x158] sm:$0xf]  ;;  %v5572_v42 = vor.u32 %v6589_v11, %v5571_v41  ;;  %v6713_v41 = vld [vmem:[%s9816_s0 + $0x178] sm:$0xf0]  ;;  %v5583_v11 = vld [vmem:[%s9816_s0 + $0x150] sm:$0xf] }
 0x163   :  { %v5100_v9 = vor.u32 %v6710_v17, %v5099_v62  ;;  %v6711_v62 = vld [vmem:[%s9816_s0 + $0x16c] sm:$0xf] }
 0x165   :  { %v1530_v22 = vpop.f32.mrf.mxu2  ;;  %v2355_v34 = vpop.f32.mrf.mxu3 }
 0x166   :  { %v1531_v27 = vadd.f32 %v1530_v22, %v1362_v6  ;;  %v1363_v8 = vpop.f32.mrf.mxu1  ;;  %v2526_v19 = vpop.f32.mrf.mxu0 }
 0x167   :  { %v1364_v13 = vadd.f32 %v1363_v8, %v7648_v2 }
 0x168   :  { %v2356_v33 = vadd.f32 %v2355_v34, %v1531_v27 }
 0x16a   :  { %v7960_v1 = vadd.f32 %v2524_v28, %v2356_v33 }
 0x16d   :  { %v1532_v20 = vpop.f32.mrf.mxu2  ;;  %v2357_v36 = vpop.f32.mrf.mxu3 }
 0x16e   :  { %v1533_v48 = vadd.f32 %v1532_v20, %v1364_v13  ;;  %v1366_v28 = vpop.f32.mrf.mxu1  ;;  %v2529_v10 = vpop.f32.mrf.mxu0  ;;  %v6592_v13 = vld [vmem:[%s9816_s0 + $0x158] sm:$0xf0] }
 0x16f   :  { %v1367_v34 = vadd.f32 %v1366_v28, %v7680_v30  ;;  %v6591_v30 = vld [vmem:[%s9816_s0 + $0x154] sm:$0xf] }
 0x170   :  { %v2358_v6 = vadd.f32 %v2357_v36, %v1533_v48  ;;  %v5588_v48 = vor.u32 %v6591_v30, %v5585_v50  ;;  %v6664_v50 = vld [vmem:[%s9815_s1 + $0x98] sm:$0xff] }
 0x171   :  { %1405 = vmatmul.bf16.gmra.mxu1 %v5096_v12  ;;  %2568 = vmatmul.bf16.gmra.mxu0 %v5576_v37  ;;  %v5108_v37 = vor.u32 %v6711_v62, %v5105_v56 }
 0x172   :  { %1574 = vmatmul.bf16.gmra.mxu2 %v5100_v9  ;;  %2399 = vmatmul.bf16.gmra.mxu3 %v5572_v42  ;;  %v7972_v22 = vadd.f32 %v2526_v19, %v2358_v6  ;;  %v5111_v19 = vld [vmem:[%s9816_s0 + $0x170] sm:$0xf]  ;;  %v5584_v6 = vor.u32 %v6592_v13, %v5583_v11  ;;  %v5123_v11 = vld [vmem:[%s9816_s0 + $0x188] sm:$0xf]  ;;  %v6594_v13 = vld [vmem:[%s9816_s0 + $0x16c] sm:$0xf] }
 0x173   :  { %v5112_v42 = vor.u32 %v6713_v41, %v5111_v19  ;;  %v6904_v41 = vld [vmem:[%s9815_s1 + $0x218] sm:$0xff]  ;;  %2668 = vmatpush.bf16.msra.mxu1 %v6664_v50 }
 0x174   :  { %4009 = vmatpush.bf16.msra.mxu0 %v6904_v41 }
 0x175   :  { %v1535_v27 = vpop.f32.mrf.mxu2  ;;  %v2360_v2 = vpop.f32.mrf.mxu3 }
 0x176   :  { %v1536_v8 = vadd.f32 %v1535_v27, %v1367_v34  ;;  %v1368_v33 = vpop.f32.mrf.mxu1  ;;  %v2531_v40 = vpop.f32.mrf.mxu0  ;;  %v6888_v27 = vld [vmem:[%s9815_s1 + $0x198] sm:$0xff] }
 0x177   :  { %v1369_v20 = vadd.f32 %v1368_v33, %v7688_v44  ;;  %v6896_v44 = vld [vmem:[%s9815_s1 + $0x1d8] sm:$0xff]  ;;  %3671 = vmatpush.bf16.msra.mxu2 %v6888_v27 }
 0x178   :  { %v2361_v24 = vadd.f32 %v2360_v2, %v1536_v8  ;;  %3840 = vmatpush.bf16.msra.mxu3 %v6896_v44 }
 0x17a   :  { %v7990_v17 = vadd.f32 %v2529_v10, %v2361_v24 }
 0x17d   :  { %v1537_v36 = vpop.f32.mrf.mxu2  ;;  %v2362_v12 = vpop.f32.mrf.mxu3 }
 0x17e   :  { %v1538_v28 = vadd.f32 %v1537_v36, %v1369_v20  ;;  %v1371_v10 = vpop.f32.mrf.mxu1  ;;  %v2534_v9 = vpop.f32.mrf.mxu0  ;;  %v5597_v20 = vld [vmem:[%s9816_s0 + $0x174] sm:$0xf0] }
 0x17f   :  { %v1372_v8 = vadd.f32 %v1371_v10, %v7720_v14  ;;  %v6714_v14 = vld [vmem:[%s9816_s0 + $0x184] sm:$0xf] }
 0x180   :  { %v2363_v34 = vadd.f32 %v2362_v12, %v1538_v28  ;;  %v6716_v12 = vld [vmem:[%s9816_s0 + $0x190] sm:$0xf0] }
 0x181   :  { %1410 = vmatmul.bf16.gmra.mxu1 %v5108_v37  ;;  %2573 = vmatmul.bf16.gmra.mxu0 %v5588_v48  ;;  %v5595_v37 = vld [vmem:[%s9816_s0 + $0x168] sm:$0xf]  ;;  %v6595_v48 = vld [vmem:[%s9816_s0 + $0x170] sm:$0xf0] }
 0x182   :  { %1579 = vmatmul.bf16.gmra.mxu2 %v5112_v42  ;;  %2404 = vmatmul.bf16.gmra.mxu3 %v5584_v6  ;;  %v8008_v2 = vadd.f32 %v2531_v40, %v2363_v34  ;;  %v5117_v40 = vld [vmem:[%s9816_s0 + $0x18c] sm:$0xf0]  ;;  %v5600_v34 = vor.u32 %v6594_v13, %v5597_v20  ;;  %v5129_v13 = vld [vmem:[%s9816_s0 + $0x1d4] sm:$0xf0]  ;;  %v5609_v20 = vld [vmem:[%s9816_s0 + $0x1bc] sm:$0xf0] }
 0x183   :  { %v5120_v6 = vor.u32 %v6714_v14, %v5117_v40 }
 0x185   :  { %v1540_v33 = vpop.f32.mrf.mxu2  ;;  %v2365_v24 = vpop.f32.mrf.mxu3 }
 0x186   :  { %v1541_v62 = vadd.f32 %v1540_v33, %v1372_v8  ;;  %v1373_v56 = vpop.f32.mrf.mxu1  ;;  %v2536_v19 = vpop.f32.mrf.mxu0  ;;  %v5124_v8 = vor.u32 %v6716_v12, %v5123_v11  ;;  %v5596_v33 = vor.u32 %v6595_v48, %v5595_v37  ;;  %v6717_v11 = vld [vmem:[%s9816_s0 + $0x1cc] sm:$0xf]  ;;  %v6719_v37 = vld [vmem:[%s9816_s0 + $0x1d8] sm:$0xf0]  ;;  %v5607_v48 = vld [vmem:[%s9816_s0 + $0x1b0] sm:$0xf] }
 0x187   :  { %v1374_v28 = vadd.f32 %v1373_v56, %v7734_v54 }
 0x188   :  { %v2366_v30 = vadd.f32 %v2365_v24, %v1541_v62 }
 0x18a   :  { %v8032_v36 = vadd.f32 %v2534_v9, %v2366_v30 }
 0x18d   :  { %v1542_v10 = vpop.f32.mrf.mxu2  ;;  %v2367_v42 = vpop.f32.mrf.mxu3 }
 0x18e   :  { %v1543_v9 = vadd.f32 %v1542_v10, %v1374_v28  ;;  %v1376_v27 = vpop.f32.mrf.mxu1  ;;  %v2539_v44 = vpop.f32.mrf.mxu0  ;;  %v6598_v28 = vld [vmem:[%s9816_s0 + $0x1b8] sm:$0xf0] }
 0x18f   :  { %v1377_v30 = vadd.f32 %v1376_v27, %v7772_v60  ;;  %v6597_v60 = vld [vmem:[%s9816_s0 + $0x1b4] sm:$0xf] }
 0x190   :  { %v2368_v24 = vadd.f32 %v2367_v42, %v1543_v9  ;;  %v5612_v9 = vor.u32 %v6597_v60, %v5609_v20  ;;  %v5141_v60 = vld [vmem:[%s9816_s0 + $0x1ec] sm:$0xf0]  ;;  %v5621_v20 = vld [vmem:[%s9816_s0 + $0x1d4] sm:$0xf0] }
 0x191   :  { %1415 = vmatmul.bf16.gmra.mxu1 %v5120_v6  ;;  %2578 = vmatmul.bf16.gmra.mxu0 %v5600_v34  ;;  %v5132_v34 = vor.u32 %v6717_v11, %v5129_v13 }
 0x192   :  { %1584 = vmatmul.bf16.gmra.mxu2 %v5124_v8  ;;  %2409 = vmatmul.bf16.gmra.mxu3 %v5596_v33  ;;  %v8044_v62 = vadd.f32 %v2536_v19, %v2368_v24  ;;  %v5135_v19 = vld [vmem:[%s9816_s0 + $0x1d0] sm:$0xf]  ;;  %v5608_v24 = vor.u32 %v6598_v28, %v5607_v48  ;;  %v6722_v48 = vld [vmem:[%s9816_s0 + $0x1f0] sm:$0xf0]  ;;  %v5619_v28 = vld [vmem:[%s9816_s0 + $0x1c8] sm:$0xf] }
 0x193   :  { %v5136_v33 = vor.u32 %v6719_v37, %v5135_v19  ;;  %v6720_v19 = vld [vmem:[%s9816_s0 + $0x1e4] sm:$0xf] }
 0x195   :  { %v1545_v50 = vpop.f32.mrf.mxu2  ;;  %v2370_v54 = vpop.f32.mrf.mxu3 }
 0x196   :  { %v1546_v56 = vadd.f32 %v1545_v50, %v1377_v30  ;;  %v1378_v41 = vpop.f32.mrf.mxu1  ;;  %v2541_v14 = vpop.f32.mrf.mxu0 }
 0x197   :  { %v1379_v10 = vadd.f32 %v1378_v41, %v7780_v5 }
 0x198   :  { %v2371_v40 = vadd.f32 %v2370_v54, %v1546_v56 }
 0x19a   :  { %v8062_v12 = vadd.f32 %v2539_v44, %v2371_v40 }
 0x19d   :  { %v1547_v42 = vpop.f32.mrf.mxu2  ;;  %v2372_v6 = vpop.f32.mrf.mxu3 }
 0x19e   :  { %v1548_v27 = vadd.f32 %v1547_v42, %v1379_v10  ;;  %v1381_v44 = vpop.f32.mrf.mxu1  ;;  %v2544_v8 = vpop.f32.mrf.mxu0  ;;  %v6601_v10 = vld [vmem:[%s9816_s0 + $0x1d0] sm:$0xf0] }
 0x19f   :  { %v1382_v54 = vadd.f32 %v1381_v44, %v7470_v23  ;;  %v6600_v23 = vld [vmem:[%s9816_s0 + $0x1cc] sm:$0xf] }
 0x1a0   :  { %v2373_v30 = vadd.f32 %v2372_v6, %v1548_v27  ;;  %v5624_v27 = vor.u32 %v6600_v23, %v5621_v20  ;;  %v5153_v23 = vld [vmem:[%s9816_s0 + $0x204] sm:$0xf0]  ;;  %v5633_v20 = vld [vmem:[%s9816_s0 + $0x1ec] sm:$0xf0] }
 0x1a1   :  { %1420 = vmatmul.bf16.gmra.mxu1 %v5132_v34  ;;  %2583 = vmatmul.bf16.gmra.mxu0 %v5612_v9  ;;  %v5144_v9 = vor.u32 %v6720_v19, %v5141_v60 }
 0x1a2   :  { %1589 = vmatmul.bf16.gmra.mxu2 %v5136_v33  ;;  %2414 = vmatmul.bf16.gmra.mxu3 %v5608_v24  ;;  %v8074_v50 = vadd.f32 %v2541_v14, %v2373_v30  ;;  %v5147_v14 = vld [vmem:[%s9816_s0 + $0x1e8] sm:$0xf]  ;;  %v5620_v30 = vor.u32 %v6601_v10, %v5619_v28  ;;  %v6725_v28 = vld [vmem:[%s9816_s0 + $0x208] sm:$0xf0]  ;;  %v5631_v10 = vld [vmem:[%s9816_s0 + $0x1e0] sm:$0xf] }
 0x1a3   :  { %v5148_v24 = vor.u32 %v6722_v48, %v5147_v14  ;;  %v6723_v14 = vld [vmem:[%s9816_s0 + $0x1fc] sm:$0xf] }
 0x1a5   :  { %v1550_v56 = vpop.f32.mrf.mxu2  ;;  %v2375_v5 = vpop.f32.mrf.mxu3 }
 0x1a6   :  { %v1551_v41 = vadd.f32 %v1550_v56, %v1382_v54  ;;  %v1383_v40 = vpop.f32.mrf.mxu1  ;;  %v2546_v11 = vpop.f32.mrf.mxu0 }
 0x1a7   :  { %v1384_v42 = vadd.f32 %v1383_v40, %v7478_v29 }
 0x1a8   :  { %v2376_v13 = vadd.f32 %v2375_v5, %v1551_v41 }
 0x1aa   :  { %v8092_v37 = vadd.f32 %v2544_v8, %v2376_v13 }
 0x1ad   :  { %v1552_v6 = vpop.f32.mrf.mxu2  ;;  %v2377_v34 = vpop.f32.mrf.mxu3 }
 0x1ae   :  { %v1553_v44 = vadd.f32 %v1552_v6, %v1384_v42  ;;  %v1386_v8 = vpop.f32.mrf.mxu1  ;;  %v2549_v33 = vpop.f32.mrf.mxu0  ;;  %v6604_v42 = vld [vmem:[%s9816_s0 + $0x1e8] sm:$0xf0] }
 0x1af   :  { %v1387_v5 = vadd.f32 %v1386_v8, %v7510_v43  ;;  %v6603_v43 = vld [vmem:[%s9816_s0 + $0x1e4] sm:$0xf] }
 0x1b0   :  { %v2378_v54 = vadd.f32 %v2377_v34, %v1553_v44  ;;  %v5636_v44 = vor.u32 %v6603_v43, %v5633_v20  ;;  %v6663_v20 = vld [vmem:[%s9815_s1 + $0x90] sm:$0xff] }
 0x1b1   :  { %1425 = vmatmul.bf16.gmra.mxu1 %v5144_v9  ;;  %2588 = vmatmul.bf16.gmra.mxu0 %v5624_v27  ;;  %v5156_v27 = vor.u32 %v6723_v14, %v5153_v23 }
 0x1b2   :  { %1594 = vmatmul.bf16.gmra.mxu2 %v5148_v24  ;;  %2419 = vmatmul.bf16.gmra.mxu3 %v5620_v30  ;;  %v8104_v56 = vadd.f32 %v2546_v11, %v2378_v54  ;;  %v5159_v11 = vld [vmem:[%s9816_s0 + $0x200] sm:$0xf]  ;;  %v5632_v54 = vor.u32 %v6604_v42, %v5631_v10  ;;  %v5171_v10 = vld [vmem:[%s9816_s0 + $0x218] sm:$0xf]  ;;  %v6606_v42 = vld [vmem:[%s9816_s0 + $0x1fc] sm:$0xf] }
 0x1b3   :  { %v5160_v30 = vor.u32 %v6725_v28, %v5159_v11  ;;  %v6903_v28 = vld [vmem:[%s9815_s1 + $0x210] sm:$0xff]  ;;  %2669 = vmatpush.bf16.msra.mxu1 %v6663_v20 }
 0x1b4   :  { %4010 = vmatpush.bf16.msra.mxu0 %v6903_v28 }
 0x1b5   :  { %v1555_v41 = vpop.f32.mrf.mxu2  ;;  %v2380_v29 = vpop.f32.mrf.mxu3 }
 0x1b6   :  { %v1556_v40 = vadd.f32 %v1555_v41, %v1387_v5  ;;  %v1388_v13 = vpop.f32.mrf.mxu1  ;;  %v2551_v19 = vpop.f32.mrf.mxu0  ;;  %v6887_v41 = vld [vmem:[%s9815_s1 + $0x190] sm:$0xff] }
 0x1b7   :  { %v1389_v6 = vadd.f32 %v1388_v13, %v7518_v49  ;;  %v6895_v49 = vld [vmem:[%s9815_s1 + $0x1d0] sm:$0xff]  ;;  %3672 = vmatpush.bf16.msra.mxu2 %v6887_v41 }
 0x1b8   :  { %v2381_v60 = vadd.f32 %v2380_v29, %v1556_v40  ;;  %3841 = vmatpush.bf16.msra.mxu3 %v6895_v49 }
 0x1ba   :  { %v8122_v48 = vadd.f32 %v2549_v33, %v2381_v60 }
 0x1bd   :  { %v1557_v34 = vpop.f32.mrf.mxu2  ;;  %v2382_v9 = vpop.f32.mrf.mxu3 }
 0x1be   :  { %v1558_v8 = vadd.f32 %v1557_v34, %v1389_v6  ;;  %v1391_v33 = vpop.f32.mrf.mxu1  ;;  %v2554_v24 = vpop.f32.mrf.mxu0  ;;  %v5645_v6 = vld [vmem:[%s9816_s0 + $0x204] sm:$0xf0] }
 0x1bf   :  { %v1392_v40 = vadd.f32 %v1391_v33, %v7550_v63  ;;  %v6726_v63 = vld [vmem:[%s9816_s0 + $0x214] sm:$0xf] }
 0x1c0   :  { %v2383_v5 = vadd.f32 %v2382_v9, %v1558_v8  ;;  %v6728_v9 = vld [vmem:[%s9816_s0 + $0x220] sm:$0xf0] }
 0x1c1   :  { %1430 = vmatmul.bf16.gmra.mxu1 %v5156_v27  ;;  %2593 = vmatmul.bf16.gmra.mxu0 %v5636_v44  ;;  %v5643_v27 = vld [vmem:[%s9816_s0 + $0x1f8] sm:$0xf]  ;;  %v6607_v44 = vld [vmem:[%s9816_s0 + $0x200] sm:$0xf0] }
 0x1c2   :  { %1599 = vmatmul.bf16.gmra.mxu2 %v5160_v30  ;;  %2424 = vmatmul.bf16.gmra.mxu3 %v5632_v54  ;;  %v8140_v29 = vadd.f32 %v2551_v19, %v2383_v5  ;;  %v5165_v19 = vld [vmem:[%s9816_s0 + $0x21c] sm:$0xf0]  ;;  %v5648_v5 = vor.u32 %v6606_v42, %v5645_v6  ;;  %v5177_v42 = vld [vmem:[%s9816_s0 + $0x234] sm:$0xf0] }
 0x1c3   :  { %v5168_v54 = vor.u32 %v6726_v63, %v5165_v19  ;;  %v5657_v6 = vld [vmem:[%s9816_s0 + $0x21c] sm:$0xf0] }
 0x1c5   :  { %v1560_v13 = vpop.f32.mrf.mxu2  ;;  %v2385_v60 = vpop.f32.mrf.mxu3 }
 0x1c6   :  { %v1561_v14 = vadd.f32 %v1560_v13, %v1392_v40  ;;  %v1393_v23 = vpop.f32.mrf.mxu1  ;;  %v2556_v11 = vpop.f32.mrf.mxu0  ;;  %v5172_v40 = vor.u32 %v6728_v9, %v5171_v10  ;;  %v5644_v13 = vor.u32 %v6607_v44, %v5643_v27  ;;  %v6729_v10 = vld [vmem:[%s9816_s0 + $0x22c] sm:$0xf]  ;;  %v6731_v27 = vld [vmem:[%s9816_s0 + $0x238] sm:$0xf0]  ;;  %v5655_v44 = vld [vmem:[%s9816_s0 + $0x210] sm:$0xf] }
 0x1c7   :  { %v1394_v8 = vadd.f32 %v1393_v23, %v7564_v7 }
 0x1c8   :  { %v2386_v43 = vadd.f32 %v2385_v60, %v1561_v14 }
 0x1ca   :  { %v8164_v34 = vadd.f32 %v2554_v24, %v2386_v43 }
 0x1cd   :  { %v1562_v33 = vpop.f32.mrf.mxu2  ;;  %v2387_v30 = vpop.f32.mrf.mxu3 }
 0x1ce   :  { %v1563_v24 = vadd.f32 %v1562_v33, %v1394_v8  ;;  %v1396_v41 = vpop.f32.mrf.mxu1  ;;  %v2559_v49 = vpop.f32.mrf.mxu0  ;;  %v6610_v8 = vld [vmem:[%s9816_s0 + $0x218] sm:$0xf0] }
 0x1cf   :  { %v1397_v43 = vadd.f32 %v1396_v41, %v7602_v25  ;;  %v6609_v25 = vld [vmem:[%s9816_s0 + $0x214] sm:$0xf] }
 0x1d0   :  { %v2388_v60 = vadd.f32 %v2387_v30, %v1563_v24  ;;  %v5660_v24 = vor.u32 %v6609_v25, %v5657_v6  ;;  %v5189_v25 = vld [vmem:[%s9816_s0 + $0x24c] sm:$0xf0]  ;;  %v5669_v6 = vld [vmem:[%s9816_s0 + $0x234] sm:$0xf0] }
 0x1d1   :  { %1435 = vmatmul.bf16.gmra.mxu1 %v5168_v54  ;;  %2598 = vmatmul.bf16.gmra.mxu0 %v5648_v5  ;;  %v5180_v5 = vor.u32 %v6729_v10, %v5177_v42 }
 0x1d2   :  { %1604 = vmatmul.bf16.gmra.mxu2 %v5172_v40  ;;  %2429 = vmatmul.bf16.gmra.mxu3 %v5644_v13  ;;  %v8176_v14 = vadd.f32 %v2556_v11, %v2388_v60  ;;  %v5183_v11 = vld [vmem:[%s9816_s0 + $0x230] sm:$0xf]  ;;  %v5656_v60 = vor.u32 %v6610_v8, %v5655_v44  ;;  %v6734_v44 = vld [vmem:[%s9816_s0 + $0x250] sm:$0xf0]  ;;  %v5667_v8 = vld [vmem:[%s9816_s0 + $0x228] sm:$0xf] }
 0x1d3   :  { %v5184_v13 = vor.u32 %v6731_v27, %v5183_v11  ;;  %v6732_v11 = vld [vmem:[%s9816_s0 + $0x244] sm:$0xf] }
 0x1d5   :  { %v1565_v20 = vpop.f32.mrf.mxu2  ;;  %v2390_v7 = vpop.f32.mrf.mxu3 }
 0x1d6   :  { %v1566_v23 = vadd.f32 %v1565_v20, %v1397_v43  ;;  %v1398_v28 = vpop.f32.mrf.mxu1  ;;  %v2561_v63 = vpop.f32.mrf.mxu0 }
 0x1d7   :  { %v1399_v33 = vadd.f32 %v1398_v28, %v7610_v35 }
 0x1d8   :  { %v2391_v19 = vadd.f32 %v2390_v7, %v1566_v23 }
 0x1da   :  { %v8194_v9 = vadd.f32 %v2559_v49, %v2391_v19 }
 0x1dd   :  { %v1567_v30 = vpop.f32.mrf.mxu2  ;;  %v2392_v54 = vpop.f32.mrf.mxu3 }
 0x1de   :  { %v1568_v41 = vadd.f32 %v1567_v30, %v1399_v33  ;;  %v1401_v49 = vpop.f32.mrf.mxu1  ;;  %v2564_v40 = vpop.f32.mrf.mxu0  ;;  %v6613_v33 = vld [vmem:[%s9816_s0 + $0x230] sm:$0xf0] }
 0x1df   :  { %v1402_v7 = vadd.f32 %v1401_v49, %v7642_v57  ;;  %v6612_v57 = vld [vmem:[%s9816_s0 + $0x22c] sm:$0xf] }
 0x1e0   :  { %v2393_v43 = vadd.f32 %v2392_v54, %v1568_v41  ;;  %v5672_v41 = vor.u32 %v6612_v57, %v5669_v6  ;;  %v5201_v57 = vld [vmem:[%s9816_s0 + $0x264] sm:$0xf0]  ;;  %v5681_v6 = vld [vmem:[%s9816_s0 + $0x24c] sm:$0xf0] }
 0x1e1   :  { %1440 = vmatmul.bf16.gmra.mxu1 %v5180_v5  ;;  %2603 = vmatmul.bf16.gmra.mxu0 %v5660_v24  ;;  %v5192_v24 = vor.u32 %v6732_v11, %v5189_v25 }
 0x1e2   :  { %1609 = vmatmul.bf16.gmra.mxu2 %v5184_v13  ;;  %2434 = vmatmul.bf16.gmra.mxu3 %v5656_v60  ;;  %v8206_v20 = vadd.f32 %v2561_v63, %v2393_v43  ;;  %v5195_v63 = vld [vmem:[%s9816_s0 + $0x248] sm:$0xf]  ;;  %v5668_v43 = vor.u32 %v6613_v33, %v5667_v8  ;;  %v6737_v8 = vld [vmem:[%s9816_s0 + $0x268] sm:$0xf0]  ;;  %v5679_v33 = vld [vmem:[%s9816_s0 + $0x240] sm:$0xf] }
 0x1e3   :  { %v5196_v60 = vor.u32 %v6734_v44, %v5195_v63  ;;  %v6735_v63 = vld [vmem:[%s9816_s0 + $0x25c] sm:$0xf] }
 0x1e5   :  { %v1570_v23 = vpop.f32.mrf.mxu2  ;;  %v2395_v35 = vpop.f32.mrf.mxu3 }
 0x1e6   :  { %v1571_v28 = vadd.f32 %v1570_v23, %v1402_v7  ;;  %v1403_v19 = vpop.f32.mrf.mxu1  ;;  %v2566_v10 = vpop.f32.mrf.mxu0 }
 0x1e7   :  { %v1404_v30 = vadd.f32 %v1403_v19, %v7650_v3 }
 0x1e8   :  { %v2396_v42 = vadd.f32 %v2395_v35, %v1571_v28 }
 0x1ea   :  { %v8224_v27 = vadd.f32 %v2564_v40, %v2396_v42 }
 0x1ed   :  { %v1572_v54 = vpop.f32.mrf.mxu2  ;;  %v2397_v5 = vpop.f32.mrf.mxu3 }
 0x1ee   :  { %v1573_v49 = vadd.f32 %v1572_v54, %v1404_v30  ;;  %v1406_v40 = vpop.f32.mrf.mxu1  ;;  %v2569_v13 = vpop.f32.mrf.mxu0  ;;  %v6616_v30 = vld [vmem:[%s9816_s0 + $0x248] sm:$0xf0] }
 0x1ef   :  { %v1407_v35 = vadd.f32 %v1406_v40, %v7682_v31  ;;  %v6615_v31 = vld [vmem:[%s9816_s0 + $0x244] sm:$0xf] }
 0x1f0   :  { %v2398_v7 = vadd.f32 %v2397_v5, %v1573_v49  ;;  %v5684_v49 = vor.u32 %v6615_v31, %v5681_v6  ;;  %v6662_v6 = vld [vmem:[%s9815_s1 + $0x88] sm:$0xff] }
 0x1f1   :  { %1445 = vmatmul.bf16.gmra.mxu1 %v5192_v24  ;;  %2608 = vmatmul.bf16.gmra.mxu0 %v5672_v41  ;;  %v5204_v41 = vor.u32 %v6735_v63, %v5201_v57 }
 0x1f2   :  { %1614 = vmatmul.bf16.gmra.mxu2 %v5196_v60  ;;  %2439 = vmatmul.bf16.gmra.mxu3 %v5668_v43  ;;  %v8236_v23 = vadd.f32 %v2566_v10, %v2398_v7  ;;  %v5207_v10 = vld [vmem:[%s9816_s0 + $0x260] sm:$0xf]  ;;  %v5680_v7 = vor.u32 %v6616_v30, %v5679_v33  ;;  %v5219_v33 = vld [vmem:[%s9816_s0 + $0x278] sm:$0xf]  ;;  %v6618_v30 = vld [vmem:[%s9816_s0 + $0x25c] sm:$0xf] }
 0x1f3   :  { %v5208_v43 = vor.u32 %v6737_v8, %v5207_v10  ;;  %v6902_v8 = vld [vmem:[%s9815_s1 + $0x208] sm:$0xff]  ;;  %2670 = vmatpush.bf16.msra.mxu1 %v6662_v6 }
 0x1f4   :  { %4011 = vmatpush.bf16.msra.mxu0 %v6902_v8 }
 0x1f5   :  { %v1575_v28 = vpop.f32.mrf.mxu2  ;;  %v2400_v3 = vpop.f32.mrf.mxu3 }
 0x1f6   :  { %v1576_v19 = vadd.f32 %v1575_v28, %v1407_v35  ;;  %v1408_v42 = vpop.f32.mrf.mxu1  ;;  %v2571_v11 = vpop.f32.mrf.mxu0  ;;  %v6886_v28 = vld [vmem:[%s9815_s1 + $0x188] sm:$0xff] }
 0x1f7   :  { %v1409_v54 = vadd.f32 %v1408_v42, %v7690_v45  ;;  %v6894_v45 = vld [vmem:[%s9815_s1 + $0x1c8] sm:$0xff]  ;;  %3673 = vmatpush.bf16.msra.mxu2 %v6886_v28 }
 0x1f8   :  { %v2401_v25 = vadd.f32 %v2400_v3, %v1576_v19  ;;  %3842 = vmatpush.bf16.msra.mxu3 %v6894_v45 }
 0x1fa   :  { %v8254_v44 = vadd.f32 %v2569_v13, %v2401_v25 }
 0x1fd   :  { %v1577_v5 = vpop.f32.mrf.mxu2  ;;  %v2402_v24 = vpop.f32.mrf.mxu3 }
 0x1fe   :  { %v1578_v40 = vadd.f32 %v1577_v5, %v1409_v54  ;;  %v1411_v13 = vpop.f32.mrf.mxu1  ;;  %v2574_v60 = vpop.f32.mrf.mxu0  ;;  %v5693_v54 = vld [vmem:[%s9816_s0 + $0x264] sm:$0xf0] }
 0x1ff   :  { %v1412_v19 = vadd.f32 %v1411_v13, %v7722_v15  ;;  %v6738_v15 = vld [vmem:[%s9816_s0 + $0x274] sm:$0xf] }
 0x200   :  { %v2403_v35 = vadd.f32 %v2402_v24, %v1578_v40  ;;  %v6740_v24 = vld [vmem:[%s9816_s0 + $0x280] sm:$0xf0] }
 0x201   :  { %1450 = vmatmul.bf16.gmra.mxu1 %v5204_v41  ;;  %2613 = vmatmul.bf16.gmra.mxu0 %v5684_v49  ;;  %v5691_v41 = vld [vmem:[%s9816_s0 + $0x258] sm:$0xf]  ;;  %v6619_v49 = vld [vmem:[%s9816_s0 + $0x260] sm:$0xf0] }
 0x202   :  { %1619 = vmatmul.bf16.gmra.mxu2 %v5208_v43  ;;  %2444 = vmatmul.bf16.gmra.mxu3 %v5680_v7  ;;  %v8272_v3 = vadd.f32 %v2571_v11, %v2403_v35  ;;  %v5213_v11 = vld [vmem:[%s9816_s0 + $0x27c] sm:$0xf0]  ;;  %v5696_v35 = vor.u32 %v6618_v30, %v5693_v54  ;;  %v5225_v30 = vld [vmem:[%s9816_s0 + $0x294] sm:$0xf0] }
 0x203   :  { %v5216_v7 = vor.u32 %v6738_v15, %v5213_v11  ;;  %v5705_v54 = vld [vmem:[%s9816_s0 + $0x27c] sm:$0xf0] }
 0x205   :  { %v1580_v42 = vpop.f32.mrf.mxu2  ;;  %v2405_v25 = vpop.f32.mrf.mxu3 }
 0x206   :  { %v1581_v63 = vadd.f32 %v1580_v42, %v1412_v19  ;;  %v1413_v57 = vpop.f32.mrf.mxu1  ;;  %v2576_v10 = vpop.f32.mrf.mxu0  ;;  %v5220_v19 = vor.u32 %v6740_v24, %v5219_v33  ;;  %v5692_v42 = vor.u32 %v6619_v49, %v5691_v41  ;;  %v6741_v33 = vld [vmem:[%s9816_s0 + $0x28c] sm:$0xf]  ;;  %v6743_v41 = vld [vmem:[%s9816_s0 + $0x298] sm:$0xf0]  ;;  %v5703_v49 = vld [vmem:[%s9816_s0 + $0x270] sm:$0xf] }
 0x207   :  { %v1414_v40 = vadd.f32 %v1413_v57, %v7736_v55 }
 0x208   :  { %v2406_v31 = vadd.f32 %v2405_v25, %v1581_v63 }
 0x20a   :  { %v8296_v5 = vadd.f32 %v2574_v60, %v2406_v31 }
 0x20d   :  { %v1582_v13 = vpop.f32.mrf.mxu2  ;;  %v2407_v43 = vpop.f32.mrf.mxu3 }
 0x20e   :  { %v1583_v60 = vadd.f32 %v1582_v13, %v1414_v40  ;;  %v1416_v28 = vpop.f32.mrf.mxu1  ;;  %v2579_v45 = vpop.f32.mrf.mxu0  ;;  %v6622_v40 = vld [vmem:[%s9816_s0 + $0x278] sm:$0xf0] }
 0x20f   :  { %v1417_v31 = vadd.f32 %v1416_v28, %v7774_v61  ;;  %v6621_v61 = vld [vmem:[%s9816_s0 + $0x274] sm:$0xf] }
 0x210   :  { %v2408_v25 = vadd.f32 %v2407_v43, %v1583_v60  ;;  %v5708_v60 = vor.u32 %v6621_v61, %v5705_v54  ;;  %v5237_v61 = vld [vmem:[%s9816_s0 + $0x2ac] sm:$0xf0]  ;;  %v5717_v54 = vld [vmem:[%s9816_s0 + $0x294] sm:$0xf0] }
 0x211   :  { %1455 = vmatmul.bf16.gmra.mxu1 %v5216_v7  ;;  %2618 = vmatmul.bf16.gmra.mxu0 %v5696_v35  ;;  %v5228_v35 = vor.u32 %v6741_v33, %v5225_v30 }
 0x212   :  { %1624 = vmatmul.bf16.gmra.mxu2 %v5220_v19  ;;  %2449 = vmatmul.bf16.gmra.mxu3 %v5692_v42  ;;  %v8308_v63 = vadd.f32 %v2576_v10, %v2408_v25  ;;  %v5231_v10 = vld [vmem:[%s9816_s0 + $0x290] sm:$0xf]  ;;  %v5704_v25 = vor.u32 %v6622_v40, %v5703_v49  ;;  %v6746_v49 = vld [vmem:[%s9816_s0 + $0x2b0] sm:$0xf0]  ;;  %v5715_v40 = vld [vmem:[%s9816_s0 + $0x288] sm:$0xf] }
 0x213   :  { %v5232_v42 = vor.u32 %v6743_v41, %v5231_v10  ;;  %v6744_v10 = vld [vmem:[%s9816_s0 + $0x2a4] sm:$0xf] }
 0x215   :  { %v1585_v6 = vpop.f32.mrf.mxu2  ;;  %v2410_v55 = vpop.f32.mrf.mxu3 }
 0x216   :  { %v1586_v57 = vadd.f32 %v1585_v6, %v1417_v31  ;;  %v1418_v8 = vpop.f32.mrf.mxu1  ;;  %v2581_v15 = vpop.f32.mrf.mxu0 }
 0x217   :  { %v1419_v13 = vadd.f32 %v1418_v8, %v7782_v59 }
 0x218   :  { %v2411_v11 = vadd.f32 %v2410_v55, %v1586_v57 }
 0x21a   :  { %v8326_v24 = vadd.f32 %v2579_v45, %v2411_v11 }
 0x21d   :  { %v1587_v43 = vpop.f32.mrf.mxu2  ;;  %v2412_v7 = vpop.f32.mrf.mxu3 }
 0x21e   :  { %v1588_v28 = vadd.f32 %v1587_v43, %v1419_v13  ;;  %v1421_v45 = vpop.f32.mrf.mxu1  ;;  %v2584_v19 = vpop.f32.mrf.mxu0  ;;  %v6625_v13 = vld [vmem:[%s9816_s0 + $0x290] sm:$0xf0] }
 0x21f   :  { %v1422_v55 = vadd.f32 %v1421_v45, %v7472_v26  ;;  %v6624_v26 = vld [vmem:[%s9816_s0 + $0x28c] sm:$0xf] }
 0x220   :  { %v2413_v31 = vadd.f32 %v2412_v7, %v1588_v28  ;;  %v5720_v28 = vor.u32 %v6624_v26, %v5717_v54  ;;  %v5249_v26 = vld [vmem:[%s9816_s0 + $0x2c4] sm:$0xf0]  ;;  %v5729_v54 = vld [vmem:[%s9816_s0 + $0x2ac] sm:$0xf0] }
 0x221   :  { %1460 = vmatmul.bf16.gmra.mxu1 %v5228_v35  ;;  %2623 = vmatmul.bf16.gmra.mxu0 %v5708_v60  ;;  %v5240_v60 = vor.u32 %v6744_v10, %v5237_v61 }
 0x222   :  { %1629 = vmatmul.bf16.gmra.mxu2 %v5232_v42  ;;  %2454 = vmatmul.bf16.gmra.mxu3 %v5704_v25  ;;  %v8338_v6 = vadd.f32 %v2581_v15, %v2413_v31  ;;  %v5243_v15 = vld [vmem:[%s9816_s0 + $0x2a8] sm:$0xf]  ;;  %v5716_v31 = vor.u32 %v6625_v13, %v5715_v40  ;;  %v6749_v40 = vld [vmem:[%s9816_s0 + $0x2c8] sm:$0xf0]  ;;  %v5727_v13 = vld [vmem:[%s9816_s0 + $0x2a0] sm:$0xf] }
 0x223   :  { %v5244_v25 = vor.u32 %v6746_v49, %v5243_v15  ;;  %v6747_v15 = vld [vmem:[%s9816_s0 + $0x2bc] sm:$0xf] }
 0x225   :  { %v1590_v57 = vpop.f32.mrf.mxu2  ;;  %v2415_v59 = vpop.f32.mrf.mxu3 }
 0x226   :  { %v1591_v8 = vadd.f32 %v1590_v57, %v1422_v55  ;;  %v1423_v11 = vpop.f32.mrf.mxu1  ;;  %v2586_v33 = vpop.f32.mrf.mxu0 }
 0x227   :  { %v1424_v43 = vadd.f32 %v1423_v11, %v7504_v38 }
 0x228   :  { %v2416_v30 = vadd.f32 %v2415_v59, %v1591_v8 }
 0x22a   :  { %v8356_v41 = vadd.f32 %v2584_v19, %v2416_v30 }
 0x22d   :  { %v1592_v7 = vpop.f32.mrf.mxu2  ;;  %v2417_v35 = vpop.f32.mrf.mxu3 }
 0x22e   :  { %v1593_v45 = vadd.f32 %v1592_v7, %v1424_v43  ;;  %v1426_v19 = vpop.f32.mrf.mxu1  ;;  %v2589_v42 = vpop.f32.mrf.mxu0  ;;  %v6628_v43 = vld [vmem:[%s9816_s0 + $0x2a8] sm:$0xf0] }
 0x22f   :  { %v1427_v59 = vadd.f32 %v1426_v19, %v7512_v46  ;;  %v6627_v46 = vld [vmem:[%s9816_s0 + $0x2a4] sm:$0xf] }
 0x230   :  { %v2418_v55 = vadd.f32 %v2417_v35, %v1593_v45  ;;  %v5732_v45 = vor.u32 %v6627_v46, %v5729_v54  ;;  %v6661_v54 = vld [vmem:[%s9815_s1 + $0x80] sm:$0xff] }
 0x231   :  { %1465 = vmatmul.bf16.gmra.mxu1 %v5240_v60  ;;  %2628 = vmatmul.bf16.gmra.mxu0 %v5720_v28  ;;  %v5252_v28 = vor.u32 %v6747_v15, %v5249_v26 }
 0x232   :  { %1634 = vmatmul.bf16.gmra.mxu2 %v5244_v25  ;;  %2459 = vmatmul.bf16.gmra.mxu3 %v5716_v31  ;;  %v8368_v57 = vadd.f32 %v2586_v33, %v2418_v55  ;;  %v5255_v33 = vld [vmem:[%s9816_s0 + $0x2c0] sm:$0xf]  ;;  %v5728_v55 = vor.u32 %v6628_v43, %v5727_v13  ;;  %v5267_v13 = vld [vmem:[%s9816_s0 + $0x2d8] sm:$0xf]  ;;  %v6630_v43 = vld [vmem:[%s9816_s0 + $0x2bc] sm:$0xf] }
 0x233   :  { %v5256_v31 = vor.u32 %v6749_v40, %v5255_v33  ;;  %v6901_v40 = vld [vmem:[%s9815_s1 + $0x200] sm:$0xff]  ;;  %2671 = vmatpush.bf16.msra.mxu1 %v6661_v54 }
 0x234   :  { %4012 = vmatpush.bf16.msra.mxu0 %v6901_v40 }
 0x235   :  { %v1595_v8 = vpop.f32.mrf.mxu2  ;;  %v2420_v38 = vpop.f32.mrf.mxu3 }
 0x236   :  { %v1596_v11 = vadd.f32 %v1595_v8, %v1427_v59  ;;  %v1428_v30 = vpop.f32.mrf.mxu1  ;;  %v2591_v10 = vpop.f32.mrf.mxu0  ;;  %v6885_v8 = vld [vmem:[%s9815_s1 + $0x180] sm:$0xff] }
 0x237   :  { %v1429_v7 = vadd.f32 %v1428_v30, %v7544_v58  ;;  %v6893_v58 = vld [vmem:[%s9815_s1 + $0x1c0] sm:$0xff]  ;;  %3674 = vmatpush.bf16.msra.mxu2 %v6885_v8 }
 0x238   :  { %v2421_v61 = vadd.f32 %v2420_v38, %v1596_v11  ;;  %3843 = vmatpush.bf16.msra.mxu3 %v6893_v58 }
 0x23a   :  { %v8386_v49 = vadd.f32 %v2589_v42, %v2421_v61 }
 0x23d   :  { %v1597_v35 = vpop.f32.mrf.mxu2  ;;  %v2422_v60 = vpop.f32.mrf.mxu3 }
 0x23e   :  { %v1598_v19 = vadd.f32 %v1597_v35, %v1429_v7  ;;  %v1431_v42 = vpop.f32.mrf.mxu1  ;;  %v2594_v25 = vpop.f32.mrf.mxu0  ;;  %v5741_v7 = vld [vmem:[%s9816_s0 + $0x2c4] sm:$0xf0] }
 0x23f   :  { %v1432_v11 = vadd.f32 %v1431_v42, %v7558_v4  ;;  %v6750_v4 = vld [vmem:[%s9816_s0 + $0x2d4] sm:$0xf] }
 0x240   :  { %v2423_v59 = vadd.f32 %v2422_v60, %v1598_v19  ;;  %v6752_v60 = vld [vmem:[%s9816_s0 + $0x2e0] sm:$0xf0] }
 0x241   :  { %1470 = vmatmul.bf16.gmra.mxu1 %v5252_v28  ;;  %2633 = vmatmul.bf16.gmra.mxu0 %v5732_v45  ;;  %v5739_v28 = vld [vmem:[%s9816_s0 + $0x2b8] sm:$0xf]  ;;  %v6631_v45 = vld [vmem:[%s9816_s0 + $0x2c0] sm:$0xf0] }
 0x242   :  { %1639 = vmatmul.bf16.gmra.mxu2 %v5256_v31  ;;  %2464 = vmatmul.bf16.gmra.mxu3 %v5728_v55  ;;  %v8404_v38 = vadd.f32 %v2591_v10, %v2423_v59  ;;  %v5261_v10 = vld [vmem:[%s9816_s0 + $0x2dc] sm:$0xf0]  ;;  %v5744_v59 = vor.u32 %v6630_v43, %v5741_v7  ;;  %v5273_v43 = vld [vmem:[%s9816_s0 + $0x2f4] sm:$0xf0] }
 0x243   :  { %v5264_v55 = vor.u32 %v6750_v4, %v5261_v10  ;;  %v5753_v7 = vld [vmem:[%s9816_s0 + $0x2dc] sm:$0xf0] }
 0x245   :  { %v1600_v30 = vpop.f32.mrf.mxu2  ;;  %v2425_v61 = vpop.f32.mrf.mxu3 }
 0x246   :  { %v1601_v15 = vadd.f32 %v1600_v30, %v1432_v11  ;;  %v1433_v26 = vpop.f32.mrf.mxu1  ;;  %v2596_v33 = vpop.f32.mrf.mxu0  ;;  %v5268_v11 = vor.u32 %v6752_v60, %v5267_v13  ;;  %v5740_v30 = vor.u32 %v6631_v45, %v5739_v28  ;;  %v6753_v13 = vld [vmem:[%s9816_s0 + $0x2ec] sm:$0xf]  ;;  %v6755_v28 = vld [vmem:[%s9816_s0 + $0x2f8] sm:$0xf0]  ;;  %v5751_v45 = vld [vmem:[%s9816_s0 + $0x2d0] sm:$0xf] }
 0x247   :  { %v1434_v19 = vadd.f32 %v1433_v26, %v7596_v18 }
 0x248   :  { %v2426_v46 = vadd.f32 %v2425_v61, %v1601_v15 }
 0x24a   :  { %v8428_v35 = vadd.f32 %v2594_v25, %v2426_v46 }
 0x24c   :  { %9845 = vst [vmem:[#allocation28_spill] sm:$0xff] %v8428_v35 }
 0x24d   :  { %v1602_v42 = vpop.f32.mrf.mxu2  ;;  %v2427_v31 = vpop.f32.mrf.mxu3 }
 0x24e   :  { %v1603_v25 = vadd.f32 %v1602_v42, %v1434_v19  ;;  %v1436_v8 = vpop.f32.mrf.mxu1  ;;  %v2599_v58 = vpop.f32.mrf.mxu0  ;;  %v6634_v19 = vld [vmem:[%s9816_s0 + $0x2d8] sm:$0xf0] }
 0x24f   :  { %v1437_v46 = vadd.f32 %v1436_v8, %v7604_v32  ;;  %v6633_v32 = vld [vmem:[%s9816_s0 + $0x2d4] sm:$0xf] }
 0x250   :  { %v2428_v61 = vadd.f32 %v2427_v31, %v1603_v25  ;;  %v5756_v25 = vor.u32 %v6633_v32, %v5753_v7  ;;  %v5285_v32 = vld [vmem:[%s9816_s0 + $0x30c] sm:$0xf0]  ;;  %v6636_v7 = vld [vmem:[%s9816_s0 + $0x2ec] sm:$0xf] }
 0x251   :  { %1475 = vmatmul.bf16.gmra.mxu1 %v5264_v55  ;;  %2638 = vmatmul.bf16.gmra.mxu0 %v5744_v59  ;;  %v5276_v59 = vor.u32 %v6753_v13, %v5273_v43 }
 0x252   :  { %1644 = vmatmul.bf16.gmra.mxu2 %v5268_v11  ;;  %2469 = vmatmul.bf16.gmra.mxu3 %v5740_v30  ;;  %v8440_v15 = vadd.f32 %v2596_v33, %v2428_v61  ;;  %v5279_v33 = vld [vmem:[%s9816_s0 + $0x2f0] sm:$0xf]  ;;  %v5752_v61 = vor.u32 %v6634_v19, %v5751_v45  ;;  %v6758_v19 = vld [vmem:[%s9816_s0 + $0x310] sm:$0xf0] }
 0x253   :  { %v5280_v30 = vor.u32 %v6755_v28, %v5279_v33  ;;  %v6756_v33 = vld [vmem:[%s9816_s0 + $0x304] sm:$0xf]  ;;  %v5765_v28 = vld [vmem:[%s9816_s0 + $0x2f4] sm:$0xf0] }
 0x254   :  { %9846 = vst [vmem:[#allocation29_spill] sm:$0xff] %v8440_v15 }
 0x255   :  { %v1605_v54 = vpop.f32.mrf.mxu2  ;;  %v2430_v18 = vpop.f32.mrf.mxu3 }
 0x256   :  { %v1606_v26 = vadd.f32 %v1605_v54, %v1437_v46  ;;  %v1438_v40 = vpop.f32.mrf.mxu1  ;;  %v2601_v4 = vpop.f32.mrf.mxu0 }
 0x257   :  { %v1439_v42 = vadd.f32 %v1438_v40, %v7636_v52 }
 0x258   :  { %v2431_v10 = vadd.f32 %v2430_v18, %v1606_v26  ;;  %v9849_v18 = vld [vmem:[#allocation11_spill] sm:$0xff] }
 0x25a   :  { %v8458_v60 = vadd.f32 %v2599_v58, %v2431_v10 }
 0x25c   :  { %9847 = vst [vmem:[#allocation30_spill] sm:$0xff] %v8458_v60 }
 0x25d   :  { %v1607_v31 = vpop.f32.mrf.mxu2  ;;  %v2432_v55 = vpop.f32.mrf.mxu3 }
 0x25e   :  { %v1608_v8 = vadd.f32 %v1607_v31, %v1439_v42  ;;  %v1441_v58 = vpop.f32.mrf.mxu1  ;;  %v2604_v11 = vpop.f32.mrf.mxu0  ;;  %v5763_v42 = vld [vmem:[%s9816_s0 + $0x2e8] sm:$0xf]  ;;  %v6637_v31 = vld [vmem:[%s9816_s0 + $0x2f0] sm:$0xf0] }
 0x25f   :  { %v1442_v26 = vadd.f32 %v1441_v58, %v9849_v18  ;;  %v5288_v58 = vor.u32 %v6756_v33, %v5285_v32 }
 0x260   :  { %v2433_v46 = vadd.f32 %v2432_v55, %v1608_v8  ;;  %v9851_v55 = vld [vmem:[#allocation13_spill] sm:$0xff] }
 0x261   :  { %1480 = vmatmul.bf16.gmra.mxu1 %v5276_v59  ;;  %2643 = vmatmul.bf16.gmra.mxu0 %v5756_v25 }
 0x262   :  { %1649 = vmatmul.bf16.gmra.mxu2 %v5280_v30  ;;  %2474 = vmatmul.bf16.gmra.mxu3 %v5752_v61  ;;  %v8470_v54 = vadd.f32 %v2601_v4, %v2433_v46  ;;  %v5291_v4 = vld [vmem:[%s9816_s0 + $0x308] sm:$0xf]  ;;  %v5768_v30 = vor.u32 %v6636_v7, %v5765_v28  ;;  %v6639_v28 = vld [vmem:[%s9816_s0 + $0x304] sm:$0xf] }
 0x263   :  { %v5292_v18 = vor.u32 %v6758_v19, %v5291_v4  ;;  %v6759_v4 = vld [vmem:[%s9816_s0 + $0x31c] sm:$0xf]  ;;  %v5297_v7 = vld [vmem:[%s9816_s0 + $0x324] sm:$0xf0] }
 0x264   :  { %9848 = vst [vmem:[#allocation31_spill] sm:$0xff] %v8470_v54 }
 0x265   :  { %v1610_v10 = vpop.f32.mrf.mxu2  ;;  %v2435_v52 = vpop.f32.mrf.mxu3 }
 0x266   :  { %v1611_v40 = vadd.f32 %v1610_v10, %v1442_v26  ;;  %v1443_v60 = vpop.f32.mrf.mxu1  ;;  %v2606_v13 = vpop.f32.mrf.mxu0  ;;  %v5764_v26 = vor.u32 %v6637_v31, %v5763_v42  ;;  %v6761_v42 = vld [vmem:[%s9816_s0 + $0x328] sm:$0xf0]  ;;  %v5775_v31 = vld [vmem:[%s9816_s0 + $0x300] sm:$0xf] }
 0x267   :  { %v1444_v59 = vadd.f32 %v1443_v60, %v9851_v55 }
 0x268   :  { %v2436_v43 = vadd.f32 %v2435_v52, %v1611_v40  ;;  %v9853_v40 = vld [vmem:[#allocation15_spill] sm:$0xff] }
 0x26a   :  { %v8488_v45 = vadd.f32 %v2604_v11, %v2436_v43 }
 0x26c   :  { %9850 = vst [vmem:[#allocation11_spill] sm:$0xff] %v8488_v45 }
 0x26d   :  { %v1612_v25 = vpop.f32.mrf.mxu2  ;;  %v2437_v8 = vpop.f32.mrf.mxu3 }
 0x26e   :  { %v1613_v11 = vadd.f32 %v1612_v25, %v1444_v59  ;;  %v1446_v61 = vpop.f32.mrf.mxu1  ;;  %v2609_v46 = vpop.f32.mrf.mxu0  ;;  %v6640_v59 = vld [vmem:[%s9816_s0 + $0x308] sm:$0xf0]  ;;  %v9855_v25 = vld [vmem:[#allocation17_spill] sm:$0xff] }
 0x26f   :  { %v1447_v43 = vadd.f32 %v1446_v61, %v9853_v40  ;;  %v5776_v40 = vor.u32 %v6640_v59, %v5775_v31  ;;  %v6764_v31 = vld [vmem:[%s9816_s0 + $0x340] sm:$0xf0]  ;;  %v5787_v59 = vld [vmem:[%s9816_s0 + $0x318] sm:$0xf] }
 0x270   :  { %v2438_v10 = vadd.f32 %v2437_v8, %v1613_v11  ;;  %v5300_v11 = vor.u32 %v6759_v4, %v5297_v7 }
 0x271   :  { %1485 = vmatmul.bf16.gmra.mxu1 %v5288_v58  ;;  %2648 = vmatmul.bf16.gmra.mxu0 %v5768_v30 }
 0x272   :  { %1654 = vmatmul.bf16.gmra.mxu2 %v5292_v18  ;;  %2479 = vmatmul.bf16.gmra.mxu3 %v5764_v26  ;;  %v8500_v52 = vadd.f32 %v2606_v13, %v2438_v10  ;;  %v5303_v13 = vld [vmem:[%s9816_s0 + $0x320] sm:$0xf] }
 0x273   :  { %v5304_v10 = vor.u32 %v6761_v42, %v5303_v13  ;;  %v6762_v13 = vld [vmem:[%s9816_s0 + $0x334] sm:$0xf] }
 0x274   :  { %9852 = vst [vmem:[#allocation13_spill] sm:$0xff] %v8500_v52 }
 0x275   :  { %v1615_v45 = vpop.f32.mrf.mxu2  ;;  %v2440_v60 = vpop.f32.mrf.mxu3 }
 0x276   :  { %v1616_v55 = vadd.f32 %v1615_v45, %v1447_v43  ;;  %v1448_v54 = vpop.f32.mrf.mxu1  ;;  %v2611_v33 = vpop.f32.mrf.mxu0  ;;  %v5777_v45 = vld [vmem:[%s9816_s0 + $0x30c] sm:$0xf0] }
 0x277   :  { %v1449_v8 = vadd.f32 %v1448_v54, %v9855_v25  ;;  %v5780_v61 = vor.u32 %v6639_v28, %v5777_v45  ;;  %v5309_v28 = vld [vmem:[%s9816_s0 + $0x33c] sm:$0xf0]  ;;  %v6642_v45 = vld [vmem:[%s9816_s0 + $0x31c] sm:$0xf] }
 0x278   :  { %v2441_v32 = vadd.f32 %v2440_v60, %v1616_v55  ;;  %v9857_v55 = vld [vmem:[#allocation19_spill] sm:$0xff] }
 0x27a   :  { %v8518_v19 = vadd.f32 %v2609_v46, %v2441_v32 }
 0x27c   :  { %9854 = vst [vmem:[#allocation15_spill] sm:$0xff] %v8518_v19 }
 0x27d   :  { %v1617_v58 = vpop.f32.mrf.mxu2  ;;  %v2442_v30 = vpop.f32.mrf.mxu3 }
 0x27e   :  { %v1618_v46 = vadd.f32 %v1617_v58, %v1449_v8  ;;  %v1451_v18 = vpop.f32.mrf.mxu1  ;;  %v2614_v26 = vpop.f32.mrf.mxu0  ;;  %v6643_v8 = vld [vmem:[%s9816_s0 + $0x320] sm:$0xf0]  ;;  %v9859_v58 = vld [vmem:[#allocation21_spill] sm:$0xff] }
 0x27f   :  { %v1452_v32 = vadd.f32 %v1451_v18, %v9857_v55  ;;  %v5788_v55 = vor.u32 %v6643_v8, %v5787_v59  ;;  %v6790_v59 = vld [vmem:[%s9816_s0 + $0x38] sm:$0xf0]  ;;  %v6789_v8 = vld [vmem:[%s9816_s0 + $0x34] sm:$0xf] }
 0x280   :  { %v2443_v43 = vadd.f32 %v2442_v30, %v1618_v46  ;;  %v5312_v46 = vor.u32 %v6762_v13, %v5309_v28 }
 0x281   :  { %1490 = vmatmul.bf16.gmra.mxu1 %v5300_v11  ;;  %2653 = vmatmul.bf16.gmra.mxu0 %v5780_v61 }
 0x282   :  { %1659 = vmatmul.bf16.gmra.mxu2 %v5304_v10  ;;  %2484 = vmatmul.bf16.gmra.mxu3 %v5776_v40  ;;  %v8530_v60 = vadd.f32 %v2611_v33, %v2443_v43  ;;  %v5315_v33 = vld [vmem:[%s9816_s0 + $0x338] sm:$0xf] }
 0x283   :  { %v5316_v43 = vor.u32 %v6764_v31, %v5315_v33  ;;  %v5423_v33 = vld [vmem:[%s9816_s0 + $0x8] sm:$0xf] }
 0x284   :  { %9856 = vst [vmem:[#allocation17_spill] sm:$0xff] %v8530_v60 }
 0x285   :  { %v1620_v19 = vpop.f32.mrf.mxu2  ;;  %v2445_v54 = vpop.f32.mrf.mxu3 }
 0x286   :  { %v1621_v25 = vadd.f32 %v1620_v19, %v1452_v32  ;;  %v1453_v52 = vpop.f32.mrf.mxu1  ;;  %v2616_v4 = vpop.f32.mrf.mxu0  ;;  %v5789_v19 = vld [vmem:[%s9816_s0 + $0x324] sm:$0xf0] }
 0x287   :  { %v1454_v30 = vadd.f32 %v1453_v52, %v9859_v58  ;;  %v5792_v18 = vor.u32 %v6642_v45, %v5789_v19  ;;  %v6551_v45 = vld [vmem:[%s9816_s0 + $0x10] sm:$0xf0]  ;;  %v6079_v19 = vld [vmem:[%s9816_s0 + $0x38] sm:$0xf] }
 0x288   :  { %v2446_v7 = vadd.f32 %v2445_v54, %v1621_v25  ;;  %v9861_v25 = vld [vmem:[#allocation23_spill] sm:$0xff] }
 0x28a   :  { %v8548_v42 = vadd.f32 %v2614_v26, %v2446_v7 }
 0x28c   :  { %9858 = vst [vmem:[#allocation19_spill] sm:$0xff] %v8548_v42 }
 0x28d   :  { %v1622_v11 = vpop.f32.mrf.mxu2  ;;  %v2447_v61 = vpop.f32.mrf.mxu3 }
 0x28e   :  { %v1623_v26 = vadd.f32 %v1622_v11, %v1454_v30  ;;  %v1456_v10 = vpop.f32.mrf.mxu1  ;;  %v2619_v40 = vpop.f32.mrf.mxu0  ;;  %v6073_v30 = vld [vmem:[%s9816_s0 + $0x3c] sm:$0xf0]  ;;  %v9863_v11 = vld [vmem:[#allocation25_spill] sm:$0xff] }
 0x28f   :  { %v1457_v7 = vadd.f32 %v1456_v10, %v9861_v25  ;;  %v6076_v25 = vor.u32 %v6789_v8, %v6073_v30  ;;  %v6793_v8 = vld [vmem:[%s9816_s0 + $0x50] sm:$0xf0]  ;;  %v6792_v30 = vld [vmem:[%s9816_s0 + $0x4c] sm:$0xf] }
 0x290   :  { %v2448_v32 = vadd.f32 %v2447_v61, %v1623_v26  ;;  %v5424_v26 = vor.u32 %v6551_v45, %v5423_v33 }
 0x291   :  { %1495 = vmatmul.bf16.gmra.mxu1 %v5312_v46  ;;  %2658 = vmatmul.bf16.gmra.mxu0 %v5792_v18 }
 0x292   :  { %1664 = vmatmul.bf16.gmra.mxu2 %v5316_v43  ;;  %2489 = vmatmul.bf16.gmra.mxu3 %v5788_v55  ;;  %v8560_v54 = vadd.f32 %v2616_v4, %v2448_v32  ;;  %v6071_v4 = vld [vmem:[%s9816_s0 + $0x30] sm:$0xf] }
 0x293   :  { %v6072_v32 = vor.u32 %v6790_v59, %v6071_v4  ;;  %v5435_v4 = vld [vmem:[%s9816_s0 + $0x20] sm:$0xf] }
 0x294   :  { %9860 = vst [vmem:[#allocation21_spill] sm:$0xff] %v8560_v54 }
 0x295   :  { %v1625_v42 = vpop.f32.mrf.mxu2  ;;  %v2450_v52 = vpop.f32.mrf.mxu3 }
 0x296   :  { %v1626_v58 = vadd.f32 %v1625_v42, %v1457_v7  ;;  %v1458_v60 = vpop.f32.mrf.mxu1  ;;  %v2621_v13 = vpop.f32.mrf.mxu0  ;;  %v6791_v42 = vld [vmem:[%s9816_s0 + $0x40] sm:$0xf0] }
 0x297   :  { %v1459_v61 = vadd.f32 %v1458_v60, %v9863_v11  ;;  %v6080_v10 = vor.u32 %v6791_v42, %v6079_v19  ;;  %v6554_v19 = vld [vmem:[%s9816_s0 + $0x28] sm:$0xf0]  ;;  %v6091_v42 = vld [vmem:[%s9816_s0 + $0x50] sm:$0xf] }
 0x298   :  { %v2451_v28 = vadd.f32 %v2450_v52, %v1626_v58  ;;  %v9865_v58 = vld [vmem:[#allocation3_spill] sm:$0xff] }
 0x29a   :  { %v8578_v31 = vadd.f32 %v2619_v40, %v2451_v28 }
 0x29c   :  { %9862 = vst [vmem:[#allocation23_spill] sm:$0xff] %v8578_v31 }
 0x29d   :  { %v1627_v46 = vpop.f32.mrf.mxu2  ;;  %v2452_v18 = vpop.f32.mrf.mxu3 }
 0x29e   :  { %v1628_v40 = vadd.f32 %v1627_v46, %v1459_v61  ;;  %v1461_v43 = vpop.f32.mrf.mxu1  ;;  %v2624_v55 = vpop.f32.mrf.mxu0  ;;  %v6085_v61 = vld [vmem:[%s9816_s0 + $0x54] sm:$0xf0]  ;;  %v9867_v46 = vld [vmem:[#allocation4_spill] sm:$0xff] }
 0x29f   :  { %v1462_v28 = vadd.f32 %v1461_v43, %v9865_v58  ;;  %v6088_v58 = vor.u32 %v6792_v30, %v6085_v61  ;;  %v6796_v30 = vld [vmem:[%s9816_s0 + $0x68] sm:$0xf0]  ;;  %v6795_v61 = vld [vmem:[%s9816_s0 + $0x64] sm:$0xf] }
 0x2a0   :  { %v2453_v7 = vadd.f32 %v2452_v18, %v1628_v40  ;;  %v5436_v40 = vor.u32 %v6554_v19, %v5435_v4 }
 0x2a1   :  { %2672 = vmatmul.bf16.vlgmr.msra.gmra.mxu1 %v5424_v26  ;;  %4013 = vmatmul.bf16.vlgmr.msra.gmra.mxu0 %v6080_v10 }
 0x2a2   :  { %3675 = vmatmul.bf16.vlgmr.msra.gmra.mxu2 %v6072_v32  ;;  %3844 = vmatmul.bf16.vlgmr.msra.gmra.mxu3 %v6076_v25  ;;  %v8590_v52 = vadd.f32 %v2621_v13, %v2453_v7  ;;  %v6083_v13 = vld [vmem:[%s9816_s0 + $0x48] sm:$0xf] }
 0x2a3   :  { %v6084_v7 = vor.u32 %v6793_v8, %v6083_v13  ;;  %v5447_v13 = vld [vmem:[%s9816_s0 + $0x38] sm:$0xf] }
 0x2a4   :  { %9864 = vst [vmem:[#allocation25_spill] sm:$0xff] %v8590_v52 }
 0x2a5   :  { %v1630_v31 = vpop.f32.mrf.mxu2  ;;  %v2455_v60 = vpop.f32.mrf.mxu3 }
 0x2a6   :  { %v1631_v11 = vadd.f32 %v1630_v31, %v1462_v28  ;;  %v1463_v54 = vpop.f32.mrf.mxu1  ;;  %v2626_v33 = vpop.f32.mrf.mxu0  ;;  %v6794_v31 = vld [vmem:[%s9816_s0 + $0x58] sm:$0xf0] }
 0x2a7   :  { %v1464_v18 = vadd.f32 %v1463_v54, %v9867_v46  ;;  %v6092_v43 = vor.u32 %v6794_v31, %v6091_v42  ;;  %v6557_v42 = vld [vmem:[%s9816_s0 + $0x40] sm:$0xf0]  ;;  %v6103_v31 = vld [vmem:[%s9816_s0 + $0x68] sm:$0xf] }
 0x2a8   :  { %v2456_v45 = vadd.f32 %v2455_v60, %v1631_v11  ;;  %v9869_v11 = vld [vmem:[#allocation5_spill] sm:$0xff] }
 0x2aa   :  { %v8608_v59 = vadd.f32 %v2624_v55, %v2456_v45 }
 0x2ac   :  { %9866 = vst [vmem:[#allocation3_spill] sm:$0xff] %v8608_v59 }
 0x2ad   :  { %v1632_v26 = vpop.f32.mrf.mxu2  ;;  %v2457_v10 = vpop.f32.mrf.mxu3 }
 0x2ae   :  { %v1633_v55 = vadd.f32 %v1632_v26, %v1464_v18  ;;  %v1466_v32 = vpop.f32.mrf.mxu1  ;;  %v2629_v25 = vpop.f32.mrf.mxu0  ;;  %v6097_v18 = vld [vmem:[%s9816_s0 + $0x6c] sm:$0xf0]  ;;  %v9871_v26 = vld [vmem:[#allocation6_spill] sm:$0xff] }
 0x2af   :  { %v1467_v45 = vadd.f32 %v1466_v32, %v9869_v11  ;;  %v6100_v11 = vor.u32 %v6795_v61, %v6097_v18  ;;  %v6799_v61 = vld [vmem:[%s9816_s0 + $0x80] sm:$0xf0]  ;;  %v6798_v18 = vld [vmem:[%s9816_s0 + $0x7c] sm:$0xf] }
 0x2b0   :  { %v2458_v28 = vadd.f32 %v2457_v10, %v1633_v55  ;;  %v5448_v55 = vor.u32 %v6557_v42, %v5447_v13 }
 0x2b1   :  { %2677 = vmatmul.bf16.gmra.mxu1 %v5436_v40  ;;  %4018 = vmatmul.bf16.gmra.mxu0 %v6092_v43 }
 0x2b2   :  { %3680 = vmatmul.bf16.gmra.mxu2 %v6084_v7  ;;  %3849 = vmatmul.bf16.gmra.mxu3 %v6088_v58  ;;  %v8620_v60 = vadd.f32 %v2626_v33, %v2458_v28  ;;  %v6095_v33 = vld [vmem:[%s9816_s0 + $0x60] sm:$0xf] }
 0x2b3   :  { %v6096_v28 = vor.u32 %v6796_v30, %v6095_v33  ;;  %v5459_v33 = vld [vmem:[%s9816_s0 + $0x50] sm:$0xf] }
 0x2b4   :  { %9868 = vst [vmem:[#allocation4_spill] sm:$0xff] %v8620_v60 }
 0x2b5   :  { %v1635_v59 = vpop.f32.mrf.mxu2  ;;  %v2460_v54 = vpop.f32.mrf.mxu3 }
 0x2b6   :  { %v1636_v46 = vadd.f32 %v1635_v59, %v1467_v45  ;;  %v1468_v52 = vpop.f32.mrf.mxu1  ;;  %v2631_v4 = vpop.f32.mrf.mxu0  ;;  %v6797_v59 = vld [vmem:[%s9816_s0 + $0x70] sm:$0xf0] }
 0x2b7   :  { %v1469_v10 = vadd.f32 %v1468_v52, %v9871_v26  ;;  %v6104_v32 = vor.u32 %v6797_v59, %v6103_v31  ;;  %v6560_v31 = vld [vmem:[%s9816_s0 + $0x58] sm:$0xf0]  ;;  %v6115_v59 = vld [vmem:[%s9816_s0 + $0x80] sm:$0xf] }
 0x2b8   :  { %v2461_v19 = vadd.f32 %v2460_v54, %v1636_v46  ;;  %v9873_v46 = vld [vmem:[#allocation7_spill] sm:$0xff] }
 0x2ba   :  { %v8638_v8 = vadd.f32 %v2629_v25, %v2461_v19 }
 0x2bc   :  { %9870 = vst [vmem:[#allocation5_spill] sm:$0xff] %v8638_v8 }
 0x2bd   :  { %v1637_v40 = vpop.f32.mrf.mxu2  ;;  %v2462_v43 = vpop.f32.mrf.mxu3 }
 0x2be   :  { %v1638_v25 = vadd.f32 %v1637_v40, %v1469_v10  ;;  %v1471_v7 = vpop.f32.mrf.mxu1  ;;  %v2634_v58 = vpop.f32.mrf.mxu0  ;;  %v6109_v10 = vld [vmem:[%s9816_s0 + $0x84] sm:$0xf0] }
 0x2bf   :  { %v1472_v19 = vadd.f32 %v1471_v7, %v9873_v46  ;;  %v9875_v40 = vld [vmem:[#allocation8_spill] sm:$0xff]  ;;  %v6112_v46 = vor.u32 %v6798_v18, %v6109_v10  ;;  %v6802_v18 = vld [vmem:[%s9816_s0 + $0x98] sm:$0xf0]  ;;  %v6801_v10 = vld [vmem:[%s9816_s0 + $0x94] sm:$0xf] }
 0x2c0   :  { %v2463_v45 = vadd.f32 %v2462_v43, %v1638_v25  ;;  %v5460_v25 = vor.u32 %v6560_v31, %v5459_v33 }
 0x2c1   :  { %2682 = vmatmul.bf16.gmra.mxu1 %v5448_v55  ;;  %4023 = vmatmul.bf16.gmra.mxu0 %v6104_v32 }
 0x2c2   :  { %3685 = vmatmul.bf16.gmra.mxu2 %v6096_v28  ;;  %3854 = vmatmul.bf16.gmra.mxu3 %v6100_v11  ;;  %v8650_v54 = vadd.f32 %v2631_v4, %v2463_v45  ;;  %v6107_v4 = vld [vmem:[%s9816_s0 + $0x78] sm:$0xf] }
 0x2c3   :  { %v6108_v45 = vor.u32 %v6799_v61, %v6107_v4  ;;  %v5471_v4 = vld [vmem:[%s9816_s0 + $0x68] sm:$0xf] }
 0x2c4   :  { %9872 = vst [vmem:[#allocation6_spill] sm:$0xff] %v8650_v54 }
 0x2c5   :  { %v1640_v8 = vpop.f32.mrf.mxu2  ;;  %v2465_v52 = vpop.f32.mrf.mxu3 }
 0x2c6   :  { %v1641_v26 = vadd.f32 %v1640_v8, %v1472_v19  ;;  %v1473_v60 = vpop.f32.mrf.mxu1  ;;  %v2636_v13 = vpop.f32.mrf.mxu0  ;;  %v6800_v8 = vld [vmem:[%s9816_s0 + $0x88] sm:$0xf0] }
 0x2c7   :  { %v1474_v43 = vadd.f32 %v1473_v60, %v9875_v40  ;;  %v6116_v7 = vor.u32 %v6800_v8, %v6115_v59  ;;  %v6563_v59 = vld [vmem:[%s9816_s0 + $0x70] sm:$0xf0]  ;;  %v6127_v8 = vld [vmem:[%s9816_s0 + $0x98] sm:$0xf] }
 0x2c8   :  { %v2466_v42 = vadd.f32 %v2465_v52, %v1641_v26  ;;  %v9877_v26 = vld [vmem:[#allocation9_spill] sm:$0xff] }
 0x2ca   :  { %v8668_v30 = vadd.f32 %v2634_v58, %v2466_v42 }
 0x2cc   :  { %9874 = vst [vmem:[#allocation7_spill] sm:$0xff] %v8668_v30 }
 0x2cd   :  { %v1642_v55 = vpop.f32.mrf.mxu2  ;;  %v2467_v32 = vpop.f32.mrf.mxu3 }
 0x2ce   :  { %v1643_v58 = vadd.f32 %v1642_v55, %v1474_v43  ;;  %v1476_v28 = vpop.f32.mrf.mxu1  ;;  %v2639_v11 = vpop.f32.mrf.mxu0  ;;  %v6121_v43 = vld [vmem:[%s9816_s0 + $0x9c] sm:$0xf0]  ;;  %v9879_v55 = vld [vmem:[#allocation10_spill] sm:$0xff] }
 0x2cf   :  { %v1477_v42 = vadd.f32 %v1476_v28, %v9877_v26  ;;  %v6124_v26 = vor.u32 %v6801_v10, %v6121_v43  ;;  %v6805_v10 = vld [vmem:[%s9816_s0 + $0xb0] sm:$0xf0]  ;;  %v6804_v43 = vld [vmem:[%s9816_s0 + $0xac] sm:$0xf] }
 0x2d0   :  { %v2468_v19 = vadd.f32 %v2467_v32, %v1643_v58  ;;  %v5472_v58 = vor.u32 %v6563_v59, %v5471_v4 }
 0x2d1   :  { %2687 = vmatmul.bf16.gmra.mxu1 %v5460_v25  ;;  %4028 = vmatmul.bf16.gmra.mxu0 %v6116_v7 }
 0x2d2   :  { %3690 = vmatmul.bf16.gmra.mxu2 %v6108_v45  ;;  %3859 = vmatmul.bf16.gmra.mxu3 %v6112_v46  ;;  %v8680_v52 = vadd.f32 %v2636_v13, %v2468_v19  ;;  %v6119_v13 = vld [vmem:[%s9816_s0 + $0x90] sm:$0xf] }
 0x2d3   :  { %v6120_v19 = vor.u32 %v6802_v18, %v6119_v13  ;;  %v5483_v13 = vld [vmem:[%s9816_s0 + $0x80] sm:$0xf] }
 0x2d4   :  { %9876 = vst [vmem:[#allocation8_spill] sm:$0xff] %v8680_v52 }
 0x2d5   :  { %v1645_v30 = vpop.f32.mrf.mxu2  ;;  %v2470_v60 = vpop.f32.mrf.mxu3 }
 0x2d6   :  { %v1646_v40 = vadd.f32 %v1645_v30, %v1477_v42  ;;  %v1478_v54 = vpop.f32.mrf.mxu1  ;;  %v2641_v33 = vpop.f32.mrf.mxu0  ;;  %v6803_v30 = vld [vmem:[%s9816_s0 + $0xa0] sm:$0xf0] }
 0x2d7   :  { %v1479_v32 = vadd.f32 %v1478_v54, %v9879_v55  ;;  %v6128_v28 = vor.u32 %v6803_v30, %v6127_v8  ;;  %v6566_v8 = vld [vmem:[%s9816_s0 + $0x88] sm:$0xf0]  ;;  %v6139_v30 = vld [vmem:[%s9816_s0 + $0xb0] sm:$0xf] }
 0x2d8   :  { %v2471_v31 = vadd.f32 %v2470_v60, %v1646_v40  ;;  %v9881_v40 = vld [vmem:[#allocation12_spill] sm:$0xff] }
 0x2da   :  { %v8698_v61 = vadd.f32 %v2639_v11, %v2471_v31 }
 0x2dc   :  { %9878 = vst [vmem:[#allocation9_spill] sm:$0xff] %v8698_v61 }
 0x2dd   :  { %v1647_v25 = vpop.f32.mrf.mxu2  ;;  %v2472_v7 = vpop.f32.mrf.mxu3 }
 0x2de   :  { %v1648_v11 = vadd.f32 %v1647_v25, %v1479_v32  ;;  %v1481_v45 = vpop.f32.mrf.mxu1  ;;  %v2644_v46 = vpop.f32.mrf.mxu0  ;;  %v6133_v32 = vld [vmem:[%s9816_s0 + $0xb4] sm:$0xf0] }
 0x2df   :  { %v1482_v31 = vadd.f32 %v1481_v45, %v9881_v40  ;;  %v9883_v25 = vld [vmem:[#allocation14_spill] sm:$0xff]  ;;  %v6136_v40 = vor.u32 %v6804_v43, %v6133_v32  ;;  %v6808_v43 = vld [vmem:[%s9816_s0 + $0xc8] sm:$0xf0]  ;;  %v6807_v32 = vld [vmem:[%s9816_s0 + $0xc4] sm:$0xf] }
 0x2e0   :  { %v2473_v42 = vadd.f32 %v2472_v7, %v1648_v11  ;;  %v5484_v11 = vor.u32 %v6566_v8, %v5483_v13 }
 0x2e1   :  { %2692 = vmatmul.bf16.gmra.mxu1 %v5472_v58  ;;  %4033 = vmatmul.bf16.gmra.mxu0 %v6128_v28 }
 0x2e2   :  { %3695 = vmatmul.bf16.gmra.mxu2 %v6120_v19  ;;  %3864 = vmatmul.bf16.gmra.mxu3 %v6124_v26  ;;  %v8710_v60 = vadd.f32 %v2641_v33, %v2473_v42  ;;  %v6131_v33 = vld [vmem:[%s9816_s0 + $0xa8] sm:$0xf] }
 0x2e3   :  { %v6132_v42 = vor.u32 %v6805_v10, %v6131_v33  ;;  %v5495_v33 = vld [vmem:[%s9816_s0 + $0x98] sm:$0xf] }
 0x2e4   :  { %9880 = vst [vmem:[#allocation10_spill] sm:$0xff] %v8710_v60 }
 0x2e5   :  { %v1650_v61 = vpop.f32.mrf.mxu2  ;;  %v2475_v54 = vpop.f32.mrf.mxu3 }
 0x2e6   :  { %v1651_v55 = vadd.f32 %v1650_v61, %v1482_v31  ;;  %v1483_v52 = vpop.f32.mrf.mxu1  ;;  %v2646_v4 = vpop.f32.mrf.mxu0  ;;  %v6806_v61 = vld [vmem:[%s9816_s0 + $0xb8] sm:$0xf0] }
 0x2e7   :  { %v1484_v7 = vadd.f32 %v1483_v52, %v9883_v25  ;;  %v6140_v45 = vor.u32 %v6806_v61, %v6139_v30  ;;  %v6569_v30 = vld [vmem:[%s9816_s0 + $0xa0] sm:$0xf0]  ;;  %v6151_v61 = vld [vmem:[%s9816_s0 + $0xc8] sm:$0xf] }
 0x2e8   :  { %v2476_v59 = vadd.f32 %v2475_v54, %v1651_v55  ;;  %v9885_v55 = vld [vmem:[#allocation16_spill] sm:$0xff] }
 0x2ea   :  { %v8728_v18 = vadd.f32 %v2644_v46, %v2476_v59 }
 0x2ec   :  { %9882 = vst [vmem:[#allocation12_spill] sm:$0xff] %v8728_v18 }
 0x2ed   :  { %v1652_v58 = vpop.f32.mrf.mxu2  ;;  %v2477_v28 = vpop.f32.mrf.mxu3 }
 0x2ee   :  { %v1653_v46 = vadd.f32 %v1652_v58, %v1484_v7  ;;  %v1486_v19 = vpop.f32.mrf.mxu1  ;;  %v2649_v26 = vpop.f32.mrf.mxu0  ;;  %v6145_v7 = vld [vmem:[%s9816_s0 + $0xcc] sm:$0xf0]  ;;  %v9887_v58 = vld [vmem:[#allocation18_spill] sm:$0xff] }
 0x2ef   :  { %v1487_v59 = vadd.f32 %v1486_v19, %v9885_v55  ;;  %v6148_v55 = vor.u32 %v6807_v32, %v6145_v7  ;;  %v6811_v32 = vld [vmem:[%s9816_s0 + $0xe0] sm:$0xf0]  ;;  %v6810_v7 = vld [vmem:[%s9816_s0 + $0xdc] sm:$0xf] }
 0x2f0   :  { %v2478_v31 = vadd.f32 %v2477_v28, %v1653_v46  ;;  %v5496_v46 = vor.u32 %v6569_v30, %v5495_v33 }
 0x2f1   :  { %2697 = vmatmul.bf16.gmra.mxu1 %v5484_v11  ;;  %4038 = vmatmul.bf16.gmra.mxu0 %v6140_v45 }
 0x2f2   :  { %3700 = vmatmul.bf16.gmra.mxu2 %v6132_v42  ;;  %3869 = vmatmul.bf16.gmra.mxu3 %v6136_v40  ;;  %v8740_v54 = vadd.f32 %v2646_v4, %v2478_v31  ;;  %v6143_v4 = vld [vmem:[%s9816_s0 + $0xc0] sm:$0xf] }
 0x2f3   :  { %v6144_v31 = vor.u32 %v6808_v43, %v6143_v4  ;;  %v5507_v4 = vld [vmem:[%s9816_s0 + $0xb0] sm:$0xf] }
 0x2f4   :  { %9884 = vst [vmem:[#allocation14_spill] sm:$0xff] %v8740_v54 }
 0x2f5   :  { %v1655_v18 = vpop.f32.mrf.mxu2  ;;  %v2480_v52 = vpop.f32.mrf.mxu3 }
 0x2f6   :  { %v1656_v25 = vadd.f32 %v1655_v18, %v1487_v59  ;;  %v1488_v60 = vpop.f32.mrf.mxu1  ;;  %v2651_v13 = vpop.f32.mrf.mxu0  ;;  %v6809_v18 = vld [vmem:[%s9816_s0 + $0xd0] sm:$0xf0] }
 0x2f7   :  { %v1489_v28 = vadd.f32 %v1488_v60, %v9887_v58  ;;  %v6152_v19 = vor.u32 %v6809_v18, %v6151_v61  ;;  %v6572_v61 = vld [vmem:[%s9816_s0 + $0xb8] sm:$0xf0]  ;;  %v6163_v18 = vld [vmem:[%s9816_s0 + $0xe0] sm:$0xf] }
 0x2f8   :  { %v2481_v8 = vadd.f32 %v2480_v52, %v1656_v25  ;;  %v9889_v25 = vld [vmem:[#allocation20_spill] sm:$0xff] }
 0x2fa   :  { %v8758_v10 = vadd.f32 %v2649_v26, %v2481_v8 }
 0x2fc   :  { %9886 = vst [vmem:[#allocation16_spill] sm:$0xff] %v8758_v10 }
 0x2fd   :  { %v1657_v11 = vpop.f32.mrf.mxu2  ;;  %v2482_v45 = vpop.f32.mrf.mxu3 }
 0x2fe   :  { %v1658_v26 = vadd.f32 %v1657_v11, %v1489_v28  ;;  %v1491_v42 = vpop.f32.mrf.mxu1  ;;  %v2654_v40 = vpop.f32.mrf.mxu0  ;;  %v6157_v28 = vld [vmem:[%s9816_s0 + $0xe4] sm:$0xf0]  ;;  %v9891_v11 = vld [vmem:[#allocation22_spill] sm:$0xff] }
 0x2ff   :  { %v1492_v8 = vadd.f32 %v1491_v42, %v9889_v25  ;;  %v6160_v25 = vor.u32 %v6810_v7, %v6157_v28  ;;  %v6814_v7 = vld [vmem:[%s9816_s0 + $0xf8] sm:$0xf0]  ;;  %v6813_v28 = vld [vmem:[%s9816_s0 + $0xf4] sm:$0xf] }
 0x300   :  { %v2483_v59 = vadd.f32 %v2482_v45, %v1658_v26  ;;  %v5508_v26 = vor.u32 %v6572_v61, %v5507_v4 }
 0x301   :  { %2702 = vmatmul.bf16.gmra.mxu1 %v5496_v46  ;;  %4043 = vmatmul.bf16.gmra.mxu0 %v6152_v19 }
 0x302   :  { %3705 = vmatmul.bf16.gmra.mxu2 %v6144_v31  ;;  %3874 = vmatmul.bf16.gmra.mxu3 %v6148_v55  ;;  %v8770_v52 = vadd.f32 %v2651_v13, %v2483_v59  ;;  %v6155_v13 = vld [vmem:[%s9816_s0 + $0xd8] sm:$0xf] }
 0x303   :  { %v6156_v59 = vor.u32 %v6811_v32, %v6155_v13  ;;  %v5519_v13 = vld [vmem:[%s9816_s0 + $0xc8] sm:$0xf] }
 0x304   :  { %9888 = vst [vmem:[#allocation18_spill] sm:$0xff] %v8770_v52 }
 0x305   :  { %v1660_v10 = vpop.f32.mrf.mxu2  ;;  %v2485_v60 = vpop.f32.mrf.mxu3 }
 0x306   :  { %v1661_v58 = vadd.f32 %v1660_v10, %v1492_v8  ;;  %v1493_v54 = vpop.f32.mrf.mxu1  ;;  %v2656_v33 = vpop.f32.mrf.mxu0  ;;  %v6812_v10 = vld [vmem:[%s9816_s0 + $0xe8] sm:$0xf0] }
 0x307   :  { %v1494_v45 = vadd.f32 %v1493_v54, %v9891_v11  ;;  %v6164_v42 = vor.u32 %v6812_v10, %v6163_v18  ;;  %v6575_v18 = vld [vmem:[%s9816_s0 + $0xd0] sm:$0xf0]  ;;  %v6175_v10 = vld [vmem:[%s9816_s0 + $0xf8] sm:$0xf] }
 0x308   :  { %v2486_v30 = vadd.f32 %v2485_v60, %v1661_v58  ;;  %v9893_v58 = vld [vmem:[#allocation24_spill] sm:$0xff] }
 0x30a   :  { %v8788_v43 = vadd.f32 %v2654_v40, %v2486_v30 }
 0x30c   :  { %9890 = vst [vmem:[#allocation20_spill] sm:$0xff] %v8788_v43 }
 0x30d   :  { %v1662_v46 = vpop.f32.mrf.mxu2  ;;  %v2487_v19 = vpop.f32.mrf.mxu3 }
 0x30e   :  { %v1663_v40 = vadd.f32 %v1662_v46, %v1494_v45  ;;  %v1496_v31 = vpop.f32.mrf.mxu1  ;;  %v2659_v55 = vpop.f32.mrf.mxu0  ;;  %v6169_v45 = vld [vmem:[%s9816_s0 + $0xfc] sm:$0xf0]  ;;  %v9895_v46 = vld [vmem:[#allocation26_spill] sm:$0xff] }
 0x30f   :  { %v1497_v30 = vadd.f32 %v1496_v31, %v9893_v58  ;;  %v6172_v58 = vor.u32 %v6813_v28, %v6169_v45 }
 0x310   :  { %v2488_v8 = vadd.f32 %v2487_v19, %v1663_v40  ;;  %v5520_v40 = vor.u32 %v6575_v18, %v5519_v13  ;;  %v6910_v13 = vld [vmem:[%s9818_s3] sm:$0xff]  }
 0x311   :  { %2707 = vmatmul.bf16.gmra.mxu1 %v5508_v26  ;;  %4048 = vmatmul.bf16.gmra.mxu0 %v6164_v42  ;;  %v9897_v18 = vld [vmem:[#allocation27_spill] sm:$0xff]  ;;  %v6911_v45 = vunpack.c.l.bf16 %v6910_v13  ;;  %v6912_v35 = vunpack.c.h.bf16 %v6910_v13 }
 0x312   :  { %3710 = vmatmul.bf16.gmra.mxu2 %v6156_v59  ;;  %3879 = vmatmul.bf16.gmra.mxu3 %v6160_v25  ;;  %v8800_v60 = vadd.f32 %v2656_v33, %v2488_v8  ;;  %v6167_v33 = vld [vmem:[%s9816_s0 + $0xf0] sm:$0xf] }
 0x313   :  { %v6168_v8 = vor.u32 %v6814_v7, %v6167_v33  ;;  %v8839_v33 = vld [vmem:[%s9817_s2] ss:$0 sm:$0xff]  ;;  %v6578_v7 = vld [vmem:[%s9816_s0 + $0xe8] sm:$0xf0] }
 0x314   :  { %9892 = vst [vmem:[#allocation22_spill] sm:$0xff] %v8800_v60 }
 0x315   :  { %v1665_v43 = vpop.f32.mrf.mxu2  ;;  %v2490_v54 = vpop.f32.mrf.mxu3 }
 0x316   :  { %v1666_v11 = vadd.f32 %v1665_v43, %v1497_v30  ;;  %v1498_v52 = vpop.f32.mrf.mxu1  ;;  %v2661_v4 = vpop.f32.mrf.mxu0  ;;  %v6815_v43 = vld [vmem:[%s9816_s0 + $0x100] sm:$0xf0] }
 0x317   :  { %v1499_v19 = vadd.f32 %v1498_v52, %v9895_v46  ;;  %v6176_v31 = vor.u32 %v6815_v43, %v6175_v10 }
 0x318   :  { %v2491_v61 = vadd.f32 %v2490_v54, %v1666_v11 }
 0x31a   :  { %v8818_v32 = vadd.f32 %v2659_v55, %v2491_v61 }
 0x31c   :  { %9894 = vst [vmem:[#allocation24_spill] sm:$0xff] %v8818_v32 }
 0x31d   :  { %v1667_v26 = vpop.f32.mrf.mxu2  ;;  %v2492_v42 = vpop.f32.mrf.mxu3 }
 0x31e   :  { %v1668_v55 = vadd.f32 %v1667_v26, %v1499_v19  ;;  %v2673_v59 = vpop.f32.mrf.mxu1  ;;  %v4014_v25 = vpop.f32.mrf.mxu0  ;;  %v6179_v19 = vld [vmem:[%s9816_s0 + $0x108] sm:$0xf]  ;;  %v6187_v26 = vld [vmem:[%s9816_s0 + $0x110] sm:$0xf] }
 0x31f   :  { %v2674_v10 = vadd.f32 %v2673_v59, %v9897_v18 }
 0x320   :  { %v2493_v30 = vadd.f32 %v2492_v42, %v1668_v55  ;;  %v6817_v42 = vld [vmem:[%s9816_s0 + $0x110] sm:$0xf0] }
 0x321   :  { %2712 = vmatmul.bf16.gmra.mxu1 %v5520_v40  ;;  %4053 = vmatmul.bf16.gmra.mxu0 %v6176_v31  ;;  %v6816_v40 = vld [vmem:[%s9816_s0 + $0x10c] sm:$0xf]  ;;  %v6181_v31 = vld [vmem:[%s9816_s0 + $0x114] sm:$0xf0] }
 0x322   :  { %3715 = vmatmul.bf16.gmra.mxu2 %v6168_v8  ;;  %3884 = vmatmul.bf16.gmra.mxu3 %v6172_v58  ;;  %v8830_v54 = vadd.f32 %v2661_v4, %v2493_v30  ;;  %v5531_v4 = vld [vmem:[%s9816_s0 + $0xe0] sm:$0xf] }
 0x323   :  { %v5532_v8 = vor.u32 %v6578_v7, %v5531_v4 }
 0x324   :  { %9896 = vst [vmem:[#allocation26_spill] sm:$0xff] %v8830_v54 }
 0x325   :  { %v3676_v11 = vpop.f32.mrf.mxu2  ;;  %v3845_v61 = vpop.f32.mrf.mxu3 }
 0x326   :  { %v3846_v32 = vadd.f32 %v3845_v61, %v3676_v11  ;;  %v2675_v52 = vpop.f32.mrf.mxu1  ;;  %v4016_v46 = vpop.f32.mrf.mxu0 }
 0x327   :  { %v2676_v60 = vadd.f32 %v2675_v52, %v7840_v47  ;;  %v7037_v47 = vld [vmem:[%s9818_s3 + $0x8] sm:$0xff]  }
 0x328   :  { %v4015_v43 = vadd.f32 %v4014_v25, %v3846_v32  ;;  %v6818_v32 = vld [vmem:[%s9816_s0 + $0x118] sm:$0xf0] }
 0x329   :  { %v6188_v58 = vor.u32 %v6818_v32, %v6187_v26 }
 0x32a   :  { %v4174_v28 = vadd.f32 %v4015_v43, %v2674_v10  ;;  %v6180_v10 = vor.u32 %v6817_v42, %v6179_v19  ;;  %v6184_v43 = vor.u32 %v6816_v40, %v6181_v31  ;;  %v6915_v40 = vunpack.c.l.bf16 %v7037_v47  ;;  %v6821_v31 = vld [vmem:[%s9816_s0 + $0x130] sm:$0xf0] }
 0x32c   :  { %v4238_v55 = vadd.f32 %v8839_v33, %v4174_v28 }
 0x32d   :  { %v3678_v59 = vpop.f32.mrf.mxu2  ;;  %v3847_v25 = vpop.f32.mrf.mxu3 }
 0x32e   :  { %v4561_v30 = vadd.f32 %v6911_v45, %v4238_v55  ;;  %v3848_v11 = vadd.f32 %v3847_v25, %v3678_v59  ;;  %v2678_v61 = vpop.f32.mrf.mxu1  ;;  %v4019_v18 = vpop.f32.mrf.mxu0  ;;  %v6820_v55 = vld [vmem:[%s9816_s0 + $0x128] sm:$0xf0]  ;;  %v6819_v59 = vld [vmem:[%s9816_s0 + $0x124] sm:$0xf]  ;;  %v6193_v25 = vld [vmem:[%s9816_s0 + $0x12c] sm:$0xf0] }
 0x330   :  { %v4625_v54 = vmax.f32 %v4561_v30, 0.0  ;;  %v4017_v15 = vadd.f32 %v4016_v46, %v3848_v11  ;;  %v2679_v46 = vadd.f32 %v2678_v61, %v7858_v21  ;;  %v6199_v21 = vld [vmem:[%s9816_s0 + $0x128] sm:$0xf] }
 0x331   :  { %2717 = vmatmul.bf16.gmra.mxu1 %v5532_v8  ;;  %4058 = vmatmul.bf16.gmra.mxu0 %v6188_v58  ;;  %v6200_v61 = vor.u32 %v6821_v31, %v6199_v21 }
 0x332   :  { %4689 = vst [vmem:[%s9819_s4] sm:$0xff] %v4625_v54  ;;  %v4175_v28 = vadd.f32 %v4017_v15, %v2676_v60  ;;  %3720 = vmatmul.bf16.gmra.mxu2 %v6180_v10  ;;  %3889 = vmatmul.bf16.gmra.mxu3 %v6184_v43  ;;  %v5543_v15 = vld [vmem:[%s9816_s0 + $0xf8] sm:$0xf]  ;;  %v6581_v60 = vld [vmem:[%s9816_s0 + $0x100] sm:$0xf0] }
 0x333   :  { %v5544_v11 = vor.u32 %v6581_v60, %v5543_v15 }
 0x334   :  { %v4239_v4 = vadd.f32 %v8839_v33, %v4175_v28 }
 0x335   :  { %v3681_v7 = vpop.f32.mrf.mxu2  ;;  %v3850_v45 = vpop.f32.mrf.mxu3 }
 0x336   :  { %v4562_v19 = vadd.f32 %v6912_v35, %v4239_v4  ;;  %v3851_v26 = vadd.f32 %v3850_v45, %v3681_v7  ;;  %v2680_v32 = vpop.f32.mrf.mxu1  ;;  %v4021_v42 = vpop.f32.mrf.mxu0  ;;  %v6191_v35 = vld [vmem:[%s9816_s0 + $0x120] sm:$0xf]  ;;  %v6196_v7 = vor.u32 %v6819_v59, %v6193_v25  ;;  %v6203_v59 = vld [vmem:[%s9816_s0 + $0x138] sm:$0xf] }
 0x337   :  { %v6192_v4 = vor.u32 %v6820_v55, %v6191_v35  ;;  %v6584_v55 = vld [vmem:[%s9816_s0 + $0x118] sm:$0xf0] }
 0x338   :  { %v4626_v52 = vmax.f32 %v4562_v19, 0.0  ;;  %v4020_v54 = vadd.f32 %v4019_v18, %v3851_v26  ;;  %v2681_v19 = vadd.f32 %v2680_v32, %v7876_v0  ;;  %v7038_v0 = vld [vmem:[%s9818_s3 + $0x10] sm:$0xff]  }
 0x33a   :  { %4690 = vst [vmem:[%s9819_s4 + $0x8] sm:$0xff] %v4626_v52  ;;  %v4176_v13 = vadd.f32 %v4020_v54, %v2679_v46  ;;  %v6916_v46 = vunpack.c.h.bf16 %v7037_v47  ;;  %v5555_v47 = vld [vmem:[%s9816_s0 + $0x110] sm:$0xf] }
 0x33c   :  { %v4240_v8 = vadd.f32 %v8839_v33, %v4176_v13 }
 0x33d   :  { %v3683_v58 = vpop.f32.mrf.mxu2  ;;  %v3852_v30 = vpop.f32.mrf.mxu3 }
 0x33e   :  { %v4563_v18 = vadd.f32 %v6915_v40, %v4240_v8  ;;  %v3853_v10 = vadd.f32 %v3852_v30, %v3683_v58  ;;  %v2683_v43 = vpop.f32.mrf.mxu1  ;;  %v4024_v28 = vpop.f32.mrf.mxu0  ;;  %v6919_v8 = vunpack.c.l.bf16 %v7038_v0  ;;  %v6824_v58 = vld [vmem:[%s9816_s0 + $0x148] sm:$0xf0]  ;;  %v6823_v30 = vld [vmem:[%s9816_s0 + $0x140] sm:$0xf0] }
 0x340   :  { %v4627_v45 = vmax.f32 %v4563_v18, 0.0  ;;  %v4022_v26 = vadd.f32 %v4021_v42, %v3853_v10  ;;  %v2684_v42 = vadd.f32 %v2683_v43, %v7900_v51  ;;  %v6211_v51 = vld [vmem:[%s9816_s0 + $0x140] sm:$0xf] }
 0x341   :  { %2722 = vmatmul.bf16.gmra.mxu1 %v5544_v11  ;;  %4063 = vmatmul.bf16.gmra.mxu0 %v6200_v61  ;;  %v6822_v11 = vld [vmem:[%s9816_s0 + $0x13c] sm:$0xf]  ;;  %v6205_v61 = vld [vmem:[%s9816_s0 + $0x144] sm:$0xf0] }
 0x342   :  { %4691 = vst [vmem:[%s9819_s4 + $0x10] sm:$0xff] %v4627_v45  ;;  %v4177_v52 = vadd.f32 %v4022_v26, %v2681_v19  ;;  %3725 = vmatmul.bf16.gmra.mxu2 %v6192_v4  ;;  %3894 = vmatmul.bf16.gmra.mxu3 %v6196_v7  ;;  %v6212_v4 = vor.u32 %v6824_v58, %v6211_v51  ;;  %v6587_v51 = vld [vmem:[%s9816_s0 + $0x130] sm:$0xf0]  ;;  %v6215_v58 = vld [vmem:[%s9816_s0 + $0x150] sm:$0xf] }
 0x344   :  { %v4241_v54 = vadd.f32 %v8839_v33, %v4177_v52  ;;  %v6204_v52 = vor.u32 %v6823_v30, %v6203_v59 }
 0x345   :  { %v3686_v15 = vpop.f32.mrf.mxu2  ;;  %v3855_v60 = vpop.f32.mrf.mxu3 }
 0x346   :  { %v4564_v35 = vadd.f32 %v6916_v46, %v4241_v54  ;;  %v3856_v13 = vadd.f32 %v3855_v60, %v3686_v15  ;;  %v2685_v40 = vpop.f32.mrf.mxu1  ;;  %v4026_v21 = vpop.f32.mrf.mxu0  ;;  %v6208_v46 = vor.u32 %v6822_v11, %v6205_v61  ;;  %v6827_v61 = vld [vmem:[%s9816_s0 + $0x160] sm:$0xf0] }
 0x347   :  { %v2686_v15 = vadd.f32 %v2685_v40, %v7912_v39  ;;  %v7039_v39 = vld [vmem:[%s9818_s3 + $0x18] sm:$0xff]  }
 0x348   :  { %v4628_v32 = vmax.f32 %v4564_v35, 0.0  ;;  %v4025_v31 = vadd.f32 %v4024_v28, %v3856_v13  ;;  %v5556_v28 = vor.u32 %v6584_v55, %v5555_v47  ;;  %v6920_v13 = vunpack.c.h.bf16 %v7038_v0  ;;  %v5567_v0 = vld [vmem:[%s9816_s0 + $0x128] sm:$0xf] }
 0x349   :  { %v6923_v11 = vunpack.c.l.bf16 %v7039_v39 }
 0x34a   :  { %4692 = vst [vmem:[%s9819_s4 + $0x18] sm:$0xff] %v4628_v32  ;;  %v4178_v25 = vadd.f32 %v4025_v31, %v2684_v42 }
 0x34c   :  { %v4242_v18 = vadd.f32 %v8839_v33, %v4178_v25 }
 0x34d   :  { %v3688_v10 = vpop.f32.mrf.mxu2  ;;  %v3857_v43 = vpop.f32.mrf.mxu3 }
 0x34e   :  { %v4565_v7 = vadd.f32 %v6919_v8, %v4242_v18  ;;  %v3858_v45 = vadd.f32 %v3857_v43, %v3688_v10  ;;  %v2688_v19 = vpop.f32.mrf.mxu1  ;;  %v4029_v26 = vpop.f32.mrf.mxu0  ;;  %v6826_v18 = vld [vmem:[%s9816_s0 + $0x158] sm:$0xf0]  ;;  %v6825_v10 = vld [vmem:[%s9816_s0 + $0x154] sm:$0xf]  ;;  %v6217_v43 = vld [vmem:[%s9816_s0 + $0x15c] sm:$0xf0] }
 0x350   :  { %v4629_v54 = vmax.f32 %v4565_v7, 0.0  ;;  %v4027_v60 = vadd.f32 %v4026_v21, %v3858_v45  ;;  %v2689_v21 = vadd.f32 %v2688_v19, %v7930_v53  ;;  %v6223_v53 = vld [vmem:[%s9816_s0 + $0x158] sm:$0xf]  ;;  %v5568_v45 = vor.u32 %v6587_v51, %v5567_v0 }
 0x351   :  { %2727 = vmatmul.bf16.gmra.mxu1 %v5556_v28  ;;  %4068 = vmatmul.bf16.gmra.mxu0 %v6212_v4  ;;  %v6224_v19 = vor.u32 %v6827_v61, %v6223_v53 }
 0x352   :  { %4693 = vst [vmem:[%s9819_s4 + $0x20] sm:$0xff] %v4629_v54  ;;  %v4179_v35 = vadd.f32 %v4027_v60, %v2686_v15  ;;  %3730 = vmatmul.bf16.gmra.mxu2 %v6204_v52  ;;  %3899 = vmatmul.bf16.gmra.mxu3 %v6208_v46  ;;  %v6216_v15 = vor.u32 %v6826_v18, %v6215_v58  ;;  %v6830_v18 = vld [vmem:[%s9816_s0 + $0x178] sm:$0xf0] }
 0x353   :  { %v6220_v60 = vor.u32 %v6825_v10, %v6217_v43  ;;  %v6829_v10 = vld [vmem:[%s9816_s0 + $0x170] sm:$0xf0]  ;;  %v6828_v43 = vld [vmem:[%s9816_s0 + $0x16c] sm:$0xf] }
 0x354   :  { %v4243_v32 = vadd.f32 %v8839_v33, %v4179_v35 }
 0x355   :  { %v3691_v42 = vpop.f32.mrf.mxu2  ;;  %v3860_v31 = vpop.f32.mrf.mxu3 }
 0x356   :  { %v4566_v47 = vadd.f32 %v6920_v13, %v4243_v32  ;;  %v3861_v55 = vadd.f32 %v3860_v31, %v3691_v42  ;;  %v2690_v59 = vpop.f32.mrf.mxu1  ;;  %v4031_v25 = vpop.f32.mrf.mxu0  ;;  %v6924_v31 = vunpack.c.h.bf16 %v7039_v39  ;;  %v5579_v39 = vld [vmem:[%s9816_s0 + $0x140] sm:$0xf] }
 0x357   :  { %v2691_v13 = vadd.f32 %v2690_v59, %v7942_v16  ;;  %v7040_v16 = vld [vmem:[%s9818_s3 + $0x20] sm:$0xff]  }
 0x358   :  { %v4630_v40 = vmax.f32 %v4566_v47, 0.0  ;;  %v4030_v8 = vadd.f32 %v4029_v26, %v3861_v55  ;;  %v6927_v61 = vunpack.c.l.bf16 %v7040_v16 }
 0x35a   :  { %4694 = vst [vmem:[%s9819_s4 + $0x28] sm:$0xff] %v4630_v40  ;;  %v4180_v30 = vadd.f32 %v4030_v8, %v2689_v21 }
 0x35c   :  { %v4244_v28 = vadd.f32 %v8839_v33, %v4180_v30  ;;  %v6590_v30 = vld [vmem:[%s9816_s0 + $0x148] sm:$0xf0] }
 0x35d   :  { %v3693_v4 = vpop.f32.mrf.mxu2  ;;  %v3862_v7 = vpop.f32.mrf.mxu3 }
 0x35e   :  { %v4567_v26 = vadd.f32 %v6923_v11, %v4244_v28  ;;  %v3863_v52 = vadd.f32 %v3862_v7, %v3693_v4  ;;  %v2693_v46 = vpop.f32.mrf.mxu1  ;;  %v4034_v54 = vpop.f32.mrf.mxu0  ;;  %v6227_v11 = vld [vmem:[%s9816_s0 + $0x168] sm:$0xf]  ;;  %v6229_v28 = vld [vmem:[%s9816_s0 + $0x174] sm:$0xf0] }
 0x360   :  { %v4631_v35 = vmax.f32 %v4567_v26, 0.0  ;;  %v4032_v32 = vadd.f32 %v4031_v25, %v3863_v52  ;;  %v2694_v25 = vadd.f32 %v2693_v46, %v7960_v1  ;;  %v6235_v1 = vld [vmem:[%s9816_s0 + $0x170] sm:$0xf] }
 0x361   :  { %2732 = vmatmul.bf16.gmra.mxu1 %v5568_v45  ;;  %4073 = vmatmul.bf16.gmra.mxu0 %v6224_v19  ;;  %v5580_v19 = vor.u32 %v6590_v30, %v5579_v39  ;;  %v6236_v26 = vor.u32 %v6830_v18, %v6235_v1  ;;  %v6593_v30 = vld [vmem:[%s9816_s0 + $0x160] sm:$0xf0]  ;;  %v6833_v1 = vld [vmem:[%s9816_s0 + $0x190] sm:$0xf0]  ;;  %v6832_v18 = vld [vmem:[%s9816_s0 + $0x188] sm:$0xf0] }
 0x362   :  { %4695 = vst [vmem:[%s9819_s4 + $0x30] sm:$0xff] %v4631_v35  ;;  %v4181_v42 = vadd.f32 %v4032_v32, %v2691_v13  ;;  %3735 = vmatmul.bf16.gmra.mxu2 %v6216_v15  ;;  %3904 = vmatmul.bf16.gmra.mxu3 %v6220_v60  ;;  %v6228_v60 = vor.u32 %v6829_v10, %v6227_v11  ;;  %v6239_v11 = vld [vmem:[%s9816_s0 + $0x180] sm:$0xf]  ;;  %v6831_v10 = vld [vmem:[%s9816_s0 + $0x184] sm:$0xf] }
 0x363   :  { %v6232_v35 = vor.u32 %v6828_v43, %v6229_v28  ;;  %v6241_v43 = vld [vmem:[%s9816_s0 + $0x18c] sm:$0xf0] }
 0x364   :  { %v4245_v47 = vadd.f32 %v8839_v33, %v4181_v42 }
 0x365   :  { %v3696_v55 = vpop.f32.mrf.mxu2  ;;  %v3865_v40 = vpop.f32.mrf.mxu3 }
 0x366   :  { %v4568_v21 = vadd.f32 %v6924_v31, %v4245_v47  ;;  %v3866_v8 = vadd.f32 %v3865_v40, %v3696_v55  ;;  %v2695_v0 = vpop.f32.mrf.mxu1  ;;  %v4036_v51 = vpop.f32.mrf.mxu0  ;;  %v6928_v47 = vunpack.c.h.bf16 %v7040_v16  ;;  %v5591_v16 = vld [vmem:[%s9816_s0 + $0x158] sm:$0xf] }
 0x367   :  { %v2696_v32 = vadd.f32 %v2695_v0, %v7972_v22  ;;  %v7041_v22 = vld [vmem:[%s9818_s3 + $0x28] sm:$0xff]  }
 0x368   :  { %v4632_v59 = vmax.f32 %v4568_v21, 0.0  ;;  %v4035_v58 = vadd.f32 %v4034_v54, %v3866_v8 }
 0x36a   :  { %4696 = vst [vmem:[%s9819_s4 + $0x38] sm:$0xff] %v4632_v59  ;;  %v4182_v53 = vadd.f32 %v4035_v58, %v2694_v25 }
 0x36c   :  { %v4246_v4 = vadd.f32 %v8839_v33, %v4182_v53 }
 0x36d   :  { %v3698_v7 = vpop.f32.mrf.mxu2  ;;  %v3867_v45 = vpop.f32.mrf.mxu3 }
 0x36e   :  { %v4569_v52 = vadd.f32 %v6927_v61, %v4246_v4  ;;  %v3868_v46 = vadd.f32 %v3867_v45, %v3698_v7  ;;  %v2698_v54 = vpop.f32.mrf.mxu1  ;;  %v4039_v15 = vpop.f32.mrf.mxu0  ;;  %v6931_v61 = vunpack.c.l.bf16 %v7041_v22  ;;  %v5592_v45 = vor.u32 %v6593_v30, %v5591_v16  ;;  %v6251_v16 = vld [vmem:[%s9816_s0 + $0x198] sm:$0xf] }
 0x370   :  { %v4633_v13 = vmax.f32 %v4569_v52, 0.0  ;;  %v4037_v42 = vadd.f32 %v4036_v51, %v3868_v46  ;;  %v2699_v51 = vadd.f32 %v2698_v54, %v7990_v17  ;;  %v6247_v17 = vld [vmem:[%s9816_s0 + $0x188] sm:$0xf] }
 0x371   :  { %2737 = vmatmul.bf16.gmra.mxu1 %v5580_v19  ;;  %4078 = vmatmul.bf16.gmra.mxu0 %v6236_v26  ;;  %v6248_v19 = vor.u32 %v6833_v1, %v6247_v17  ;;  %v6834_v17 = vld [vmem:[%s9816_s0 + $0x19c] sm:$0xf]  ;;  %v6253_v1 = vld [vmem:[%s9816_s0 + $0x1a4] sm:$0xf0] }
 0x372   :  { %4697 = vst [vmem:[%s9819_s4 + $0x40] sm:$0xff] %v4633_v13  ;;  %v4183_v31 = vadd.f32 %v4037_v42, %v2696_v32  ;;  %3740 = vmatmul.bf16.gmra.mxu2 %v6228_v60  ;;  %3909 = vmatmul.bf16.gmra.mxu3 %v6232_v35  ;;  %v6244_v60 = vor.u32 %v6831_v10, %v6241_v43 }
 0x374   :  { %v4247_v55 = vadd.f32 %v8839_v33, %v4183_v31  ;;  %v6932_v31 = vunpack.c.h.bf16 %v7041_v22  ;;  %v5603_v22 = vld [vmem:[%s9816_s0 + $0x170] sm:$0xf] }
 0x375   :  { %v3701_v40 = vpop.f32.mrf.mxu2  ;;  %v3870_v21 = vpop.f32.mrf.mxu3 }
 0x376   :  { %v4570_v8 = vadd.f32 %v6928_v47, %v4247_v55  ;;  %v3871_v59 = vadd.f32 %v3870_v21, %v3701_v40  ;;  %v2700_v25 = vpop.f32.mrf.mxu1  ;;  %v4041_v58 = vpop.f32.mrf.mxu0 }
 0x377   :  { %v2701_v13 = vadd.f32 %v2700_v25, %v8008_v2  ;;  %v7042_v2 = vld [vmem:[%s9818_s3 + $0x30] sm:$0xff]  }
 0x378   :  { %v4634_v0 = vmax.f32 %v4570_v8, 0.0  ;;  %v4040_v39 = vadd.f32 %v4039_v15, %v3871_v59  ;;  %v6240_v15 = vor.u32 %v6832_v18, %v6239_v11  ;;  %v6935_v11 = vunpack.c.l.bf16 %v7042_v2 }
 0x37a   :  { %4698 = vst [vmem:[%s9819_s4 + $0x48] sm:$0xff] %v4634_v0  ;;  %v4184_v53 = vadd.f32 %v4040_v39, %v2699_v51  ;;  %v6596_v39 = vld [vmem:[%s9816_s0 + $0x178] sm:$0xf0] }
 0x37c   :  { %v4248_v28 = vadd.f32 %v8839_v33, %v4184_v53  ;;  %v6836_v53 = vld [vmem:[%s9816_s0 + $0x1a8] sm:$0xf0] }
 0x37d   :  { %v3703_v4 = vpop.f32.mrf.mxu2  ;;  %v3872_v7 = vpop.f32.mrf.mxu3 }
 0x37e   :  { %v4571_v26 = vadd.f32 %v6931_v61, %v4248_v28  ;;  %v3873_v52 = vadd.f32 %v3872_v7, %v3703_v4  ;;  %v2703_v46 = vpop.f32.mrf.mxu1  ;;  %v4044_v54 = vpop.f32.mrf.mxu0  ;;  %v6835_v61 = vld [vmem:[%s9816_s0 + $0x1a0] sm:$0xf0]  ;;  %v5604_v28 = vor.u32 %v6596_v39, %v5603_v22  ;;  %v6839_v39 = vld [vmem:[%s9816_s0 + $0x1f0] sm:$0xf0] }
 0x380   :  { %v4635_v35 = vmax.f32 %v4571_v26, 0.0  ;;  %v4042_v32 = vadd.f32 %v4041_v58, %v3873_v52  ;;  %v2704_v58 = vadd.f32 %v2703_v46, %v8032_v36  ;;  %v6259_v36 = vld [vmem:[%s9816_s0 + $0x1a0] sm:$0xf]  ;;  %v6252_v52 = vor.u32 %v6835_v61, %v6251_v16  ;;  %v6838_v16 = vld [vmem:[%s9816_s0 + $0x1e8] sm:$0xf0] }
 0x381   :  { %2742 = vmatmul.bf16.gmra.mxu1 %v5592_v45  ;;  %4083 = vmatmul.bf16.gmra.mxu0 %v6248_v19  ;;  %v6260_v4 = vor.u32 %v6836_v53, %v6259_v36  ;;  %v6256_v46 = vor.u32 %v6834_v17, %v6253_v1 }
 0x382   :  { %4699 = vst [vmem:[%s9819_s4 + $0x50] sm:$0xff] %v4635_v35  ;;  %v4185_v42 = vadd.f32 %v4042_v32, %v2701_v13  ;;  %3745 = vmatmul.bf16.gmra.mxu2 %v6240_v15  ;;  %3914 = vmatmul.bf16.gmra.mxu3 %v6244_v60  ;;  %v6936_v13 = vunpack.c.h.bf16 %v7042_v2  ;;  %v5615_v2 = vld [vmem:[%s9816_s0 + $0x1b8] sm:$0xf] }
 0x384   :  { %v4249_v47 = vadd.f32 %v8839_v33, %v4185_v42 }
 0x385   :  { %v3706_v55 = vpop.f32.mrf.mxu2  ;;  %v3875_v40 = vpop.f32.mrf.mxu3 }
 0x386   :  { %v4572_v21 = vadd.f32 %v6932_v31, %v4249_v47  ;;  %v3876_v8 = vadd.f32 %v3875_v40, %v3706_v55  ;;  %v2705_v59 = vpop.f32.mrf.mxu1  ;;  %v4046_v0 = vpop.f32.mrf.mxu0 }
 0x387   :  { %v2706_v15 = vadd.f32 %v2705_v59, %v8044_v62  ;;  %v7043_v62 = vld [vmem:[%s9818_s3 + $0x38] sm:$0xff]  }
 0x388   :  { %v4636_v25 = vmax.f32 %v4572_v21, 0.0  ;;  %v4045_v51 = vadd.f32 %v4044_v54, %v3876_v8  ;;  %v6939_v22 = vunpack.c.l.bf16 %v7043_v62 }
 0x38a   :  { %4700 = vst [vmem:[%s9819_s4 + $0x58] sm:$0xff] %v4636_v25  ;;  %v4186_v30 = vadd.f32 %v4045_v51, %v2704_v58  ;;  %v6599_v25 = vld [vmem:[%s9816_s0 + $0x1c0] sm:$0xf0]  ;;  %v6263_v58 = vld [vmem:[%s9816_s0 + $0x1e0] sm:$0xf] }
 0x38b   :  { %v5616_v17 = vor.u32 %v6599_v25, %v5615_v2  ;;  %v6841_v2 = vld [vmem:[%s9816_s0 + $0x200] sm:$0xf0]  ;;  %v6840_v25 = vld [vmem:[%s9816_s0 + $0x1fc] sm:$0xf] }
 0x38c   :  { %v4250_v18 = vadd.f32 %v8839_v33, %v4186_v30  ;;  %v6837_v30 = vld [vmem:[%s9816_s0 + $0x1e4] sm:$0xf] }
 0x38d   :  { %v3708_v10 = vpop.f32.mrf.mxu2  ;;  %v3877_v43 = vpop.f32.mrf.mxu3 }
 0x38e   :  { %v4573_v7 = vadd.f32 %v6935_v11, %v4250_v18  ;;  %v3878_v45 = vadd.f32 %v3877_v43, %v3708_v10  ;;  %v2708_v19 = vpop.f32.mrf.mxu1  ;;  %v4049_v26 = vpop.f32.mrf.mxu0  ;;  %v6265_v11 = vld [vmem:[%s9816_s0 + $0x1ec] sm:$0xf0] }
 0x38f   :  { %v2709_v59 = vadd.f32 %v2708_v19, %v8062_v12  ;;  %v6271_v12 = vld [vmem:[%s9816_s0 + $0x1e8] sm:$0xf] }
 0x390   :  { %v4637_v54 = vmax.f32 %v4573_v7, 0.0  ;;  %v4047_v60 = vadd.f32 %v4046_v0, %v3878_v45  ;;  %v6272_v1 = vor.u32 %v6839_v39, %v6271_v12  ;;  %v6268_v7 = vor.u32 %v6837_v30, %v6265_v11 }
 0x391   :  { %2747 = vmatmul.bf16.gmra.mxu1 %v5604_v28  ;;  %4088 = vmatmul.bf16.gmra.mxu0 %v6260_v4  ;;  %v6264_v4 = vor.u32 %v6838_v16, %v6263_v58  ;;  %v6277_v58 = vld [vmem:[%s9816_s0 + $0x204] sm:$0xf0] }
 0x392   :  { %4701 = vst [vmem:[%s9819_s4 + $0x60] sm:$0xff] %v4637_v54  ;;  %v4187_v35 = vadd.f32 %v4047_v60, %v2706_v15  ;;  %3750 = vmatmul.bf16.gmra.mxu2 %v6252_v52  ;;  %3919 = vmatmul.bf16.gmra.mxu3 %v6256_v46  ;;  %v6940_v46 = vunpack.c.h.bf16 %v7043_v62  ;;  %v6275_v62 = vld [vmem:[%s9816_s0 + $0x1f8] sm:$0xf] }
 0x394   :  { %v4251_v32 = vadd.f32 %v8839_v33, %v4187_v35 }
 0x395   :  { %v3711_v42 = vpop.f32.mrf.mxu2  ;;  %v3880_v31 = vpop.f32.mrf.mxu3 }
 0x396   :  { %v4574_v47 = vadd.f32 %v6936_v13, %v4251_v32  ;;  %v3881_v55 = vadd.f32 %v3880_v31, %v3711_v42  ;;  %v2710_v40 = vpop.f32.mrf.mxu1  ;;  %v4051_v21 = vpop.f32.mrf.mxu0 }
 0x397   :  { %v2711_v19 = vadd.f32 %v2710_v40, %v8074_v50  ;;  %v7044_v50 = vld [vmem:[%s9818_s3 + $0x40] sm:$0xff]   ;;  %v5627_v40 = vld [vmem:[%s9816_s0 + $0x1d0] sm:$0xf] }
 0x398   :  { %v4638_v8 = vmax.f32 %v4574_v47, 0.0  ;;  %v4050_v0 = vadd.f32 %v4049_v26, %v3881_v55 }
 0x39a   :  { %4702 = vst [vmem:[%s9819_s4 + $0x68] sm:$0xff] %v4638_v8  ;;  %v4188_v51 = vadd.f32 %v4050_v0, %v2709_v59  ;;  %v6943_v59 = vunpack.c.l.bf16 %v7044_v50  ;;  %v6842_v0 = vld [vmem:[%s9816_s0 + $0x208] sm:$0xf0] }
 0x39c   :  { %v4252_v36 = vadd.f32 %v8839_v33, %v4188_v51 }
 0x39d   :  { %v3713_v53 = vpop.f32.mrf.mxu2  ;;  %v3882_v61 = vpop.f32.mrf.mxu3 }
 0x39e   :  { %v4575_v18 = vadd.f32 %v6939_v22, %v4252_v36  ;;  %v3883_v10 = vadd.f32 %v3882_v61, %v3713_v53  ;;  %v2713_v43 = vpop.f32.mrf.mxu1  ;;  %v4054_v28 = vpop.f32.mrf.mxu0  ;;  %v6276_v61 = vor.u32 %v6841_v2, %v6275_v62 }
 0x39f   :  { %v2714_v47 = vadd.f32 %v2713_v43, %v8092_v37  ;;  %v6283_v37 = vld [vmem:[%s9816_s0 + $0x200] sm:$0xf] }
 0x3a0   :  { %v4639_v45 = vmax.f32 %v4575_v18, 0.0  ;;  %v4052_v26 = vadd.f32 %v4051_v21, %v3883_v10  ;;  %v6602_v21 = vld [vmem:[%s9816_s0 + $0x1d8] sm:$0xf0]  ;;  %v6284_v16 = vor.u32 %v6842_v0, %v6283_v37 }
 0x3a1   :  { %2752 = vmatmul.bf16.gmra.mxu1 %v5616_v17  ;;  %4093 = vmatmul.bf16.gmra.mxu0 %v6272_v1  ;;  %v5628_v39 = vor.u32 %v6602_v21, %v5627_v40  ;;  %v6280_v17 = vor.u32 %v6840_v25, %v6277_v58  ;;  %v6289_v40 = vld [vmem:[%s9816_s0 + $0x21c] sm:$0xf0] }
 0x3a2   :  { %4703 = vst [vmem:[%s9819_s4 + $0x70] sm:$0xff] %v4639_v45  ;;  %v4189_v52 = vadd.f32 %v4052_v26, %v2711_v19  ;;  %3755 = vmatmul.bf16.gmra.mxu2 %v6264_v4  ;;  %3924 = vmatmul.bf16.gmra.mxu3 %v6268_v7 }
 0x3a4   :  { %v4253_v54 = vadd.f32 %v8839_v33, %v4189_v52 }
 0x3a5   :  { %v3716_v15 = vpop.f32.mrf.mxu2  ;;  %v3885_v60 = vpop.f32.mrf.mxu3 }
 0x3a6   :  { %v4576_v35 = vadd.f32 %v6940_v46, %v4253_v54  ;;  %v3886_v13 = vadd.f32 %v3885_v60, %v3716_v15  ;;  %v2715_v32 = vpop.f32.mrf.mxu1  ;;  %v4056_v42 = vpop.f32.mrf.mxu0 }
 0x3a7   :  { %v2716_v18 = vadd.f32 %v2715_v32, %v8104_v56  ;;  %v7045_v56 = vld [vmem:[%s9818_s3 + $0x48] sm:$0xff]   ;;  %v6287_v32 = vld [vmem:[%s9816_s0 + $0x210] sm:$0xf] }
 0x3a8   :  { %v4640_v31 = vmax.f32 %v4576_v35, 0.0  ;;  %v4055_v55 = vadd.f32 %v4054_v28, %v3886_v13  ;;  %v6944_v28 = vunpack.c.h.bf16 %v7044_v50  ;;  %v5639_v35 = vld [vmem:[%s9816_s0 + $0x1e8] sm:$0xf]  ;;  %v6605_v13 = vld [vmem:[%s9816_s0 + $0x1f0] sm:$0xf0]  ;;  %v6947_v50 = vunpack.c.l.bf16 %v7045_v56 }
 0x3aa   :  { %4704 = vst [vmem:[%s9819_s4 + $0x78] sm:$0xff] %v4640_v31  ;;  %v4190_v8 = vadd.f32 %v4055_v55, %v2714_v47  ;;  %v6845_v31 = vld [vmem:[%s9816_s0 + $0x220] sm:$0xf0]  ;;  %v6844_v47 = vld [vmem:[%s9816_s0 + $0x218] sm:$0xf0] }
 0x3ab   :  { %v6843_v55 = vld [vmem:[%s9816_s0 + $0x214] sm:$0xf] }
 0x3ac   :  { %v4254_v51 = vadd.f32 %v8839_v33, %v4190_v8 }
 0x3ad   :  { %v3718_v22 = vpop.f32.mrf.mxu2  ;;  %v3887_v12 = vpop.f32.mrf.mxu3 }
 0x3ae   :  { %v4577_v30 = vadd.f32 %v6943_v59, %v4254_v51  ;;  %v3888_v11 = vadd.f32 %v3887_v12, %v3718_v22  ;;  %v2718_v36 = vpop.f32.mrf.mxu1  ;;  %v4059_v53 = vpop.f32.mrf.mxu0  ;;  %v5640_v59 = vor.u32 %v6605_v13, %v5639_v35  ;;  %v6288_v51 = vor.u32 %v6844_v47, %v6287_v32 }
 0x3af   :  { %v2719_v15 = vadd.f32 %v2718_v36, %v8122_v48  ;;  %v6295_v48 = vld [vmem:[%s9816_s0 + $0x218] sm:$0xf]  ;;  %v6292_v22 = vor.u32 %v6843_v55, %v6289_v40 }
 0x3b0   :  { %v4641_v1 = vmax.f32 %v4577_v30, 0.0  ;;  %v4057_v10 = vadd.f32 %v4056_v42, %v3888_v11  ;;  %v6296_v37 = vor.u32 %v6845_v31, %v6295_v48  ;;  %v6948_v11 = vunpack.c.h.bf16 %v7045_v56  ;;  %v6847_v56 = vld [vmem:[%s9816_s0 + $0x230] sm:$0xf0] }
 0x3b1   :  { %2757 = vmatmul.bf16.gmra.mxu1 %v5628_v39  ;;  %4098 = vmatmul.bf16.gmra.mxu0 %v6284_v16 }
 0x3b2   :  { %4705 = vst [vmem:[%s9819_s4 + $0x80] sm:$0xff] %v4641_v1  ;;  %v4191_v43 = vadd.f32 %v4057_v10, %v2716_v18  ;;  %3760 = vmatmul.bf16.gmra.mxu2 %v6276_v61  ;;  %3929 = vmatmul.bf16.gmra.mxu3 %v6280_v17 }
 0x3b4   :  { %v4255_v4 = vadd.f32 %v8839_v33, %v4191_v43 }
 0x3b5   :  { %v3721_v7 = vpop.f32.mrf.mxu2  ;;  %v3890_v45 = vpop.f32.mrf.mxu3 }
 0x3b6   :  { %v4578_v19 = vadd.f32 %v6944_v28, %v4255_v4  ;;  %v3891_v26 = vadd.f32 %v3890_v45, %v3721_v7  ;;  %v2720_v52 = vpop.f32.mrf.mxu1  ;;  %v4061_v46 = vpop.f32.mrf.mxu0  ;;  %v5651_v7 = vld [vmem:[%s9816_s0 + $0x200] sm:$0xf]  ;;  %v6608_v45 = vld [vmem:[%s9816_s0 + $0x208] sm:$0xf0] }
 0x3b7   :  { %v2721_v39 = vadd.f32 %v2720_v52, %v8140_v29  ;;  %v7046_v29 = vld [vmem:[%s9818_s3 + $0x50] sm:$0xff]   ;;  %v5652_v32 = vor.u32 %v6608_v45, %v5651_v7 }
 0x3b8   :  { %v4642_v54 = vmax.f32 %v4578_v19, 0.0  ;;  %v4060_v60 = vadd.f32 %v4059_v53, %v3891_v26  ;;  %v6299_v19 = vld [vmem:[%s9816_s0 + $0x228] sm:$0xf]  ;;  %v6951_v52 = vunpack.c.l.bf16 %v7046_v29 }
 0x3b9   :  { %v6300_v55 = vor.u32 %v6847_v56, %v6299_v19 }
 0x3ba   :  { %4706 = vst [vmem:[%s9819_s4 + $0x88] sm:$0xff] %v4642_v54  ;;  %v4192_v42 = vadd.f32 %v4060_v60, %v2719_v15  ;;  %v6846_v54 = vld [vmem:[%s9816_s0 + $0x22c] sm:$0xf]  ;;  %v6301_v15 = vld [vmem:[%s9816_s0 + $0x234] sm:$0xf0] }
 0x3bb   :  { %v6304_v40 = vor.u32 %v6846_v54, %v6301_v15 }
 0x3bc   :  { %v4256_v21 = vadd.f32 %v8839_v33, %v4192_v42 }
 0x3bd   :  { %v3723_v62 = vpop.f32.mrf.mxu2  ;;  %v3892_v8 = vpop.f32.mrf.mxu3 }
 0x3be   :  { %v4579_v0 = vadd.f32 %v6947_v50, %v4256_v21  ;;  %v3893_v2 = vadd.f32 %v3892_v8, %v3723_v62  ;;  %v2723_v25 = vpop.f32.mrf.mxu1  ;;  %v4064_v58 = vpop.f32.mrf.mxu0 }
 0x3bf   :  { %v2724_v28 = vadd.f32 %v2723_v25, %v8164_v34  ;;  %v6307_v34 = vld [vmem:[%s9816_s0 + $0x230] sm:$0xf] }
 0x3c0   :  { %v4643_v12 = vmax.f32 %v4579_v0, 0.0  ;;  %v4062_v16 = vadd.f32 %v4061_v46, %v3893_v2  ;;  %v6848_v46 = vld [vmem:[%s9816_s0 + $0x238] sm:$0xf0] }
 0x3c1   :  { %2762 = vmatmul.bf16.gmra.mxu1 %v5640_v59  ;;  %4103 = vmatmul.bf16.gmra.mxu0 %v6296_v37  ;;  %v6308_v42 = vor.u32 %v6848_v46, %v6307_v34  ;;  %v6952_v37 = vunpack.c.h.bf16 %v7046_v29  ;;  %v6313_v29 = vld [vmem:[%s9816_s0 + $0x24c] sm:$0xf0] }
 0x3c2   :  { %4707 = vst [vmem:[%s9819_s4 + $0x90] sm:$0xff] %v4643_v12  ;;  %v4193_v30 = vadd.f32 %v4062_v16, %v2721_v39  ;;  %3765 = vmatmul.bf16.gmra.mxu2 %v6288_v51  ;;  %3934 = vmatmul.bf16.gmra.mxu3 %v6292_v22 }
 0x3c4   :  { %v4257_v36 = vadd.f32 %v8839_v33, %v4193_v30 }
 0x3c5   :  { %v3726_v53 = vpop.f32.mrf.mxu2  ;;  %v3895_v61 = vpop.f32.mrf.mxu3 }
 0x3c6   :  { %v4580_v17 = vadd.f32 %v6948_v11, %v4257_v36  ;;  %v3896_v1 = vadd.f32 %v3895_v61, %v3726_v53  ;;  %v2725_v18 = vpop.f32.mrf.mxu1  ;;  %v4066_v10 = vpop.f32.mrf.mxu0  ;;  %v5663_v11 = vld [vmem:[%s9816_s0 + $0x218] sm:$0xf]  ;;  %v6611_v36 = vld [vmem:[%s9816_s0 + $0x220] sm:$0xf0]  ;;  %v6311_v53 = vld [vmem:[%s9816_s0 + $0x240] sm:$0xf] }
 0x3c7   :  { %v2726_v62 = vadd.f32 %v2725_v18, %v8176_v14  ;;  %v7047_v14 = vld [vmem:[%s9818_s3 + $0x58] sm:$0xff]   ;;  %v6850_v18 = vld [vmem:[%s9816_s0 + $0x248] sm:$0xf0]  ;;  %v5664_v7 = vor.u32 %v6611_v36, %v5663_v11 }
 0x3c8   :  { %v4644_v43 = vmax.f32 %v4580_v17, 0.0  ;;  %v4065_v4 = vadd.f32 %v4064_v58, %v3896_v1  ;;  %v6955_v17 = vunpack.c.l.bf16 %v7047_v14  ;;  %v6851_v1 = vld [vmem:[%s9816_s0 + $0x250] sm:$0xf0]  ;;  %v6312_v46 = vor.u32 %v6850_v18, %v6311_v53 }
 0x3ca   :  { %4708 = vst [vmem:[%s9819_s4 + $0x98] sm:$0xff] %v4644_v43  ;;  %v4194_v26 = vadd.f32 %v4065_v4, %v2724_v28 }
 0x3cc   :  { %v4258_v60 = vadd.f32 %v8839_v33, %v4194_v26 }
 0x3cd   :  { %v3728_v35 = vpop.f32.mrf.mxu2  ;;  %v3897_v13 = vpop.f32.mrf.mxu3 }
 0x3ce   :  { %v4581_v50 = vadd.f32 %v6951_v52, %v4258_v60  ;;  %v3898_v48 = vadd.f32 %v3897_v13, %v3728_v35  ;;  %v2728_v31 = vpop.f32.mrf.mxu1  ;;  %v4069_v47 = vpop.f32.mrf.mxu0  ;;  %v6956_v13 = vunpack.c.h.bf16 %v7047_v14 }
 0x3cf   :  { %v2729_v16 = vadd.f32 %v2728_v31, %v8194_v9  ;;  %v6319_v9 = vld [vmem:[%s9816_s0 + $0x248] sm:$0xf] }
 0x3d0   :  { %v4645_v21 = vmax.f32 %v4581_v50, 0.0  ;;  %v4067_v8 = vadd.f32 %v4066_v10, %v3898_v48  ;;  %v6849_v10 = vld [vmem:[%s9816_s0 + $0x244] sm:$0xf]  ;;  %v6320_v45 = vor.u32 %v6851_v1, %v6319_v9 }
 0x3d1   :  { %2767 = vmatmul.bf16.gmra.mxu1 %v5652_v32  ;;  %4108 = vmatmul.bf16.gmra.mxu0 %v6308_v42  ;;  %v6316_v56 = vor.u32 %v6849_v10, %v6313_v29 }
 0x3d2   :  { %4709 = vst [vmem:[%s9819_s4 + $0xa0] sm:$0xff] %v4645_v21  ;;  %v4195_v59 = vadd.f32 %v4067_v8, %v2726_v62  ;;  %3770 = vmatmul.bf16.gmra.mxu2 %v6300_v55  ;;  %3939 = vmatmul.bf16.gmra.mxu3 %v6304_v40  ;;  %v5675_v8 = vld [vmem:[%s9816_s0 + $0x230] sm:$0xf] }
 0x3d4   :  { %v4259_v0 = vadd.f32 %v8839_v33, %v4195_v59  ;;  %v6323_v59 = vld [vmem:[%s9816_s0 + $0x258] sm:$0xf] }
 0x3d5   :  { %v3731_v2 = vpop.f32.mrf.mxu2  ;;  %v3900_v25 = vpop.f32.mrf.mxu3 }
 0x3d6   :  { %v4582_v58 = vadd.f32 %v6952_v37, %v4259_v0  ;;  %v3901_v51 = vadd.f32 %v3900_v25, %v3731_v2  ;;  %v2730_v22 = vpop.f32.mrf.mxu1  ;;  %v4071_v12 = vpop.f32.mrf.mxu0  ;;  %v6854_v2 = vld [vmem:[%s9816_s0 + $0x268] sm:$0xf0]  ;;  %v6853_v25 = vld [vmem:[%s9816_s0 + $0x260] sm:$0xf0] }
 0x3d7   :  { %v2731_v15 = vadd.f32 %v2730_v22, %v8206_v20  ;;  %v7048_v20 = vld [vmem:[%s9818_s3 + $0x60] sm:$0xff]  }
 0x3d8   :  { %v4646_v39 = vmax.f32 %v4582_v58, 0.0  ;;  %v4070_v30 = vadd.f32 %v4069_v47, %v3901_v51  ;;  %v6959_v0 = vunpack.c.l.bf16 %v7048_v20  ;;  %v6852_v58 = vld [vmem:[%s9816_s0 + $0x25c] sm:$0xf]  ;;  %v6325_v51 = vld [vmem:[%s9816_s0 + $0x264] sm:$0xf0] }
 0x3d9   :  { %v9312_v22 = vld [vmem:[%s9817_s2] ss:$0 sm:$0xff]  ;;  %v6328_v9 = vor.u32 %v6852_v58, %v6325_v51 }
 0x3da   :  { %4710 = vst [vmem:[%s9819_s4 + $0xa8] sm:$0xff] %v4646_v39  ;;  %v4196_v61 = vadd.f32 %v4070_v30, %v2729_v16 }
 0x3dc   :  { %v4260_v43 = vadd.f32 %v8839_v33, %v4196_v61 }
 0x3dd   :  { %v3733_v28 = vpop.f32.mrf.mxu2  ;;  %v3902_v4 = vpop.f32.mrf.mxu3 }
 0x3de   :  { %v4583_v19 = vadd.f32 %v6955_v17, %v4260_v43  ;;  %v3903_v26 = vadd.f32 %v3902_v4, %v3733_v28  ;;  %v2733_v52 = vpop.f32.mrf.mxu1  ;;  %v4074_v34 = vpop.f32.mrf.mxu0  ;;  %v6324_v17 = vor.u32 %v6853_v25, %v6323_v59  ;;  %v6960_v43 = vunpack.c.h.bf16 %v7048_v20 }
 0x3df   :  { %v2734_v21 = vadd.f32 %v2733_v52, %v8224_v27  ;;  %v6331_v27 = vld [vmem:[%s9816_s0 + $0x260] sm:$0xf] }
 0x3e0   :  { %v4647_v54 = vmax.f32 %v4583_v19, 0.0  ;;  %v4072_v60 = vadd.f32 %v4071_v12, %v3903_v26  ;;  %v6332_v30 = vor.u32 %v6854_v2, %v6331_v27 }
 0x3e1   :  { %2772 = vmatmul.bf16.gmra.mxu1 %v5664_v7  ;;  %4113 = vmatmul.bf16.gmra.mxu0 %v6320_v45 }
 0x3e2   :  { %4711 = vst [vmem:[%s9819_s4 + $0xb0] sm:$0xff] %v4647_v54  ;;  %v4197_v35 = vadd.f32 %v4072_v60, %v2731_v15  ;;  %3775 = vmatmul.bf16.gmra.mxu2 %v6312_v46  ;;  %3944 = vmatmul.bf16.gmra.mxu3 %v6316_v56  ;;  %v5687_v54 = vld [vmem:[%s9816_s0 + $0x248] sm:$0xf]  ;;  %v6617_v15 = vld [vmem:[%s9816_s0 + $0x250] sm:$0xf0] }
 0x3e3   :  { %v6335_v60 = vld [vmem:[%s9816_s0 + $0x270] sm:$0xf]  ;;  %v5688_v20 = vor.u32 %v6617_v15, %v5687_v54 }
 0x3e4   :  { %v4261_v32 = vadd.f32 %v8839_v33, %v4197_v35  ;;  %v6614_v33 = vld [vmem:[%s9816_s0 + $0x238] sm:$0xf0] }
 0x3e5   :  { %v3736_v42 = vpop.f32.mrf.mxu2  ;;  %v3905_v50 = vpop.f32.mrf.mxu3  ;;  %v5676_v16 = vor.u32 %v6614_v33, %v5675_v8 }
 0x3e6   :  { %v4584_v48 = vadd.f32 %v6956_v13, %v4261_v32  ;;  %v3906_v31 = vadd.f32 %v3905_v50, %v3736_v42  ;;  %v2735_v47 = vpop.f32.mrf.mxu1  ;;  %v4076_v55 = vpop.f32.mrf.mxu0  ;;  %v6857_v32 = vld [vmem:[%s9816_s0 + $0x280] sm:$0xf0]  ;;  %v6856_v42 = vld [vmem:[%s9816_s0 + $0x278] sm:$0xf0]  ;;  %v6855_v50 = vld [vmem:[%s9816_s0 + $0x274] sm:$0xf] }
 0x3e7   :  { %v2736_v18 = vadd.f32 %v2735_v47, %v8236_v23  ;;  %v7049_v23 = vld [vmem:[%s9818_s3 + $0x68] sm:$0xff]   ;;  %v6336_v59 = vor.u32 %v6856_v42, %v6335_v60 }
 0x3e8   :  { %v4648_v40 = vmax.f32 %v4584_v48, 0.0  ;;  %v4075_v62 = vadd.f32 %v4074_v34, %v3906_v31  ;;  %v6963_v13 = vunpack.c.l.bf16 %v7049_v23  ;;  %v6337_v48 = vld [vmem:[%s9816_s0 + $0x27c] sm:$0xf0]  ;;  %v6964_v58 = vunpack.c.h.bf16 %v7049_v23 }
 0x3ea   :  { %4712 = vst [vmem:[%s9819_s4 + $0xb8] sm:$0xff] %v4648_v40  ;;  %v4198_v37 = vadd.f32 %v4075_v62, %v2734_v21 }
 0x3ec   :  { %v4262_v12 = vadd.f32 %v9312_v22, %v4198_v37  ;;  %v6340_v37 = vor.u32 %v6855_v50, %v6337_v48 }
 0x3ed   :  { %v3738_v14 = vpop.f32.mrf.mxu2  ;;  %v3907_v39 = vpop.f32.mrf.mxu3 }
 0x3ee   :  { %v4585_v11 = vadd.f32 %v6959_v0, %v4262_v12  ;;  %v3908_v36 = vadd.f32 %v3907_v39, %v3738_v14  ;;  %v2738_v53 = vpop.f32.mrf.mxu1  ;;  %v4079_v61 = vpop.f32.mrf.mxu0 }
 0x3ef   :  { %v2739_v46 = vadd.f32 %v2738_v53, %v8254_v44  ;;  %v6343_v44 = vld [vmem:[%s9816_s0 + $0x278] sm:$0xf] }
 0x3f0   :  { %v4649_v1 = vmax.f32 %v4585_v11, 0.0  ;;  %v4077_v10 = vadd.f32 %v4076_v55, %v3908_v36  ;;  %v6344_v40 = vor.u32 %v6857_v32, %v6343_v44 }
 0x3f1   :  { %2777 = vmatmul.bf16.gmra.mxu1 %v5676_v16  ;;  %4118 = vmatmul.bf16.gmra.mxu0 %v6332_v30 }
 0x3f2   :  { %4713 = vst [vmem:[%s9819_s4 + $0xc0] sm:$0xff] %v4649_v1  ;;  %v4199_v29 = vadd.f32 %v4077_v10, %v2736_v18  ;;  %3780 = vmatmul.bf16.gmra.mxu2 %v6324_v17  ;;  %3949 = vmatmul.bf16.gmra.mxu3 %v6328_v9  ;;  %v5699_v17 = vld [vmem:[%s9816_s0 + $0x260] sm:$0xf]  ;;  %v6620_v9 = vld [vmem:[%s9816_s0 + $0x268] sm:$0xf0] }
 0x3f3   :  { %v6347_v1 = vld [vmem:[%s9816_s0 + $0x288] sm:$0xf] }
 0x3f4   :  { %v4263_v28 = vadd.f32 %v9312_v22, %v4199_v29  ;;  %v6860_v29 = vld [vmem:[%s9816_s0 + $0x298] sm:$0xf0] }
 0x3f5   :  { %v3741_v4 = vpop.f32.mrf.mxu2  ;;  %v3910_v7 = vpop.f32.mrf.mxu3 }
 0x3f6   :  { %v4586_v45 = vadd.f32 %v6960_v43, %v4263_v28  ;;  %v3911_v19 = vadd.f32 %v3910_v7, %v3741_v4  ;;  %v2740_v26 = vpop.f32.mrf.mxu1  ;;  %v4081_v52 = vpop.f32.mrf.mxu0  ;;  %v6859_v43 = vld [vmem:[%s9816_s0 + $0x290] sm:$0xf0]  ;;  %v6858_v28 = vld [vmem:[%s9816_s0 + $0x28c] sm:$0xf]  ;;  %v6349_v4 = vld [vmem:[%s9816_s0 + $0x294] sm:$0xf0] }
 0x3f7   :  { %v2741_v27 = vadd.f32 %v2740_v26, %v8272_v3  ;;  %v7050_v3 = vld [vmem:[%s9818_s3 + $0x70] sm:$0xff]   ;;  %v5700_v26 = vor.u32 %v6620_v9, %v5699_v17  ;;  %v6348_v54 = vor.u32 %v6859_v43, %v6347_v1  ;;  %v6352_v15 = vor.u32 %v6858_v28, %v6349_v4 }
 0x3f8   :  { %v4650_v34 = vmax.f32 %v4586_v45, 0.0  ;;  %v4080_v56 = vadd.f32 %v4079_v61, %v3911_v19  ;;  %v6967_v10 = vunpack.c.l.bf16 %v7050_v3  ;;  %v6968_v32 = vunpack.c.h.bf16 %v7050_v3 }
 0x3fa   :  { %4714 = vst [vmem:[%s9819_s4 + $0xc8] sm:$0xff] %v4650_v34  ;;  %v4200_v35 = vadd.f32 %v4080_v56, %v2739_v46 }
 0x3fc   :  { %v4264_v31 = vadd.f32 %v9312_v22, %v4200_v35 }
 0x3fd   :  { %v3743_v47 = vpop.f32.mrf.mxu2  ;;  %v3912_v55 = vpop.f32.mrf.mxu3 }
 0x3fe   :  { %v4587_v21 = vadd.f32 %v6963_v13, %v4264_v31  ;;  %v3913_v62 = vadd.f32 %v3912_v55, %v3743_v47  ;;  %v2743_v8 = vpop.f32.mrf.mxu1  ;;  %v4084_v33 = vpop.f32.mrf.mxu0 }
 0x3ff   :  { %v2744_v53 = vadd.f32 %v2743_v8, %v8296_v5  ;;  %v6355_v5 = vld [vmem:[%s9816_s0 + $0x290] sm:$0xf]  ;;  %v5711_v8 = vld [vmem:[%s9816_s0 + $0x278] sm:$0xf] }
 0x400   :  { %v4651_v0 = vmax.f32 %v4587_v21, 0.0  ;;  %v4082_v2 = vadd.f32 %v4081_v52, %v3913_v62  ;;  %v6356_v52 = vor.u32 %v6860_v29, %v6355_v5 }
 0x401   :  { %2782 = vmatmul.bf16.gmra.mxu1 %v5688_v20  ;;  %4123 = vmatmul.bf16.gmra.mxu0 %v6344_v40 }
 0x402   :  { %4715 = vst [vmem:[%s9819_s4 + $0xd0] sm:$0xff] %v4651_v0  ;;  %v4201_v25 = vadd.f32 %v4082_v2, %v2741_v27  ;;  %3785 = vmatmul.bf16.gmra.mxu2 %v6336_v59  ;;  %3954 = vmatmul.bf16.gmra.mxu3 %v6340_v37  ;;  %v6359_v59 = vld [vmem:[%s9816_s0 + $0x2a0] sm:$0xf]  ;;  %v6863_v27 = vld [vmem:[%s9816_s0 + $0x2b0] sm:$0xf0] }
 0x403   :  { %v6862_v2 = vld [vmem:[%s9816_s0 + $0x2a8] sm:$0xf0] }
 0x404   :  { %v4265_v51 = vadd.f32 %v9312_v22, %v4201_v25  ;;  %v6861_v25 = vld [vmem:[%s9816_s0 + $0x2a4] sm:$0xf] }
 0x405   :  { %v3746_v12 = vpop.f32.mrf.mxu2  ;;  %v3915_v14 = vpop.f32.mrf.mxu3 }
 0x406   :  { %v4588_v39 = vadd.f32 %v6964_v58, %v4265_v51  ;;  %v3916_v16 = vadd.f32 %v3915_v14, %v3746_v12  ;;  %v2745_v30 = vpop.f32.mrf.mxu1  ;;  %v4086_v11 = vpop.f32.mrf.mxu0  ;;  %v6361_v58 = vld [vmem:[%s9816_s0 + $0x2ac] sm:$0xf0] }
 0x407   :  { %v2746_v35 = vadd.f32 %v2745_v30, %v8308_v63  ;;  %v7051_v63 = vld [vmem:[%s9818_s3 + $0x78] sm:$0xff]  }
 0x408   :  { %v4652_v36 = vmax.f32 %v4588_v39, 0.0  ;;  %v4085_v61 = vadd.f32 %v4084_v33, %v3916_v16  ;;  %v6623_v33 = vld [vmem:[%s9816_s0 + $0x280] sm:$0xf0]  ;;  %v6971_v0 = vunpack.c.l.bf16 %v7051_v63 }
 0x409   :  { %v5712_v39 = vor.u32 %v6623_v33, %v5711_v8 }
 0x40a   :  { %4716 = vst [vmem:[%s9819_s4 + $0xd8] sm:$0xff] %v4652_v36  ;;  %v4202_v18 = vadd.f32 %v4085_v61, %v2744_v53  ;;  %v6360_v53 = vor.u32 %v6862_v2, %v6359_v59  ;;  %v6364_v61 = vor.u32 %v6861_v25, %v6361_v58 }
 0x40c   :  { %v4266_v7 = vadd.f32 %v9312_v22, %v4202_v18 }
 0x40d   :  { %v3748_v45 = vpop.f32.mrf.mxu2  ;;  %v3917_v19 = vpop.f32.mrf.mxu3 }
 0x40e   :  { %v4589_v23 = vadd.f32 %v6967_v10, %v4266_v7  ;;  %v3918_v34 = vadd.f32 %v3917_v19, %v3748_v45  ;;  %v2748_v46 = vpop.f32.mrf.mxu1  ;;  %v4089_v56 = vpop.f32.mrf.mxu0  ;;  %v6972_v10 = vunpack.c.h.bf16 %v7051_v63 }
 0x40f   :  { %v2749_v21 = vadd.f32 %v2748_v46, %v8326_v24  ;;  %v6367_v24 = vld [vmem:[%s9816_s0 + $0x2a8] sm:$0xf]  ;;  %v6371_v46 = vld [vmem:[%s9816_s0 + $0x2b8] sm:$0xf] }
 0x410   :  { %v4653_v60 = vmax.f32 %v4589_v23, 0.0  ;;  %v4087_v13 = vadd.f32 %v4086_v11, %v3918_v34  ;;  %v6368_v16 = vor.u32 %v6863_v27, %v6367_v24  ;;  %v5723_v23 = vld [vmem:[%s9816_s0 + $0x290] sm:$0xf]  ;;  %v6626_v34 = vld [vmem:[%s9816_s0 + $0x298] sm:$0xf0] }
 0x411   :  { %2787 = vmatmul.bf16.gmra.mxu1 %v5700_v26  ;;  %4128 = vmatmul.bf16.gmra.mxu0 %v6356_v52 }
 0x412   :  { %4717 = vst [vmem:[%s9819_s4 + $0xe0] sm:$0xff] %v4653_v60  ;;  %v4203_v44 = vadd.f32 %v4087_v13, %v2746_v35  ;;  %3790 = vmatmul.bf16.gmra.mxu2 %v6348_v54  ;;  %3959 = vmatmul.bf16.gmra.mxu3 %v6352_v15  ;;  %v6866_v15 = vld [vmem:[%s9816_s0 + $0x2c8] sm:$0xf0]  ;;  %v6865_v60 = vld [vmem:[%s9816_s0 + $0x2c0] sm:$0xf0] }
 0x413   :  { %v6864_v35 = vld [vmem:[%s9816_s0 + $0x2bc] sm:$0xf]  ;;  %v6373_v13 = vld [vmem:[%s9816_s0 + $0x2c4] sm:$0xf0]  ;;  %v6372_v63 = vor.u32 %v6865_v60, %v6371_v46 }
 0x414   :  { %v4267_v42 = vadd.f32 %v9312_v22, %v4203_v44 }
 0x415   :  { %v3751_v50 = vpop.f32.mrf.mxu2  ;;  %v3920_v48 = vpop.f32.mrf.mxu3 }
 0x416   :  { %v4590_v31 = vadd.f32 %v6968_v32, %v4267_v42  ;;  %v3921_v47 = vadd.f32 %v3920_v48, %v3751_v50  ;;  %v2750_v55 = vpop.f32.mrf.mxu1  ;;  %v4091_v20 = vpop.f32.mrf.mxu0  ;;  %v5724_v50 = vor.u32 %v6626_v34, %v5723_v23 }
 0x417   :  { %v2751_v9 = vadd.f32 %v2750_v55, %v8338_v6  ;;  %v7052_v6 = vld [vmem:[%s9818_s3 + $0x80] sm:$0xff]  }
 0x418   :  { %v4654_v40 = vmax.f32 %v4590_v31, 0.0  ;;  %v4090_v62 = vadd.f32 %v4089_v56, %v3921_v47  ;;  %v6975_v54 = vunpack.c.l.bf16 %v7052_v6  ;;  %v6976_v59 = vunpack.c.h.bf16 %v7052_v6 }
 0x41a   :  { %4718 = vst [vmem:[%s9819_s4 + $0xe8] sm:$0xff] %v4654_v40  ;;  %v4204_v37 = vadd.f32 %v4090_v62, %v2749_v21  ;;  %v6376_v40 = vor.u32 %v6864_v35, %v6373_v13  ;;  %v9898_v13 = vld [vmem:[#allocation28_spill] sm:$0xff] }
 0x41c   :  { %v4268_v51 = vadd.f32 %v9312_v22, %v4204_v37 }
 0x41d   :  { %v3753_v12 = vpop.f32.mrf.mxu2  ;;  %v3922_v14 = vpop.f32.mrf.mxu3 }
 0x41e   :  { %v4591_v30 = vadd.f32 %v6971_v0, %v4268_v51  ;;  %v3923_v11 = vadd.f32 %v3922_v14, %v3753_v12  ;;  %v2753_v3 = vpop.f32.mrf.mxu1  ;;  %v4094_v36 = vpop.f32.mrf.mxu0 }
 0x41f   :  { %v2754_v26 = vadd.f32 %v2753_v3, %v8356_v41  ;;  %v6379_v41 = vld [vmem:[%s9816_s0 + $0x2c0] sm:$0xf] }
 0x420   :  { %v4655_v17 = vmax.f32 %v4591_v30, 0.0  ;;  %v4092_v1 = vadd.f32 %v4091_v20, %v3923_v11  ;;  %v6380_v48 = vor.u32 %v6866_v15, %v6379_v41  ;;  %v6383_v30 = vld [vmem:[%s9816_s0 + $0x2d0] sm:$0xf] }
 0x421   :  { %2792 = vmatmul.bf16.gmra.mxu1 %v5712_v39  ;;  %4133 = vmatmul.bf16.gmra.mxu0 %v6368_v16  ;;  %v5735_v39 = vld [vmem:[%s9816_s0 + $0x2a8] sm:$0xf]  ;;  %v6629_v16 = vld [vmem:[%s9816_s0 + $0x2b0] sm:$0xf0] }
 0x422   :  { %4719 = vst [vmem:[%s9819_s4 + $0xf0] sm:$0xff] %v4655_v17  ;;  %v4205_v18 = vadd.f32 %v4092_v1, %v2751_v9  ;;  %3795 = vmatmul.bf16.gmra.mxu2 %v6360_v53  ;;  %3964 = vmatmul.bf16.gmra.mxu3 %v6364_v61  ;;  %v6868_v53 = vld [vmem:[%s9816_s0 + $0x2d8] sm:$0xf0]  ;;  %v6867_v61 = vld [vmem:[%s9816_s0 + $0x2d4] sm:$0xf] }
 0x423   :  { %v6385_v17 = vld [vmem:[%s9816_s0 + $0x2dc] sm:$0xf0] }
 0x424   :  { %v4269_v5 = vadd.f32 %v9312_v22, %v4205_v18 }
 0x425   :  { %v3756_v29 = vpop.f32.mrf.mxu2  ;;  %v3925_v43 = vpop.f32.mrf.mxu3 }
 0x426   :  { %v4592_v28 = vadd.f32 %v6972_v10, %v4269_v5  ;;  %v3926_v4 = vadd.f32 %v3925_v43, %v3756_v29  ;;  %v2755_v7 = vpop.f32.mrf.mxu1  ;;  %v4096_v45 = vpop.f32.mrf.mxu0  ;;  %v5736_v10 = vor.u32 %v6629_v16, %v5735_v39 }
 0x427   :  { %v2756_v62 = vadd.f32 %v2755_v7, %v8368_v57  ;;  %v7053_v57 = vld [vmem:[%s9818_s3 + $0x88] sm:$0xff]   ;;  %v6384_v7 = vor.u32 %v6868_v53, %v6383_v30 }
 0x428   :  { %v4656_v19 = vmax.f32 %v4592_v28, 0.0  ;;  %v4095_v52 = vadd.f32 %v4094_v36, %v3926_v4  ;;  %v6979_v3 = vunpack.c.l.bf16 %v7053_v57  ;;  %v6869_v36 = vld [vmem:[%s9816_s0 + $0x2e0] sm:$0xf0]  ;;  %v6980_v23 = vunpack.c.h.bf16 %v7053_v57 }
 0x42a   :  { %4720 = vst [vmem:[%s9819_s4 + $0xf8] sm:$0xff] %v4656_v19  ;;  %v4206_v56 = vadd.f32 %v4095_v52, %v2754_v26 }
 0x42c   :  { %v4270_v44 = vadd.f32 %v9312_v22, %v4206_v56 }
 0x42d   :  { %v3758_v32 = vpop.f32.mrf.mxu2  ;;  %v3927_v42 = vpop.f32.mrf.mxu3 }
 0x42e   :  { %v4593_v31 = vadd.f32 %v6975_v54, %v4270_v44  ;;  %v3928_v47 = vadd.f32 %v3927_v42, %v3758_v32  ;;  %v2758_v55 = vpop.f32.mrf.mxu1  ;;  %v4099_v20 = vpop.f32.mrf.mxu0  ;;  %v5747_v42 = vld [vmem:[%s9816_s0 + $0x2c0] sm:$0xf] }
 0x42f   :  { %v2759_v12 = vadd.f32 %v2758_v55, %v8386_v49  ;;  %v6391_v49 = vld [vmem:[%s9816_s0 + $0x2d8] sm:$0xf]  ;;  %v6403_v55 = vld [vmem:[%s9816_s0 + $0x2f0] sm:$0xf] }
 0x430   :  { %v4657_v21 = vmax.f32 %v4593_v31, 0.0  ;;  %v4097_v8 = vadd.f32 %v4096_v45, %v3928_v47  ;;  %v6392_v5 = vor.u32 %v6869_v36, %v6391_v49  ;;  %v6388_v45 = vor.u32 %v6867_v61, %v6385_v17  ;;  %v7055_v17 = vld [vmem:[%s9818_s3 + $0x98] sm:$0xff]  }
 0x431   :  { %2797 = vmatmul.bf16.gmra.mxu1 %v5724_v50  ;;  %4138 = vmatmul.bf16.gmra.mxu0 %v6380_v48  ;;  %v6632_v50 = vld [vmem:[%s9816_s0 + $0x2c8] sm:$0xf0]  ;;  %v6395_v48 = vld [vmem:[%s9816_s0 + $0x2e8] sm:$0xf] }
 0x432   :  { %4721 = vst [vmem:[%s9819_s4 + $0x100] sm:$0xff] %v4657_v21  ;;  %v4207_v33 = vadd.f32 %v4097_v8, %v2756_v62  ;;  %3800 = vmatmul.bf16.gmra.mxu2 %v6372_v63  ;;  %3969 = vmatmul.bf16.gmra.mxu3 %v6376_v40  ;;  %v6871_v63 = vld [vmem:[%s9816_s0 + $0x2f0] sm:$0xf0]  ;;  %v6870_v40 = vld [vmem:[%s9816_s0 + $0x2ec] sm:$0xf] }
 0x433   :  { %v6397_v21 = vld [vmem:[%s9816_s0 + $0x2f4] sm:$0xf0] }
 0x434   :  { %v4271_v37 = vadd.f32 %v9312_v22, %v4207_v33 }
 0x435   :  { %v3761_v0 = vpop.f32.mrf.mxu2  ;;  %v3930_v24 = vpop.f32.mrf.mxu3 }
 0x436   :  { %v4594_v27 = vadd.f32 %v6976_v59, %v4271_v37  ;;  %v3931_v2 = vadd.f32 %v3930_v24, %v3761_v0  ;;  %v2760_v25 = vpop.f32.mrf.mxu1  ;;  %v4101_v58 = vpop.f32.mrf.mxu0  ;;  %v5748_v59 = vor.u32 %v6632_v50, %v5747_v42 }
 0x437   :  { %v2761_v19 = vadd.f32 %v2760_v25, %v8404_v38  ;;  %v7054_v38 = vld [vmem:[%s9818_s3 + $0x90] sm:$0xff]   ;;  %v6396_v25 = vor.u32 %v6871_v63, %v6395_v48  ;;  %v6988_v48 = vunpack.c.h.bf16 %v7055_v17 }
 0x438   :  { %v4658_v51 = vmax.f32 %v4594_v27, 0.0  ;;  %v4100_v14 = vadd.f32 %v4099_v20, %v3931_v2  ;;  %v6983_v47 = vunpack.c.l.bf16 %v7054_v38  ;;  %v6872_v20 = vld [vmem:[%s9816_s0 + $0x2f8] sm:$0xf0]  ;;  %v6984_v16 = vunpack.c.h.bf16 %v7054_v38 }
 0x439   :  { %v6404_v37 = vor.u32 %v6872_v20, %v6403_v55 }
 0x43a   :  { %4722 = vst [vmem:[%s9819_s4 + $0x108] sm:$0xff] %v4658_v51  ;;  %v4208_v11 = vadd.f32 %v4100_v14, %v2759_v12  ;;  %v9899_v51 = vld [vmem:[#allocation29_spill] sm:$0xff] }
 0x43c   :  { %v4272_v9 = vadd.f32 %v9312_v22, %v4208_v11 }
 0x43d   :  { %v3763_v1 = vpop.f32.mrf.mxu2  ;;  %v3932_v18 = vpop.f32.mrf.mxu3 }
 0x43e   :  { %v4595_v29 = vadd.f32 %v6979_v3, %v4272_v9  ;;  %v3933_v43 = vadd.f32 %v3932_v18, %v3763_v1  ;;  %v2763_v28 = vpop.f32.mrf.mxu1  ;;  %v4104_v4 = vpop.f32.mrf.mxu0  ;;  %v9900_v1 = vld [vmem:[#allocation30_spill] sm:$0xff] }
 0x43f   :  { %v2764_v44 = vadd.f32 %v2763_v28, %v9898_v13 }
 0x440   :  { %v4659_v6 = vmax.f32 %v4595_v29, 0.0  ;;  %v4102_v26 = vadd.f32 %v4101_v58, %v3933_v43  ;;  %v6400_v58 = vor.u32 %v6870_v40, %v6397_v21  ;;  %v6635_v29 = vld [vmem:[%s9816_s0 + $0x2e0] sm:$0xf0]  ;;  %v6407_v43 = vld [vmem:[%s9816_s0 + $0x300] sm:$0xf] }
 0x441   :  { %2802 = vmatmul.bf16.gmra.mxu1 %v5736_v10  ;;  %4143 = vmatmul.bf16.gmra.mxu0 %v6392_v5  ;;  %v5759_v5 = vld [vmem:[%s9816_s0 + $0x2d8] sm:$0xf] }
 0x442   :  { %4723 = vst [vmem:[%s9819_s4 + $0x110] sm:$0xff] %v4659_v6  ;;  %v4209_v52 = vadd.f32 %v4102_v26, %v2761_v19  ;;  %3805 = vmatmul.bf16.gmra.mxu2 %v6384_v7  ;;  %3974 = vmatmul.bf16.gmra.mxu3 %v6388_v45  ;;  %v6415_v7 = vld [vmem:[%s9816_s0 + $0x308] sm:$0xf]  ;;  %v6875_v45 = vld [vmem:[%s9816_s0 + $0x310] sm:$0xf0] }
 0x443   :  { %v6874_v6 = vld [vmem:[%s9816_s0 + $0x308] sm:$0xf0]  ;;  %v6873_v19 = vld [vmem:[%s9816_s0 + $0x304] sm:$0xf]  ;;  %v6409_v26 = vld [vmem:[%s9816_s0 + $0x30c] sm:$0xf0] }
 0x444   :  { %v4273_v34 = vadd.f32 %v9312_v22, %v4209_v52  ;;  %v6408_v38 = vor.u32 %v6874_v6, %v6407_v43 }
 0x445   :  { %v3766_v46 = vpop.f32.mrf.mxu2  ;;  %v3935_v56 = vpop.f32.mrf.mxu3 }
 0x446   :  { %v4596_v54 = vadd.f32 %v6980_v23, %v4273_v34  ;;  %v3936_v41 = vadd.f32 %v3935_v56, %v3766_v46  ;;  %v2765_v15 = vpop.f32.mrf.mxu1  ;;  %v4106_v60 = vpop.f32.mrf.mxu0  ;;  %v5760_v46 = vor.u32 %v6635_v29, %v5759_v5  ;;  %v6416_v56 = vor.u32 %v6875_v45, %v6415_v7 }
 0x447   :  { %v2766_v12 = vadd.f32 %v2765_v15, %v9899_v51  ;;  %v6877_v51 = vld [vmem:[%s9816_s0 + $0x320] sm:$0xf0] }
 0x448   :  { %v4660_v35 = vmax.f32 %v4596_v54, 0.0  ;;  %v4105_v32 = vadd.f32 %v4104_v4, %v3936_v41  ;;  %v6987_v4 = vunpack.c.l.bf16 %v7055_v17 }
 0x44a   :  { %4724 = vst [vmem:[%s9819_s4 + $0x118] sm:$0xff] %v4660_v35  ;;  %v4210_v31 = vadd.f32 %v4105_v32, %v2764_v44  ;;  %v6412_v35 = vor.u32 %v6873_v19, %v6409_v26  ;;  %v9901_v44 = vld [vmem:[#allocation31_spill] sm:$0xff] }
 0x44c   :  { %v4274_v62 = vadd.f32 %v9312_v22, %v4210_v31 }
 0x44d   :  { %v3768_v8 = vpop.f32.mrf.mxu2  ;;  %v3937_v33 = vpop.f32.mrf.mxu3 }
 0x44e   :  { %v4597_v0 = vadd.f32 %v6983_v47, %v4274_v62  ;;  %v3938_v24 = vadd.f32 %v3937_v33, %v3768_v8  ;;  %v2768_v27 = vpop.f32.mrf.mxu1  ;;  %v4109_v2 = vpop.f32.mrf.mxu0  ;;  %v7056_v62 = vld [vmem:[%s9818_s3 + $0xa0] sm:$0xff]  }
 0x44f   :  { %v2769_v18 = vadd.f32 %v2768_v27, %v9900_v1  ;;  %v9902_v33 = vld [vmem:[#allocation11_spill] sm:$0xff]  ;;  %v6419_v27 = vld [vmem:[%s9816_s0 + $0x318] sm:$0xf]  ;;  %v6992_v43 = vunpack.c.h.bf16 %v7056_v62 }
 0x450   :  { %v4661_v57 = vmax.f32 %v4597_v0, 0.0  ;;  %v4107_v14 = vadd.f32 %v4106_v60, %v3938_v24  ;;  %v5771_v0 = vld [vmem:[%s9816_s0 + $0x2f0] sm:$0xf]  ;;  %v6638_v24 = vld [vmem:[%s9816_s0 + $0x2f8] sm:$0xf0]  ;;  %v6420_v17 = vor.u32 %v6877_v51, %v6419_v27 }
 0x451   :  { %2807 = vmatmul.bf16.gmra.mxu1 %v5748_v59  ;;  %4148 = vmatmul.bf16.gmra.mxu0 %v6404_v37 }
 0x452   :  { %4725 = vst [vmem:[%s9819_s4 + $0x120] sm:$0xff] %v4661_v57  ;;  %v4211_v39 = vadd.f32 %v4107_v14, %v2766_v12  ;;  %3810 = vmatmul.bf16.gmra.mxu2 %v6396_v25  ;;  %3979 = vmatmul.bf16.gmra.mxu3 %v6400_v58  ;;  %v6991_v25 = vunpack.c.l.bf16 %v7056_v62  ;;  %v6427_v58 = vld [vmem:[%s9816_s0 + $0x320] sm:$0xf]  ;;  %v6878_v57 = vld [vmem:[%s9816_s0 + $0x328] sm:$0xf0] }
 0x453   :  { %v6876_v12 = vld [vmem:[%s9816_s0 + $0x31c] sm:$0xf]  ;;  %v6421_v14 = vld [vmem:[%s9816_s0 + $0x324] sm:$0xf0] }
 0x454   :  { %v4275_v30 = vadd.f32 %v9312_v22, %v4211_v39 }
 0x455   :  { %v3771_v11 = vpop.f32.mrf.mxu2  ;;  %v3940_v3 = vpop.f32.mrf.mxu3 }
 0x456   :  { %v4598_v49 = vadd.f32 %v6984_v16, %v4275_v30  ;;  %v3941_v36 = vadd.f32 %v3940_v3, %v3771_v11  ;;  %v2770_v53 = vpop.f32.mrf.mxu1  ;;  %v4111_v61 = vpop.f32.mrf.mxu0  ;;  %v5772_v11 = vor.u32 %v6638_v24, %v5771_v0  ;;  %v6428_v3 = vor.u32 %v6878_v57, %v6427_v58 }
 0x457   :  { %v2771_v32 = vadd.f32 %v2770_v53, %v9901_v44  ;;  %v6880_v44 = vld [vmem:[%s9816_s0 + $0x338] sm:$0xf0] }
 0x458   :  { %v4662_v9 = vmax.f32 %v4598_v49, 0.0  ;;  %v4110_v10 = vadd.f32 %v4109_v2, %v3941_v36 }
 0x45a   :  { %4726 = vst [vmem:[%s9819_s4 + $0x128] sm:$0xff] %v4662_v9  ;;  %v4212_v28 = vadd.f32 %v4110_v10, %v2769_v18  ;;  %v6424_v9 = vor.u32 %v6876_v12, %v6421_v14  ;;  %v9903_v18 = vld [vmem:[#allocation13_spill] sm:$0xff] }
 0x45c   :  { %v4276_v52 = vadd.f32 %v9312_v22, %v4212_v28 }
 0x45d   :  { %v3773_v23 = vpop.f32.mrf.mxu2  ;;  %v3942_v34 = vpop.f32.mrf.mxu3 }
 0x45e   :  { %v4599_v54 = vadd.f32 %v6987_v4, %v4276_v52  ;;  %v3943_v41 = vadd.f32 %v3942_v34, %v3773_v23  ;;  %v2773_v15 = vpop.f32.mrf.mxu1  ;;  %v4114_v60 = vpop.f32.mrf.mxu0  ;;  %v7057_v52 = vld [vmem:[%s9818_s3 + $0xa8] sm:$0xff]   ;;  %v9904_v34 = vld [vmem:[#allocation15_spill] sm:$0xff] }
 0x45f   :  { %v2774_v59 = vadd.f32 %v2773_v15, %v9902_v33  ;;  %v6431_v15 = vld [vmem:[%s9816_s0 + $0x330] sm:$0xf]  ;;  %v6996_v27 = vunpack.c.h.bf16 %v7057_v52 }
 0x460   :  { %v4663_v13 = vmax.f32 %v4599_v54, 0.0  ;;  %v4112_v42 = vadd.f32 %v4111_v61, %v3943_v41  ;;  %v5783_v54 = vld [vmem:[%s9816_s0 + $0x308] sm:$0xf]  ;;  %v6641_v41 = vld [vmem:[%s9816_s0 + $0x310] sm:$0xf0]  ;;  %v6432_v62 = vor.u32 %v6880_v44, %v6431_v15 }
 0x461   :  { %2812 = vmatmul.bf16.gmra.mxu1 %v5760_v46  ;;  %4153 = vmatmul.bf16.gmra.mxu0 %v6416_v56 }
 0x462   :  { %4727 = vst [vmem:[%s9819_s4 + $0x130] sm:$0xff] %v4663_v13  ;;  %v4213_v50 = vadd.f32 %v4112_v42, %v2771_v32  ;;  %3815 = vmatmul.bf16.gmra.mxu2 %v6408_v38  ;;  %3984 = vmatmul.bf16.gmra.mxu3 %v6412_v35  ;;  %v6995_v38 = vunpack.c.l.bf16 %v7057_v52  ;;  %v6439_v35 = vld [vmem:[%s9816_s0 + $0x338] sm:$0xf]  ;;  %v6881_v13 = vld [vmem:[%s9816_s0 + $0x340] sm:$0xf0] }
 0x463   :  { %v6879_v32 = vld [vmem:[%s9816_s0 + $0x334] sm:$0xf]  ;;  %v6433_v42 = vld [vmem:[%s9816_s0 + $0x33c] sm:$0xf0] }
 0x464   :  { %v4277_v31 = vadd.f32 %v9312_v22, %v4213_v50 }
 0x465   :  { %v3776_v47 = vpop.f32.mrf.mxu2  ;;  %v3945_v55 = vpop.f32.mrf.mxu3 }
 0x466   :  { %v4600_v20 = vadd.f32 %v6988_v48, %v4277_v31  ;;  %v3946_v63 = vadd.f32 %v3945_v55, %v3776_v47  ;;  %v2775_v40 = vpop.f32.mrf.mxu1  ;;  %v4116_v21 = vpop.f32.mrf.mxu0  ;;  %v5784_v47 = vor.u32 %v6641_v41, %v5783_v54  ;;  %v6440_v55 = vor.u32 %v6881_v13, %v6439_v35 }
 0x467   :  { %v2776_v10 = vadd.f32 %v2775_v40, %v9903_v18  ;;  %v6883_v18 = vld [vmem:[%s9816_s0 + $0x350] sm:$0xf0] }
 0x468   :  { %v4664_v8 = vmax.f32 %v4600_v20, 0.0  ;;  %v4115_v37 = vadd.f32 %v4114_v60, %v3946_v63 }
 0x46a   :  { %4728 = vst [vmem:[%s9819_s4 + $0x138] sm:$0xff] %v4664_v8  ;;  %v4214_v2 = vadd.f32 %v4115_v37, %v2774_v59  ;;  %v6436_v8 = vor.u32 %v6879_v32, %v6433_v42  ;;  %v9905_v59 = vld [vmem:[#allocation17_spill] sm:$0xff] }
 0x46c   :  { %v4278_v39 = vadd.f32 %v9312_v22, %v4214_v2 }
 0x46d   :  { %v3778_v16 = vpop.f32.mrf.mxu2  ;;  %v3947_v30 = vpop.f32.mrf.mxu3 }
 0x46e   :  { %v4601_v49 = vadd.f32 %v6991_v25, %v4278_v39  ;;  %v3948_v36 = vadd.f32 %v3947_v30, %v3778_v16  ;;  %v2778_v53 = vpop.f32.mrf.mxu1  ;;  %v4119_v61 = vpop.f32.mrf.mxu0  ;;  %v7058_v39 = vld [vmem:[%s9818_s3 + $0xb0] sm:$0xff]   ;;  %v9906_v30 = vld [vmem:[#allocation19_spill] sm:$0xff] }
 0x46f   :  { %v2779_v46 = vadd.f32 %v2778_v53, %v9904_v34  ;;  %v6443_v53 = vld [vmem:[%s9816_s0 + $0x348] sm:$0xf]  ;;  %v7000_v15 = vunpack.c.h.bf16 %v7058_v39 }
 0x470   :  { %v4665_v1 = vmax.f32 %v4601_v49, 0.0  ;;  %v4117_v5 = vadd.f32 %v4116_v21, %v3948_v36  ;;  %v5795_v49 = vld [vmem:[%s9816_s0 + $0x320] sm:$0xf]  ;;  %v6644_v36 = vld [vmem:[%s9816_s0 + $0x328] sm:$0xf0]  ;;  %v6444_v52 = vor.u32 %v6883_v18, %v6443_v53 }
 0x471   :  { %2817 = vmatmul.bf16.gmra.mxu1 %v5772_v11  ;;  %4158 = vmatmul.bf16.gmra.mxu0 %v6428_v3 }
 0x472   :  { %4729 = vst [vmem:[%s9819_s4 + $0x140] sm:$0xff] %v4665_v1  ;;  %v4215_v29 = vadd.f32 %v4117_v5, %v2776_v10  ;;  %3820 = vmatmul.bf16.gmra.mxu2 %v6420_v17  ;;  %3989 = vmatmul.bf16.gmra.mxu3 %v6424_v9  ;;  %v6999_v17 = vunpack.c.l.bf16 %v7058_v39  ;;  %v6451_v9 = vld [vmem:[%s9816_s0 + $0x350] sm:$0xf]  ;;  %v6884_v1 = vld [vmem:[%s9816_s0 + $0x358] sm:$0xf0] }
 0x473   :  { %v6882_v10 = vld [vmem:[%s9816_s0 + $0x34c] sm:$0xf]  ;;  %v6445_v5 = vld [vmem:[%s9816_s0 + $0x354] sm:$0xf0] }
 0x474   :  { %v4279_v28 = vadd.f32 %v9312_v22, %v4215_v29 }
 0x475   :  { %v3781_v4 = vpop.f32.mrf.mxu2  ;;  %v3950_v7 = vpop.f32.mrf.mxu3 }
 0x476   :  { %v4602_v45 = vadd.f32 %v6992_v43, %v4279_v28  ;;  %v3951_v6 = vadd.f32 %v3950_v7, %v3781_v4  ;;  %v2780_v19 = vpop.f32.mrf.mxu1  ;;  %v4121_v26 = vpop.f32.mrf.mxu0  ;;  %v5796_v4 = vor.u32 %v6644_v36, %v5795_v49  ;;  %v6452_v7 = vor.u32 %v6884_v1, %v6451_v9  ;;  %v9910_v49 = vld [vmem:[#allocation3_spill] sm:$0xff] }
 0x477   :  { %v2781_v37 = vadd.f32 %v2780_v19, %v9905_v59 }
 0x478   :  { %v4666_v23 = vmax.f32 %v4602_v45, 0.0  ;;  %v4120_v56 = vadd.f32 %v4119_v61, %v3951_v6 }
 0x47a   :  { %4730 = vst [vmem:[%s9819_s4 + $0x148] sm:$0xff] %v4666_v23  ;;  %v4216_v60 = vadd.f32 %v4120_v56, %v2779_v46  ;;  %v6448_v23 = vor.u32 %v6882_v10, %v6445_v5  ;;  %v9907_v46 = vld [vmem:[#allocation21_spill] sm:$0xff] }
 0x47c   :  { %v4280_v50 = vadd.f32 %v9312_v22, %v4216_v60 }
 0x47d   :  { %v3783_v48 = vpop.f32.mrf.mxu2  ;;  %v3952_v31 = vpop.f32.mrf.mxu3 }
 0x47e   :  { %v4603_v20 = vadd.f32 %v6995_v38, %v4280_v50  ;;  %v3953_v63 = vadd.f32 %v3952_v31, %v3783_v48  ;;  %v2783_v40 = vpop.f32.mrf.mxu1  ;;  %v4124_v21 = vpop.f32.mrf.mxu0  ;;  %v7059_v50 = vld [vmem:[%s9818_s3 + $0xb8] sm:$0xff]   ;;  %v9908_v31 = vld [vmem:[#allocation23_spill] sm:$0xff] }
 0x47f   :  { %v2784_v11 = vadd.f32 %v2783_v40, %v9906_v30 }
 0x480   :  { %v4667_v33 = vmax.f32 %v4603_v20, 0.0  ;;  %v4122_v0 = vadd.f32 %v4121_v26, %v3953_v63  ;;  %v7003_v63 = vunpack.c.l.bf16 %v7059_v50 }
 0x481   :  { %2822 = vmatmul.bf16.gmra.mxu1 %v5784_v47  ;;  %4163 = vmatmul.bf16.gmra.mxu0 %v6440_v55 }
 0x482   :  { %4731 = vst [vmem:[%s9819_s4 + $0x150] sm:$0xff] %v4667_v33  ;;  %v4217_v24 = vadd.f32 %v4122_v0, %v2781_v37  ;;  %3825 = vmatmul.bf16.gmra.mxu2 %v6432_v62  ;;  %3994 = vmatmul.bf16.gmra.mxu3 %v6436_v8 }
 0x484   :  { %v4281_v2 = vadd.f32 %v9312_v22, %v4217_v24  ;;  %v9909_v24 = vld [vmem:[#allocation25_spill] sm:$0xff] }
 0x485   :  { %v3786_v25 = vpop.f32.mrf.mxu2  ;;  %v3955_v58 = vpop.f32.mrf.mxu3 }
 0x486   :  { %v4604_v57 = vadd.f32 %v6996_v27, %v4281_v2  ;;  %v3956_v51 = vadd.f32 %v3955_v58, %v3786_v25  ;;  %v2785_v12 = vpop.f32.mrf.mxu1  ;;  %v4126_v14 = vpop.f32.mrf.mxu0  ;;  %v7004_v58 = vunpack.c.h.bf16 %v7059_v50 }
 0x487   :  { %v2786_v56 = vadd.f32 %v2785_v12, %v9907_v46 }
 0x488   :  { %v4668_v16 = vmax.f32 %v4604_v57, 0.0  ;;  %v4125_v3 = vadd.f32 %v4124_v21, %v3956_v51 }
 0x48a   :  { %4732 = vst [vmem:[%s9819_s4 + $0x158] sm:$0xff] %v4668_v16  ;;  %v4218_v61 = vadd.f32 %v4125_v3, %v2784_v11  ;;  %v7060_v11 = vld [vmem:[%s9818_s3 + $0xc0] sm:$0xff]  }
 0x48c   :  { %v4282_v29 = vadd.f32 %v9312_v22, %v4218_v61 }
 0x48d   :  { %v3788_v43 = vpop.f32.mrf.mxu2  ;;  %v3957_v28 = vpop.f32.mrf.mxu3 }
 0x48e   :  { %v4605_v45 = vadd.f32 %v6999_v17, %v4282_v29  ;;  %v3958_v6 = vadd.f32 %v3957_v28, %v3788_v43  ;;  %v2788_v19 = vpop.f32.mrf.mxu1  ;;  %v4129_v26 = vpop.f32.mrf.mxu0  ;;  %v7007_v17 = vunpack.c.l.bf16 %v7060_v11 }
 0x48f   :  { %v2789_v47 = vadd.f32 %v2788_v19, %v9908_v31  ;;  %v7008_v19 = vunpack.c.h.bf16 %v7060_v11 }
 0x490   :  { %v4669_v34 = vmax.f32 %v4605_v45, 0.0  ;;  %v4127_v54 = vadd.f32 %v4126_v14, %v3958_v6 }
 0x491   :  { %2827 = vmatmul.bf16.gmra.mxu1 %v5796_v4  ;;  %4168 = vmatmul.bf16.gmra.mxu0 %v6452_v7  ;;  %v9911_v4 = vld [vmem:[#allocation4_spill] sm:$0xff] }
 0x492   :  { %4733 = vst [vmem:[%s9819_s4 + $0x160] sm:$0xff] %v4669_v34  ;;  %v4219_v41 = vadd.f32 %v4127_v54, %v2786_v56  ;;  %3830 = vmatmul.bf16.gmra.mxu2 %v6444_v52  ;;  %3999 = vmatmul.bf16.gmra.mxu3 %v6448_v23 }
 0x494   :  { %v4283_v60 = vadd.f32 %v9312_v22, %v4219_v41  ;;  %v7061_v41 = vld [vmem:[%s9818_s3 + $0xc8] sm:$0xff]  }
 0x495   :  { %v3791_v38 = vpop.f32.mrf.mxu2  ;;  %v3960_v35 = vpop.f32.mrf.mxu3 }
 0x496   :  { %v4606_v13 = vadd.f32 %v7000_v15, %v4283_v60  ;;  %v3961_v44 = vadd.f32 %v3960_v35, %v3791_v38  ;;  %v2790_v32 = vpop.f32.mrf.mxu1  ;;  %v4131_v42 = vpop.f32.mrf.mxu0  ;;  %v9912_v60 = vld [vmem:[#allocation5_spill] sm:$0xff] }
 0x497   :  { %v2791_v27 = vadd.f32 %v2790_v32, %v9909_v24 }
 0x498   :  { %v4670_v48 = vmax.f32 %v4606_v13, 0.0  ;;  %v4130_v55 = vadd.f32 %v4129_v26, %v3961_v44  ;;  %v9726_v44 = vld [vmem:[%s9817_s2] ss:$0 sm:$0xff] }
 0x49a   :  { %4734 = vst [vmem:[%s9819_s4 + $0x168] sm:$0xff] %v4670_v48  ;;  %v4220_v20 = vadd.f32 %v4130_v55, %v2789_v47 }
 0x49c   :  { %v4284_v40 = vadd.f32 %v9312_v22, %v4220_v20 }
 0x49d   :  { %v3793_v21 = vpop.f32.mrf.mxu2  ;;  %v3962_v62 = vpop.f32.mrf.mxu3 }
 0x49e   :  { %v4607_v8 = vadd.f32 %v7003_v63, %v4284_v40  ;;  %v3963_v33 = vadd.f32 %v3962_v62, %v3793_v21  ;;  %v2793_v59 = vpop.f32.mrf.mxu1  ;;  %v4134_v37 = vpop.f32.mrf.mxu0  ;;  %v9913_v63 = vld [vmem:[#allocation6_spill] sm:$0xff] }
 0x49f   :  { %v2794_v36 = vadd.f32 %v2793_v59, %v9910_v49 }
 0x4a0   :  { %v4671_v0 = vmax.f32 %v4607_v8, 0.0  ;;  %v4132_v2 = vadd.f32 %v4131_v42, %v3963_v33  ;;  %v7012_v8 = vunpack.c.h.bf16 %v7061_v41 }
 0x4a2   :  { %4735 = vst [vmem:[%s9819_s4 + $0x170] sm:$0xff] %v4671_v0  ;;  %v4221_v25 = vadd.f32 %v4132_v2, %v2791_v27 }
 0x4a4   :  { %v4285_v57 = vadd.f32 %v9312_v22, %v4221_v25  ;;  %v7062_v25 = vld [vmem:[%s9818_s3 + $0xd0] sm:$0xff]  }
 0x4a5   :  { %v3796_v51 = vpop.f32.mrf.mxu2  ;;  %v3965_v12 = vpop.f32.mrf.mxu3 }
 0x4a6   :  { %v4608_v14 = vadd.f32 %v7004_v58, %v4285_v57  ;;  %v3966_v39 = vadd.f32 %v3965_v12, %v3796_v51  ;;  %v2795_v16 = vpop.f32.mrf.mxu1  ;;  %v4136_v30 = vpop.f32.mrf.mxu0  ;;  %v9914_v57 = vld [vmem:[#allocation7_spill] sm:$0xff] }
 0x4a7   :  { %v2796_v7 = vadd.f32 %v2795_v16, %v9911_v4 }
 0x4a8   :  { %v4672_v3 = vmax.f32 %v4608_v14, 0.0  ;;  %v4135_v53 = vadd.f32 %v4134_v37, %v3966_v39  ;;  %v7015_v39 = vunpack.c.l.bf16 %v7062_v25 }
 0x4aa   :  { %4736 = vst [vmem:[%s9819_s4 + $0x178] sm:$0xff] %v4672_v3  ;;  %v4222_v61 = vadd.f32 %v4135_v53, %v2794_v36 }
 0x4ac   :  { %v4286_v9 = vadd.f32 %v9312_v22, %v4222_v61 }
 0x4ad   :  { %v3798_v1 = vpop.f32.mrf.mxu2  ;;  %v3967_v18 = vpop.f32.mrf.mxu3 }
 0x4ae   :  { %v4609_v10 = vadd.f32 %v7007_v17, %v4286_v9  ;;  %v3968_v5 = vadd.f32 %v3967_v18, %v3798_v1  ;;  %v2798_v29 = vpop.f32.mrf.mxu1  ;;  %v4139_v43 = vpop.f32.mrf.mxu0  ;;  %v9915_v17 = vld [vmem:[#allocation8_spill] sm:$0xff] }
 0x4af   :  { %v2799_v38 = vadd.f32 %v2798_v29, %v9912_v60 }
 0x4b0   :  { %v4673_v28 = vmax.f32 %v4609_v10, 0.0  ;;  %v4137_v45 = vadd.f32 %v4136_v30, %v3968_v5  ;;  %v7016_v10 = vunpack.c.h.bf16 %v7062_v25 }
 0x4b2   :  { %4737 = vst [vmem:[%s9819_s4 + $0x180] sm:$0xff] %v4673_v28  ;;  %v4223_v6 = vadd.f32 %v4137_v45, %v2796_v7 }
 0x4b4   :  { %v4287_v26 = vadd.f32 %v9312_v22, %v4223_v6  ;;  %v7011_v22 = vunpack.c.l.bf16 %v7061_v41  ;;  %v7063_v6 = vld [vmem:[%s9818_s3 + $0xd8] sm:$0xff]  }
 0x4b5   :  { %v3801_v52 = vpop.f32.mrf.mxu2  ;;  %v3970_v23 = vpop.f32.mrf.mxu3 }
 0x4b6   :  { %v4610_v34 = vadd.f32 %v7008_v19, %v4287_v26  ;;  %v3971_v46 = vadd.f32 %v3970_v23, %v3801_v52  ;;  %v2800_v56 = vpop.f32.mrf.mxu1  ;;  %v4141_v54 = vpop.f32.mrf.mxu0  ;;  %v9916_v26 = vld [vmem:[#allocation9_spill] sm:$0xff] }
 0x4b7   :  { %v2801_v40 = vadd.f32 %v2800_v56, %v9913_v63 }
 0x4b8   :  { %v4674_v15 = vmax.f32 %v4610_v34, 0.0  ;;  %v4140_v35 = vadd.f32 %v4139_v43, %v3971_v46  ;;  %v7019_v46 = vunpack.c.l.bf16 %v7063_v6 }
 0x4ba   :  { %4738 = vst [vmem:[%s9819_s4 + $0x188] sm:$0xff] %v4674_v15  ;;  %v4224_v13 = vadd.f32 %v4140_v35, %v2799_v38 }
 0x4bc   :  { %v4288_v32 = vadd.f32 %v9726_v44, %v4224_v13 }
 0x4bd   :  { %v3803_v42 = vpop.f32.mrf.mxu2  ;;  %v3972_v50 = vpop.f32.mrf.mxu3 }
 0x4be   :  { %v4611_v48 = vadd.f32 %v7011_v22, %v4288_v32  ;;  %v3973_v31 = vadd.f32 %v3972_v50, %v3803_v42  ;;  %v2803_v47 = vpop.f32.mrf.mxu1  ;;  %v4144_v55 = vpop.f32.mrf.mxu0  ;;  %v9917_v22 = vld [vmem:[#allocation10_spill] sm:$0xff] }
 0x4bf   :  { %v2804_v51 = vadd.f32 %v2803_v47, %v9914_v57 }
 0x4c0   :  { %v4675_v20 = vmax.f32 %v4611_v48, 0.0  ;;  %v4142_v21 = vadd.f32 %v4141_v54, %v3973_v31  ;;  %v7020_v48 = vunpack.c.h.bf16 %v7063_v6 }
 0x4c2   :  { %4739 = vst [vmem:[%s9819_s4 + $0x190] sm:$0xff] %v4675_v20  ;;  %v4225_v62 = vadd.f32 %v4142_v21, %v2801_v40 }
 0x4c4   :  { %v4289_v33 = vadd.f32 %v9726_v44, %v4225_v62  ;;  %v7064_v62 = vld [vmem:[%s9818_s3 + $0xe0] sm:$0xff]  }
 0x4c5   :  { %v3806_v59 = vpop.f32.mrf.mxu2  ;;  %v3975_v37 = vpop.f32.mrf.mxu3 }
 0x4c6   :  { %v4612_v0 = vadd.f32 %v7012_v8, %v4289_v33  ;;  %v3976_v24 = vadd.f32 %v3975_v37, %v3806_v59  ;;  %v2805_v27 = vpop.f32.mrf.mxu1  ;;  %v4146_v2 = vpop.f32.mrf.mxu0  ;;  %v9918_v33 = vld [vmem:[#allocation12_spill] sm:$0xff] }
 0x4c7   :  { %v2806_v9 = vadd.f32 %v2805_v27, %v9915_v17 }
 0x4c8   :  { %v4676_v58 = vmax.f32 %v4612_v0, 0.0  ;;  %v4145_v12 = vadd.f32 %v4144_v55, %v3976_v24  ;;  %v7023_v24 = vunpack.c.l.bf16 %v7064_v62 }
 0x4ca   :  { %4740 = vst [vmem:[%s9819_s4 + $0x198] sm:$0xff] %v4676_v58  ;;  %v4226_v14 = vadd.f32 %v4145_v12, %v2804_v51 }
 0x4cc   :  { %v4290_v16 = vadd.f32 %v9726_v44, %v4226_v14 }
 0x4cd   :  { %v3808_v30 = vpop.f32.mrf.mxu2  ;;  %v3977_v11 = vpop.f32.mrf.mxu3 }
 0x4ce   :  { %v4613_v3 = vadd.f32 %v7015_v39, %v4290_v16  ;;  %v3978_v49 = vadd.f32 %v3977_v11, %v3808_v30  ;;  %v2808_v36 = vpop.f32.mrf.mxu1  ;;  %v4149_v53 = vpop.f32.mrf.mxu0  ;;  %v9919_v39 = vld [vmem:[#allocation14_spill] sm:$0xff] }
 0x4cf   :  { %v2809_v52 = vadd.f32 %v2808_v36, %v9916_v26 }
 0x4d0   :  { %v4677_v61 = vmax.f32 %v4613_v3, 0.0  ;;  %v4147_v1 = vadd.f32 %v4146_v2, %v3978_v49  ;;  %v7024_v3 = vunpack.c.h.bf16 %v7064_v62 }
 0x4d2   :  { %4741 = vst [vmem:[%s9819_s4 + $0x1a0] sm:$0xff] %v4677_v61  ;;  %v4227_v18 = vadd.f32 %v4147_v1, %v2806_v9 }
 0x4d4   :  { %v4291_v5 = vadd.f32 %v9726_v44, %v4227_v18  ;;  %v7065_v18 = vld [vmem:[%s9818_s3 + $0xe8] sm:$0xff]  }
 0x4d5   :  { %v3811_v29 = vpop.f32.mrf.mxu2  ;;  %v3980_v43 = vpop.f32.mrf.mxu3 }
 0x4d6   :  { %v4614_v28 = vadd.f32 %v7016_v10, %v4291_v5  ;;  %v3981_v4 = vadd.f32 %v3980_v43, %v3811_v29  ;;  %v2810_v7 = vpop.f32.mrf.mxu1  ;;  %v4151_v45 = vpop.f32.mrf.mxu0  ;;  %v9920_v5 = vld [vmem:[#allocation16_spill] sm:$0xff] }
 0x4d7   :  { %v2811_v32 = vadd.f32 %v2810_v7, %v9917_v22 }
 0x4d8   :  { %v4678_v19 = vmax.f32 %v4614_v28, 0.0  ;;  %v4150_v23 = vadd.f32 %v4149_v53, %v3981_v4  ;;  %v7027_v4 = vunpack.c.l.bf16 %v7065_v18 }
 0x4da   :  { %4742 = vst [vmem:[%s9819_s4 + $0x1a8] sm:$0xff] %v4678_v19  ;;  %v4228_v34 = vadd.f32 %v4150_v23, %v2809_v52 }
 0x4dc   :  { %v4292_v56 = vadd.f32 %v9726_v44, %v4228_v34  ;;  %v9921_v34 = vld [vmem:[#allocation18_spill] sm:$0xff] }
 0x4dd   :  { %v3813_v54 = vpop.f32.mrf.mxu2  ;;  %v3982_v41 = vpop.f32.mrf.mxu3 }
 0x4de   :  { %v4615_v15 = vadd.f32 %v7019_v46, %v4292_v56  ;;  %v3983_v60 = vadd.f32 %v3982_v41, %v3813_v54  ;;  %v2813_v38 = vpop.f32.mrf.mxu1  ;;  %v4154_v35 = vpop.f32.mrf.mxu0 }
 0x4df   :  { %v2814_v59 = vadd.f32 %v2813_v38, %v9918_v33 }
 0x4e0   :  { %v4679_v13 = vmax.f32 %v4615_v15, 0.0  ;;  %v4152_v42 = vadd.f32 %v4151_v45, %v3983_v60  ;;  %v7028_v15 = vunpack.c.h.bf16 %v7065_v18 }
 0x4e2   :  { %4743 = vst [vmem:[%s9819_s4 + $0x1b0] sm:$0xff] %v4679_v13  ;;  %v4229_v50 = vadd.f32 %v4152_v42, %v2811_v32  ;;  %v7066_v32 = vld [vmem:[%s9818_s3 + $0xf0] sm:$0xff]  }
 0x4e4   :  { %v4293_v31 = vadd.f32 %v9726_v44, %v4229_v50  ;;  %v9922_v50 = vld [vmem:[#allocation20_spill] sm:$0xff] }
 0x4e5   :  { %v3816_v47 = vpop.f32.mrf.mxu2  ;;  %v3985_v55 = vpop.f32.mrf.mxu3 }
 0x4e6   :  { %v4616_v20 = vadd.f32 %v7020_v48, %v4293_v31  ;;  %v3986_v63 = vadd.f32 %v3985_v55, %v3816_v47  ;;  %v2815_v40 = vpop.f32.mrf.mxu1  ;;  %v4156_v21 = vpop.f32.mrf.mxu0 }
 0x4e7   :  { %v2816_v16 = vadd.f32 %v2815_v40, %v9919_v39 }
 0x4e8   :  { %v4680_v8 = vmax.f32 %v4616_v20, 0.0  ;;  %v4155_v37 = vadd.f32 %v4154_v35, %v3986_v63  ;;  %v7031_v20 = vunpack.c.l.bf16 %v7066_v32 }
 0x4ea   :  { %4744 = vst [vmem:[%s9819_s4 + $0x1b8] sm:$0xff] %v4680_v8  ;;  %v4230_v0 = vadd.f32 %v4155_v37, %v2814_v59  ;;  %v9923_v37 = vld [vmem:[#allocation22_spill] sm:$0xff] }
 0x4ec   :  { %v4294_v27 = vadd.f32 %v9726_v44, %v4230_v0 }
 0x4ed   :  { %v3818_v2 = vpop.f32.mrf.mxu2  ;;  %v3987_v25 = vpop.f32.mrf.mxu3 }
 0x4ee   :  { %v4617_v58 = vadd.f32 %v7023_v24, %v4294_v27  ;;  %v3988_v57 = vadd.f32 %v3987_v25, %v3818_v2  ;;  %v2818_v51 = vpop.f32.mrf.mxu1  ;;  %v4159_v12 = vpop.f32.mrf.mxu0  ;;  %v7032_v2 = vunpack.c.h.bf16 %v7066_v32 }
 0x4ef   :  { %v2819_v29 = vadd.f32 %v2818_v51, %v9920_v5 }
 0x4f0   :  { %v4681_v14 = vmax.f32 %v4617_v58, 0.0  ;;  %v4157_v30 = vadd.f32 %v4156_v21, %v3988_v57 }
 0x4f2   :  { %4745 = vst [vmem:[%s9819_s4 + $0x1c0] sm:$0xff] %v4681_v14  ;;  %v4231_v11 = vadd.f32 %v4157_v30, %v2816_v16  ;;  %v7067_v16 = vld [vmem:[%s9818_s3 + $0xf8] sm:$0xff]  }
 0x4f4   :  { %v4295_v49 = vadd.f32 %v9726_v44, %v4231_v11  ;;  %v9924_v11 = vld [vmem:[#allocation24_spill] sm:$0xff] }
 0x4f5   :  { %v3821_v36 = vpop.f32.mrf.mxu2  ;;  %v3990_v53 = vpop.f32.mrf.mxu3 }
 0x4f6   :  { %v4618_v61 = vadd.f32 %v7024_v3, %v4295_v49  ;;  %v3991_v17 = vadd.f32 %v3990_v53, %v3821_v36  ;;  %v2820_v9 = vpop.f32.mrf.mxu1  ;;  %v4161_v1 = vpop.f32.mrf.mxu0  ;;  %v7035_v53 = vunpack.c.l.bf16 %v7067_v16 }
 0x4f7   :  { %v2821_v46 = vadd.f32 %v2820_v9, %v9921_v34 }
 0x4f8   :  { %v4682_v10 = vmax.f32 %v4618_v61, 0.0  ;;  %v4160_v43 = vadd.f32 %v4159_v12, %v3991_v17 }
 0x4fa   :  { %4746 = vst [vmem:[%s9819_s4 + $0x1c8] sm:$0xff] %v4682_v10  ;;  %v4232_v28 = vadd.f32 %v4160_v43, %v2819_v29  ;;  %v9925_v43 = vld [vmem:[#allocation26_spill] sm:$0xff] }
 0x4fc   :  { %v4296_v7 = vadd.f32 %v9726_v44, %v4232_v28 }
 0x4fd   :  { %v3823_v45 = vpop.f32.mrf.mxu2  ;;  %v3992_v6 = vpop.f32.mrf.mxu3 }
 0x4fe   :  { %v4619_v19 = vadd.f32 %v7027_v4, %v4296_v7  ;;  %v3993_v26 = vadd.f32 %v3992_v6, %v3823_v45  ;;  %v2823_v52 = vpop.f32.mrf.mxu1  ;;  %v4164_v54 = vpop.f32.mrf.mxu0  ;;  %v7036_v45 = vunpack.c.h.bf16 %v7067_v16 }
 0x4ff   :  { %v2824_v48 = vadd.f32 %v2823_v52, %v9922_v50 }
 0x500   :  { %v4683_v23 = vmax.f32 %v4619_v19, 0.0  ;;  %v4162_v56 = vadd.f32 %v4161_v1, %v3993_v26 }
 0x502   :  { %4747 = vst [vmem:[%s9819_s4 + $0x1d0] sm:$0xff] %v4683_v23  ;;  %v4233_v41 = vadd.f32 %v4162_v56, %v2821_v46 }
 0x504   :  { %v4297_v60 = vadd.f32 %v9726_v44, %v4233_v41 }
 0x505   :  { %v3826_v38 = vpop.f32.mrf.mxu2  ;;  %v3995_v35 = vpop.f32.mrf.mxu3 }
 0x506   :  { %v4620_v13 = vadd.f32 %v7028_v15, %v4297_v60  ;;  %v3996_v22 = vadd.f32 %v3995_v35, %v3826_v38  ;;  %v2825_v47 = vpop.f32.mrf.mxu1  ;;  %v4166_v63 = vpop.f32.mrf.mxu0 }
 0x507   :  { %v2826_v0 = vadd.f32 %v2825_v47, %v9923_v37 }
 0x508   :  { %v4684_v42 = vmax.f32 %v4620_v13, 0.0  ;;  %v4165_v31 = vadd.f32 %v4164_v54, %v3996_v22 }
 0x50a   :  { %4748 = vst [vmem:[%s9819_s4 + $0x1d8] sm:$0xff] %v4684_v42  ;;  %v4234_v55 = vadd.f32 %v4165_v31, %v2824_v48 }
 0x50c   :  { %v4298_v40 = vadd.f32 %v9726_v44, %v4234_v55 }
 0x50d   :  { %v3828_v21 = vpop.f32.mrf.mxu2  ;;  %v3997_v62 = vpop.f32.mrf.mxu3 }
 0x50e   :  { %v4621_v8 = vadd.f32 %v7031_v20, %v4298_v40  ;;  %v3998_v33 = vadd.f32 %v3997_v62, %v3828_v21  ;;  %v2828_v25 = vpop.f32.mrf.mxu1  ;;  %v4169_v57 = vpop.f32.mrf.mxu0 }
 0x50f   :  { %v2829_v3 = vadd.f32 %v2828_v25, %v9924_v11 }
 0x510   :  { %v4685_v59 = vmax.f32 %v4621_v8, 0.0  ;;  %v4167_v24 = vadd.f32 %v4166_v63, %v3998_v33 }
 0x512   :  { %4749 = vst [vmem:[%s9819_s4 + $0x1e0] sm:$0xff] %v4685_v59  ;;  %v4235_v27 = vadd.f32 %v4167_v24, %v2826_v0 }
 0x514   :  { %v4299_v58 = vadd.f32 %v9726_v44, %v4235_v27 }
 0x515   :  { %v3831_v51 = vpop.f32.mrf.mxu2  ;;  %v4000_v12 = vpop.f32.mrf.mxu3 }
 0x516   :  { %v4622_v14 = vadd.f32 %v7032_v2, %v4299_v58  ;;  %v4001_v39 = vadd.f32 %v4000_v12, %v3831_v51  ;;  %v2830_v17 = vpop.f32.mrf.mxu1  ;;  %v4171_v5 = vpop.f32.mrf.mxu0 }
 0x517   :  { %v2831_v28 = vadd.f32 %v2830_v17, %v9925_v43 }
 0x518   :  { %v4686_v30 = vmax.f32 %v4622_v14, 0.0  ;;  %v4170_v49 = vadd.f32 %v4169_v57, %v4001_v39 }
 0x51a   :  { %4750 = vst [vmem:[%s9819_s4 + $0x1e8] sm:$0xff] %v4686_v30  ;;  %v4236_v36 = vadd.f32 %v4170_v49, %v2829_v3 }
 0x51c   :  { %v4300_v61 = vadd.f32 %v9726_v44, %v4236_v36 }
 0x51d   :  { %v3833_v9 = vpop.f32.mrf.mxu2  ;;  %v4002_v1 = vpop.f32.mrf.mxu3 }
 0x51e   :  { %v4623_v18 = vadd.f32 %v7035_v53, %v4300_v61  ;;  %v4003_v10 = vadd.f32 %v4002_v1, %v3833_v9 }
 0x520   :  { %v4687_v29 = vmax.f32 %v4623_v18, 0.0  ;;  %v4172_v4 = vadd.f32 %v4171_v5, %v4003_v10 }
 0x522   :  { %4751 = vst [vmem:[%s9819_s4 + $0x1f0] sm:$0xff] %v4687_v29  ;;  %v4237_v7 = vadd.f32 %v4172_v4, %v2831_v28 }
 0x524   :  { %v4301_v6 = vadd.f32 %v9726_v44, %v4237_v7 }
 0x526   :  { %v4624_v19 = vadd.f32 %v7036_v45, %v4301_v6 }
 0x528   :  { %v4688_v26 = vmax.f32 %v4624_v19, 0.0 }
 0x52a   :  { %4752 = vst [vmem:[%s9819_s4 + $0x1f8] sm:$0xff] %v4688_v26 }

</bundles_post_ra>
